<compile_context>
chip_gen: v7x
topology: tpu7x:2x2x1
jax: 0.10.0
libtpu: 0.0.40
codegen_flags: <defaults>
</compile_context>

<pallas_src>
import functools

import jax
import jax.numpy as jnp
import numpy as np
from jax import lax
from jax.experimental import pallas as pl
from jax.experimental.pallas import tpu as pltpu

EPS = 1e-5          # nn.BatchNorm2d default eps
NEG_SLOPE = 0.2     # LeakyReLU(0.2)
LANE = 128


def _round_up(x, m):
    return -(-x // m) * m


def _vmem_limit_bytes(shapes, dtype_bytes=4):
    """Rough scoped-VMEM budget: (sublane,lane)-padded block bytes, x2 for double
    buffering, plus headroom; clamped to [16 MiB, 64 MiB] (safe on v5e/v6e/v7x)."""
    def padded(shape):
        s = list(shape)
        s[-1] = _round_up(s[-1], 128)
        if len(s) >= 2:
            s[-2] = _round_up(s[-2], 8)
        n = dtype_bytes
        for d in s:
            n *= d
        return n
    need = 2 * sum(padded(s) for s in shapes) + (4 << 20)
    return int(min(max(need, 16 << 20), 64 << 20))


# --------------------------- Pallas kernels ---------------------------------

def _conv_stage_kernel(x_ref, scale_ref, shift_ref, w_ref, y_ref, st_ref, pad_sc,
                       *, normalize_input):
    """One batch sample:
         [optional fused BN scale/shift + LeakyReLU on the input]
         -> 3x3 'same' conv (9 MXU matmuls, first tap initializes the accumulator)
         -> per-channel partial (sum, sum of squares) for the two-phase BatchNorm.

    x_ref:  (1, H, W, C_in)     activation block (channels-last)
    scale_ref/shift_ref: (1, C_in)   fused BN affine for the input (stage 2 only)
    w_ref:  (9, C_in, C_out_p)  per-tap weights, output channels padded to 128
    y_ref:  (1, H*W, C_out_p)   raw conv output (lane-dense)
    st_ref: (1, 2, C_out_p)     per-sample partial sum / sumsq per channel
    pad_sc: (H+2, W+2, C_in)    VMEM scratch holding the zero-padded input activation
    """
    _, H, W, C = x_ref.shape
    HW = H * W

    a = x_ref[0]                                           # (H, W, C)
    if normalize_input:
        a = a * scale_ref[...] + shift_ref[...]            # fused BN affine
        a = jnp.where(a > 0, a, NEG_SLOPE * a)             # LeakyReLU(0.2)

    # Zero-padded activation in scratch.  Only the 1-pixel halo ring is (re)zeroed each
    # step (cheap, megacore-safe); the interior is fully overwritten exactly once.
    zrow = jnp.zeros((1, W + 2, C), a.dtype)
    pad_sc[0:1, :, :] = zrow
    pad_sc[H + 1:H + 2, :, :] = zrow
    zcol = jnp.zeros((H, 1, C), a.dtype)
    pad_sc[1:H + 1, 0:1, :] = zcol
    pad_sc[1:H + 1, W + 1:W + 2, :] = zcol
    pad_sc[1:H + 1, 1:W + 1, :] = a

    # 3x3 conv: 9 shifted (H*W, C) x (C, C_out_p) matmuls; first tap initializes acc.
    y = None
    for t in range(9):
        dy, dx = t // 3, t % 3
        patch = pad_sc[dy:dy + H, dx:dx + W, :].reshape(HW, C)
        contrib = jnp.dot(patch, w_ref[t], preferred_element_type=jnp.float32)
        y = contrib if y is None else y + contrib          # (HW, C_out_p) f32

    y_ref[0] = y.astype(y_ref.dtype)

    # Single-pass partial BN statistics (reduced across the batch in the wrapper).
    st_ref[0, 0:1, :] = jnp.sum(y, axis=0, keepdims=True)
    st_ref[0, 1:2, :] = jnp.sum(y * y, axis=0, keepdims=True)


def _affine_lrelu_kernel(y_ref, scale_ref, shift_ref, o_ref):
    """Per-channel BN scale/shift + LeakyReLU epilogue (lane-dense over channels)."""
    a = y_ref[0] * scale_ref[...] + shift_ref[...]         # (HW, C_p) * (1, C_p)
    o_ref[0] = jnp.where(a > 0, a, NEG_SLOPE * a).astype(o_ref.dtype)


# --------------------------- pallas_call wrappers ----------------------------

def _conv_stage(x_nhwc, scale, shift, w_taps, *, normalize_input):
    N, H, W, C = x_nhwc.shape
    Coutp = w_taps.shape[-1]
    HW = H * W
    kernel = functools.partial(_conv_stage_kernel, normalize_input=normalize_input)
    vmem_limit = _vmem_limit_bytes([
        (1, H, W, C), (1, C), (1, C), (9, C, Coutp),        # input blocks
        (1, HW, Coutp), (1, 2, Coutp),                      # output blocks
        (H + 2, W + 2, C), (HW, Coutp),                     # scratch + live accumulator
    ])
    return pl.pallas_call(
        kernel,
        grid=(N,),
        in_specs=[
            pl.BlockSpec((1, H, W, C), lambda n: (n, 0, 0, 0)),
            pl.BlockSpec((1, C), lambda n: (0, 0)),
            pl.BlockSpec((1, C), lambda n: (0, 0)),
            pl.BlockSpec((9, C, Coutp), lambda n: (0, 0, 0)),
        ],
        out_specs=(
            pl.BlockSpec((1, HW, Coutp), lambda n: (n, 0, 0)),
            pl.BlockSpec((1, 2, Coutp), lambda n: (n, 0, 0)),
        ),
        out_shape=(
            jax.ShapeDtypeStruct((N, HW, Coutp), jnp.float32),
            jax.ShapeDtypeStruct((N, 2, Coutp), jnp.float32),
        ),
        scratch_shapes=[pltpu.VMEM((H + 2, W + 2, C), jnp.float32)],
        compiler_params=pltpu.CompilerParams(
            dimension_semantics=("parallel",),
            vmem_limit_bytes=vmem_limit),
    )(x_nhwc, scale, shift, w_taps)


def _affine_lrelu(y, scale, shift):
    N, HW, Cp = y.shape
    vmem_limit = _vmem_limit_bytes([(1, HW, Cp), (1, Cp), (1, Cp), (1, HW, Cp)])
    return pl.pallas_call(
        _affine_lrelu_kernel,
        grid=(N,),
        in_specs=[
            pl.BlockSpec((1, HW, Cp), lambda n: (n, 0, 0)),
            pl.BlockSpec((1, Cp), lambda n: (0, 0)),
            pl.BlockSpec((1, Cp), lambda n: (0, 0)),
        ],
        out_specs=pl.BlockSpec((1, HW, Cp), lambda n: (n, 0, 0)),
        out_shape=jax.ShapeDtypeStruct((N, HW, Cp), jnp.float32),
        compiler_params=pltpu.CompilerParams(
            dimension_semantics=("parallel",),
            vmem_limit_bytes=vmem_limit),
    )(y, scale, shift)


# --------------------------- glue (plain JAX, tiny) ---------------------------

def _prep_weight(w, cin_p, cout_p):
    """(Cout, Cin, 3, 3) PyTorch layout -> (9, cin_p, cout_p), tap t = dy*3 + dx."""
    cout, cin = w.shape[0], w.shape[1]
    wt = jnp.transpose(w.astype(jnp.float32), (2, 3, 1, 0)).reshape(9, cin, cout)
    return jnp.pad(wt, ((0, 0), (0, cin_p - cin), (0, cout_p - cout)))


def _bn_scale_shift(partial_stats, gamma_p, beta_p, count):
    """Reduce per-sample (sum, sumsq) partials and fold BN into one scale/shift."""
    tot = jnp.sum(partial_stats.astype(jnp.float32), axis=0)      # (2, C_p)
    mean = tot[0] / count
    var = jnp.maximum(tot[1] / count - mean * mean, 0.0)          # biased (train-mode) var
    inv_std = lax.rsqrt(var + EPS)
    scale = gamma_p * inv_std
    shift = beta_p - mean * scale
    return scale.reshape(1, -1), shift.reshape(1, -1)


def conv_block_forward(x_nchw, params):
    """params = (w1, b1, g1, bt1, w2, b2, g2, bt2) with PyTorch layouts:
    w*: (Cout, Cin, 3, 3), b*/g*/bt*: (Cout,).  Input and output are NCHW."""
    w1, b1, g1, bt1, w2, b2, g2, bt2 = params
    del b1, b2   # conv biases are cancelled exactly by train-mode BN mean subtraction
    N, Cin, H, W = x_nchw.shape
    Cout = w1.shape[0]
    HW = H * W
    Cp = _round_up(Cout, LANE)       # lane-dense channel padding for stored activations
    count = N * HW

    f32 = jnp.float32
    x_nhwc = jnp.transpose(x_nchw.astype(f32), (0, 2, 3, 1))       # NCHW -> channels-last

    w1t = _prep_weight(w1, Cin, Cp)                                # (9, Cin, Cp)
    w2t = _prep_weight(w2, Cp, Cp)                                 # (9, Cp,  Cp)
    pad_c = lambda v: jnp.pad(v.astype(f32), (0, Cp - Cout))
    g1p, bt1p, g2p, bt2p = pad_c(g1), pad_c(bt1), pad_c(g2), pad_c(bt2)

    dummy_s = jnp.ones((1, Cin), f32)      # unused by stage 1 (normalize_input=False)
    dummy_t = jnp.zeros((1, Cin), f32)

    # stage 1: conv1 + per-sample partial BN statistics
    y1, st1 = _conv_stage(x_nhwc, dummy_s, dummy_t, w1t, normalize_input=False)
    s1, t1 = _bn_scale_shift(st1, g1p, bt1p, count)                # (1, Cp) each

    # stage 2: BN1 + LeakyReLU + conv2 + partial BN statistics, fused in one kernel
    y1 = y1.reshape(N, H, W, Cp)                                   # free metadata reshape
    y2, st2 = _conv_stage(y1, s1, t1, w2t, normalize_input=True)
    s2, t2 = _bn_scale_shift(st2, g2p, bt2p, count)

    # stage 3: BN2 + LeakyReLU epilogue
    out = _affine_lrelu(y2, s2, t2)                                # (N, HW, Cp)

    out = out[:, :, :Cout].reshape(N, H, W, Cout)
    return jnp.transpose(out, (0, 3, 1, 2))                        # back to NCHW


# ---------------- pure-JAX reference (for correctness check) ----------------

def _ref_forward(x, params):
    w1, b1, g1, bt1, w2, b2, g2, bt2 = params

    def conv(x, w, b):
        y = lax.conv_general_dilated(
            x, w, window_strides=(1, 1), padding='SAME',
            dimension_numbers=('NCHW', 'OIHW', 'NCHW'))
        return y + b.reshape(1, -1, 1, 1)

    def bn_lrelu(y, g, bt):
        mean = jnp.mean(y, axis=(0, 2, 3), keepdims=True)
        var = jnp.mean((y - mean) ** 2, axis=(0, 2, 3), keepdims=True)
        yn = (y - mean) / jnp.sqrt(var + EPS)
        yn = yn * g.reshape(1, -1, 1, 1) + bt.reshape(1, -1, 1, 1)
        return jnp.where(yn > 0, yn, NEG_SLOPE * yn)

    y = bn_lrelu(conv(x, w1, b1), g1, bt1)
    y = bn_lrelu(conv(y, w2, b2), g2, bt2)
    return y


if __name__ == "__main__":
    N, Cin, Cout, H, W = 2, 4, 8, 16, 16

    key = jax.random.PRNGKey(0)
    kx, k1, kb1, k2, kb2 = jax.random.split(key, 5)

    x = jax.random.normal(kx, (N, Cin, H, W), jnp.float32)

    # synthetic parameters (shapes match nn.Conv2d / nn.BatchNorm2d)
    w1 = 0.1 * jax.random.normal(k1, (Cout, Cin, 3, 3), jnp.float32)
    b1 = 0.1 * jax.random.normal(kb1, (Cout,), jnp.float32)
    w2 = 0.1 * jax.random.normal(k2, (Cout, Cout, 3, 3), jnp.float32)
    b2 = 0.1 * jax.random.normal(kb2, (Cout,), jnp.float32)
    g1 = jnp.ones((Cout,), jnp.float32)
    bt1 = jnp.zeros((Cout,), jnp.float32)
    g2 = jnp.ones((Cout,), jnp.float32)
    bt2 = jnp.zeros((Cout,), jnp.float32)

    params = (w1, b1, g1, bt1, w2, b2, g2, bt2)

    fwd = jax.jit(conv_block_forward)
    out = jax.block_until_ready(fwd(x, params))

    ref = jax.block_until_ready(_ref_forward(x, params))
    assert out.shape == (N, Cout, H, W), out.shape
    np.testing.assert_allclose(np.asarray(out), np.asarray(ref), rtol=1e-3, atol=1e-3)

    print("KERNEL_OK")
</pallas_src>

<mosaic_0001>
module attributes {stable_mosaic.version = 11 : i64} {
  func.func @_conv_stage_kernel(%arg0: i32, %arg1: memref<1x16x16x4xf32, #tpu.memory_space<vmem>>, %arg2: memref<1x4xf32, #tpu.memory_space<vmem>>, %arg3: memref<1x4xf32, #tpu.memory_space<vmem>>, %arg4: memref<9x4x128xf32, #tpu.memory_space<vmem>>, %arg5: memref<1x256x128xf32, #tpu.memory_space<vmem>>, %arg6: memref<1x2x128xf32, #tpu.memory_space<vmem>>, %arg7: memref<18x18x4xf32, #tpu.memory_space<vmem>>) attributes {dimension_semantics = [#tpu.dimension_semantics<parallel>], iteration_bounds = array<i64: 2>, scalar_prefetch = 0 : i64, scratch_operands = 1 : i64, tpu.core_type = #tpu.core_type<tc>, window_params = [{transform_indices = @transform_0, window_bounds = array<i64: 1, 16, 16, 4>}, {pipeline_mode = #tpu.pipeline_mode<synchronous>, transform_indices = @transform_1, window_bounds = array<i64: 1, 4>}, {pipeline_mode = #tpu.pipeline_mode<synchronous>, transform_indices = @transform_2, window_bounds = array<i64: 1, 4>}, {pipeline_mode = #tpu.pipeline_mode<synchronous>, transform_indices = @transform_3, window_bounds = array<i64: 9, 4, 128>}, {transform_indices = @transform_4, window_bounds = array<i64: 1, 256, 128>}, {transform_indices = @transform_5, window_bounds = array<i64: 1, 2, 128>}]} {
    %c0 = arith.constant 0 : index
    %c0_0 = arith.constant 0 : index
    %c0_1 = arith.constant 0 : index
    %c0_2 = arith.constant 0 : index
    %0 = vector.load %arg1[%c0, %c0_0, %c0_1, %c0_2] : memref<1x16x16x4xf32, #tpu.memory_space<vmem>>, vector<1x16x16x4xf32>
    %1 = vector.shape_cast %0 : vector<1x16x16x4xf32> to vector<16x16x4xf32>
    %cst = arith.constant 0.000000e+00 : f32
    %2 = vector.broadcast %cst : f32 to vector<1x18x4xf32>
    %c0_3 = arith.constant 0 : index
    %c0_4 = arith.constant 0 : index
    %c0_5 = arith.constant 0 : index
    %3 = vector.load %arg7[%c0_3, %c0_4, %c0_5] : memref<18x18x4xf32, #tpu.memory_space<vmem>>, vector<1x18x4xf32>
    tpu.vector_store %arg7[%c0_3, %c0_4, %c0_5], %2 {strides = array<i32>} : memref<18x18x4xf32, #tpu.memory_space<vmem>>, vector<1x18x4xf32>,
    %c17 = arith.constant 17 : index
    %c0_6 = arith.constant 0 : index
    %c0_7 = arith.constant 0 : index
    %4 = vector.load %arg7[%c17, %c0_6, %c0_7] : memref<18x18x4xf32, #tpu.memory_space<vmem>>, vector<1x18x4xf32>
    tpu.vector_store %arg7[%c17, %c0_6, %c0_7], %2 {strides = array<i32>} : memref<18x18x4xf32, #tpu.memory_space<vmem>>, vector<1x18x4xf32>,
    %cst_8 = arith.constant 0.000000e+00 : f32
    %5 = vector.broadcast %cst_8 : f32 to vector<16x1x4xf32>
    %c1 = arith.constant 1 : index
    %c0_9 = arith.constant 0 : index
    %c0_10 = arith.constant 0 : index
    %6 = vector.load %arg7[%c1, %c0_9, %c0_10] : memref<18x18x4xf32, #tpu.memory_space<vmem>>, vector<16x1x4xf32>
    tpu.vector_store %arg7[%c1, %c0_9, %c0_10], %5 {strides = array<i32>} : memref<18x18x4xf32, #tpu.memory_space<vmem>>, vector<16x1x4xf32>,
    %c1_11 = arith.constant 1 : index
    %c17_12 = arith.constant 17 : index
    %c0_13 = arith.constant 0 : index
    %7 = vector.load %arg7[%c1_11, %c17_12, %c0_13] : memref<18x18x4xf32, #tpu.memory_space<vmem>>, vector<16x1x4xf32>
    tpu.vector_store %arg7[%c1_11, %c17_12, %c0_13], %5 {strides = array<i32>} : memref<18x18x4xf32, #tpu.memory_space<vmem>>, vector<16x1x4xf32>,
    %c1_14 = arith.constant 1 : index
    %c1_15 = arith.constant 1 : index
    %c0_16 = arith.constant 0 : index
    %8 = vector.load %arg7[%c1_14, %c1_15, %c0_16] : memref<18x18x4xf32, #tpu.memory_space<vmem>>, vector<16x16x4xf32>
    tpu.vector_store %arg7[%c1_14, %c1_15, %c0_16], %1 {strides = array<i32>} : memref<18x18x4xf32, #tpu.memory_space<vmem>>, vector<16x16x4xf32>,
    %c0_17 = arith.constant 0 : index
    %c0_18 = arith.constant 0 : index
    %c0_19 = arith.constant 0 : index
    %9 = vector.load %arg7[%c0_17, %c0_18, %c0_19] : memref<18x18x4xf32, #tpu.memory_space<vmem>>, vector<16x16x4xf32>
    %10 = vector.shape_cast %9 : vector<16x16x4xf32> to vector<256x4xf32>
    %c0_20 = arith.constant 0 : index
    %c0_21 = arith.constant 0 : index
    %c0_22 = arith.constant 0 : index
    %11 = vector.load %arg4[%c0_20, %c0_21, %c0_22] : memref<9x4x128xf32, #tpu.memory_space<vmem>>, vector<1x4x128xf32>
    %12 = vector.shape_cast %11 : vector<1x4x128xf32> to vector<4x128xf32>
    %cst_23 = arith.constant dense<0.000000e+00> : vector<256x128xf32>
    %13 = tpu.matmul %10, %12, %cst_23 {dimension_numbers = #tpu.dot_dimension_numbers<[1], [0], [0], [1], [0, 0, 1, 1], [], []>} : vector<256x4xf32>, vector<4x128xf32>, vector<256x128xf32> -> vector<256x128xf32>
    %c0_24 = arith.constant 0 : index
    %c1_25 = arith.constant 1 : index
    %c0_26 = arith.constant 0 : index
    %14 = vector.load %arg7[%c0_24, %c1_25, %c0_26] : memref<18x18x4xf32, #tpu.memory_space<vmem>>, vector<16x16x4xf32>
    %15 = vector.shape_cast %14 : vector<16x16x4xf32> to vector<256x4xf32>
    %c1_27 = arith.constant 1 : index
    %c0_28 = arith.constant 0 : index
    %c0_29 = arith.constant 0 : index
    %16 = vector.load %arg4[%c1_27, %c0_28, %c0_29] : memref<9x4x128xf32, #tpu.memory_space<vmem>>, vector<1x4x128xf32>
    %17 = vector.shape_cast %16 : vector<1x4x128xf32> to vector<4x128xf32>
    %cst_30 = arith.constant dense<0.000000e+00> : vector<256x128xf32>
    %18 = tpu.matmul %15, %17, %cst_30 {dimension_numbers = #tpu.dot_dimension_numbers<[1], [0], [0], [1], [0, 0, 1, 1], [], []>} : vector<256x4xf32>, vector<4x128xf32>, vector<256x128xf32> -> vector<256x128xf32>
    %19 = arith.addf %13, %18 : vector<256x128xf32>
    %c0_31 = arith.constant 0 : index
    %c2 = arith.constant 2 : index
    %c0_32 = arith.constant 0 : index
    %20 = vector.load %arg7[%c0_31, %c2, %c0_32] : memref<18x18x4xf32, #tpu.memory_space<vmem>>, vector<16x16x4xf32>
    %21 = vector.shape_cast %20 : vector<16x16x4xf32> to vector<256x4xf32>
    %c2_33 = arith.constant 2 : index
    %c0_34 = arith.constant 0 : index
    %c0_35 = arith.constant 0 : index
    %22 = vector.load %arg4[%c2_33, %c0_34, %c0_35] : memref<9x4x128xf32, #tpu.memory_space<vmem>>, vector<1x4x128xf32>
    %23 = vector.shape_cast %22 : vector<1x4x128xf32> to vector<4x128xf32>
    %cst_36 = arith.constant dense<0.000000e+00> : vector<256x128xf32>
    %24 = tpu.matmul %21, %23, %cst_36 {dimension_numbers = #tpu.dot_dimension_numbers<[1], [0], [0], [1], [0, 0, 1, 1], [], []>} : vector<256x4xf32>, vector<4x128xf32>, vector<256x128xf32> -> vector<256x128xf32>
    %25 = arith.addf %19, %24 : vector<256x128xf32>
    %c1_37 = arith.constant 1 : index
    %c0_38 = arith.constant 0 : index
    %c0_39 = arith.constant 0 : index
    %26 = vector.load %arg7[%c1_37, %c0_38, %c0_39] : memref<18x18x4xf32, #tpu.memory_space<vmem>>, vector<16x16x4xf32>
    %27 = vector.shape_cast %26 : vector<16x16x4xf32> to vector<256x4xf32>
    %c3 = arith.constant 3 : index
    %c0_40 = arith.constant 0 : index
    %c0_41 = arith.constant 0 : index
    %28 = vector.load %arg4[%c3, %c0_40, %c0_41] : memref<9x4x128xf32, #tpu.memory_space<vmem>>, vector<1x4x128xf32>
    %29 = vector.shape_cast %28 : vector<1x4x128xf32> to vector<4x128xf32>
    %cst_42 = arith.constant dense<0.000000e+00> : vector<256x128xf32>
    %30 = tpu.matmul %27, %29, %cst_42 {dimension_numbers = #tpu.dot_dimension_numbers<[1], [0], [0], [1], [0, 0, 1, 1], [], []>} : vector<256x4xf32>, vector<4x128xf32>, vector<256x128xf32> -> vector<256x128xf32>
    %31 = arith.addf %25, %30 : vector<256x128xf32>
    %c1_43 = arith.constant 1 : index
    %c1_44 = arith.constant 1 : index
    %c0_45 = arith.constant 0 : index
    %32 = vector.load %arg7[%c1_43, %c1_44, %c0_45] : memref<18x18x4xf32, #tpu.memory_space<vmem>>, vector<16x16x4xf32>
    %33 = vector.shape_cast %32 : vector<16x16x4xf32> to vector<256x4xf32>
    %c4 = arith.constant 4 : index
    %c0_46 = arith.constant 0 : index
    %c0_47 = arith.constant 0 : index
    %34 = vector.load %arg4[%c4, %c0_46, %c0_47] : memref<9x4x128xf32, #tpu.memory_space<vmem>>, vector<1x4x128xf32>
    %35 = vector.shape_cast %34 : vector<1x4x128xf32> to vector<4x128xf32>
    %cst_48 = arith.constant dense<0.000000e+00> : vector<256x128xf32>
    %36 = tpu.matmul %33, %35, %cst_48 {dimension_numbers = #tpu.dot_dimension_numbers<[1], [0], [0], [1], [0, 0, 1, 1], [], []>} : vector<256x4xf32>, vector<4x128xf32>, vector<256x128xf32> -> vector<256x128xf32>
    %37 = arith.addf %31, %36 : vector<256x128xf32>
    %c1_49 = arith.constant 1 : index
    %c2_50 = arith.constant 2 : index
    %c0_51 = arith.constant 0 : index
    %38 = vector.load %arg7[%c1_49, %c2_50, %c0_51] : memref<18x18x4xf32, #tpu.memory_space<vmem>>, vector<16x16x4xf32>
    %39 = vector.shape_cast %38 : vector<16x16x4xf32> to vector<256x4xf32>
    %c5 = arith.constant 5 : index
    %c0_52 = arith.constant 0 : index
    %c0_53 = arith.constant 0 : index
    %40 = vector.load %arg4[%c5, %c0_52, %c0_53] : memref<9x4x128xf32, #tpu.memory_space<vmem>>, vector<1x4x128xf32>
    %41 = vector.shape_cast %40 : vector<1x4x128xf32> to vector<4x128xf32>
    %cst_54 = arith.constant dense<0.000000e+00> : vector<256x128xf32>
    %42 = tpu.matmul %39, %41, %cst_54 {dimension_numbers = #tpu.dot_dimension_numbers<[1], [0], [0], [1], [0, 0, 1, 1], [], []>} : vector<256x4xf32>, vector<4x128xf32>, vector<256x128xf32> -> vector<256x128xf32>
    %43 = arith.addf %37, %42 : vector<256x128xf32>
    %c2_55 = arith.constant 2 : index
    %c0_56 = arith.constant 0 : index
    %c0_57 = arith.constant 0 : index
    %44 = vector.load %arg7[%c2_55, %c0_56, %c0_57] : memref<18x18x4xf32, #tpu.memory_space<vmem>>, vector<16x16x4xf32>
    %45 = vector.shape_cast %44 : vector<16x16x4xf32> to vector<256x4xf32>
    %c6 = arith.constant 6 : index
    %c0_58 = arith.constant 0 : index
    %c0_59 = arith.constant 0 : index
    %46 = vector.load %arg4[%c6, %c0_58, %c0_59] : memref<9x4x128xf32, #tpu.memory_space<vmem>>, vector<1x4x128xf32>
    %47 = vector.shape_cast %46 : vector<1x4x128xf32> to vector<4x128xf32>
    %cst_60 = arith.constant dense<0.000000e+00> : vector<256x128xf32>
    %48 = tpu.matmul %45, %47, %cst_60 {dimension_numbers = #tpu.dot_dimension_numbers<[1], [0], [0], [1], [0, 0, 1, 1], [], []>} : vector<256x4xf32>, vector<4x128xf32>, vector<256x128xf32> -> vector<256x128xf32>
    %49 = arith.addf %43, %48 : vector<256x128xf32>
    %c2_61 = arith.constant 2 : index
    %c1_62 = arith.constant 1 : index
    %c0_63 = arith.constant 0 : index
    %50 = vector.load %arg7[%c2_61, %c1_62, %c0_63] : memref<18x18x4xf32, #tpu.memory_space<vmem>>, vector<16x16x4xf32>
    %51 = vector.shape_cast %50 : vector<16x16x4xf32> to vector<256x4xf32>
    %c7 = arith.constant 7 : index
    %c0_64 = arith.constant 0 : index
    %c0_65 = arith.constant 0 : index
    %52 = vector.load %arg4[%c7, %c0_64, %c0_65] : memref<9x4x128xf32, #tpu.memory_space<vmem>>, vector<1x4x128xf32>
    %53 = vector.shape_cast %52 : vector<1x4x128xf32> to vector<4x128xf32>
    %cst_66 = arith.constant dense<0.000000e+00> : vector<256x128xf32>
    %54 = tpu.matmul %51, %53, %cst_66 {dimension_numbers = #tpu.dot_dimension_numbers<[1], [0], [0], [1], [0, 0, 1, 1], [], []>} : vector<256x4xf32>, vector<4x128xf32>, vector<256x128xf32> -> vector<256x128xf32>
    %55 = arith.addf %49, %54 : vector<256x128xf32>
    %c2_67 = arith.constant 2 : index
    %c2_68 = arith.constant 2 : index
    %c0_69 = arith.constant 0 : index
    %56 = vector.load %arg7[%c2_67, %c2_68, %c0_69] : memref<18x18x4xf32, #tpu.memory_space<vmem>>, vector<16x16x4xf32>
    %57 = vector.shape_cast %56 : vector<16x16x4xf32> to vector<256x4xf32>
    %c8 = arith.constant 8 : index
    %c0_70 = arith.constant 0 : index
    %c0_71 = arith.constant 0 : index
    %58 = vector.load %arg4[%c8, %c0_70, %c0_71] : memref<9x4x128xf32, #tpu.memory_space<vmem>>, vector<1x4x128xf32>
    %59 = vector.shape_cast %58 : vector<1x4x128xf32> to vector<4x128xf32>
    %cst_72 = arith.constant dense<0.000000e+00> : vector<256x128xf32>
    %60 = tpu.matmul %57, %59, %cst_72 {dimension_numbers = #tpu.dot_dimension_numbers<[1], [0], [0], [1], [0, 0, 1, 1], [], []>} : vector<256x4xf32>, vector<4x128xf32>, vector<256x128xf32> -> vector<256x128xf32>
    %61 = arith.addf %55, %60 : vector<256x128xf32>
    %c0_73 = arith.constant 0 : index
    %c0_74 = arith.constant 0 : index
    %c0_75 = arith.constant 0 : index
    %62 = vector.load %arg5[%c0_73, %c0_74, %c0_75] : memref<1x256x128xf32, #tpu.memory_space<vmem>>, vector<1x256x128xf32>
    %63 = vector.shape_cast %62 : vector<1x256x128xf32> to vector<256x128xf32>
    %64 = vector.shape_cast %61 : vector<256x128xf32> to vector<1x256x128xf32>
    tpu.vector_store %arg5[%c0_73, %c0_74, %c0_75], %64 {strides = array<i32>} : memref<1x256x128xf32, #tpu.memory_space<vmem>>, vector<1x256x128xf32>,
    %cst_76 = arith.constant dense<0.000000e+00> : vector<128xf32>
    %65 = vector.multi_reduction <add>, %61, %cst_76 [0] : vector<256x128xf32> to vector<128xf32>
    %66 = vector.shape_cast %65 : vector<128xf32> to vector<1x128xf32>
    %c0_77 = arith.constant 0 : index
    %c0_78 = arith.constant 0 : index
    %c0_79 = arith.constant 0 : index
    %67 = vector.load %arg6[%c0_77, %c0_78, %c0_79] : memref<1x2x128xf32, #tpu.memory_space<vmem>>, vector<1x1x128xf32>
    %68 = vector.shape_cast %67 : vector<1x1x128xf32> to vector<1x128xf32>
    %69 = vector.shape_cast %66 : vector<1x128xf32> to vector<1x1x128xf32>
    tpu.vector_store %arg6[%c0_77, %c0_78, %c0_79], %69 {strides = array<i32>} : memref<1x2x128xf32, #tpu.memory_space<vmem>>, vector<1x1x128xf32>,
    %70 = arith.mulf %61, %61 : vector<256x128xf32>
    %cst_80 = arith.constant dense<0.000000e+00> : vector<128xf32>
    %71 = vector.multi_reduction <add>, %70, %cst_80 [0] : vector<256x128xf32> to vector<128xf32>
    %72 = vector.shape_cast %71 : vector<128xf32> to vector<1x128xf32>
    %c0_81 = arith.constant 0 : index
    %c1_82 = arith.constant 1 : index
    %c0_83 = arith.constant 0 : index
    %73 = vector.load %arg6[%c0_81, %c1_82, %c0_83] : memref<1x2x128xf32, #tpu.memory_space<vmem>>, vector<1x1x128xf32>
    %74 = vector.shape_cast %73 : vector<1x1x128xf32> to vector<1x128xf32>
    %75 = vector.shape_cast %72 : vector<1x128xf32> to vector<1x1x128xf32>
    tpu.vector_store %arg6[%c0_81, %c1_82, %c0_83], %75 {strides = array<i32>} : memref<1x2x128xf32, #tpu.memory_space<vmem>>, vector<1x1x128xf32>,
    return
  }
  func.func @transform_0(%arg0: i32) -> (i32, i32, i32, i32) {
    %c0_i32 = arith.constant 0 : i32
    %c0_i32_0 = arith.constant 0 : i32
    %c0_i32_1 = arith.constant 0 : i32
    %c0_i32_2 = arith.constant 0 : i32
    return %arg0, %c0_i32, %c0_i32_0, %c0_i32_1 : i32, i32, i32, i32
  }
  func.func @transform_1(%arg0: i32) -> (i32, i32) {
    %c0_i32 = arith.constant 0 : i32
    %c0_i32_0 = arith.constant 0 : i32
    %c0_i32_1 = arith.constant 0 : i32
    return %c0_i32, %c0_i32_0 : i32, i32
  }
  func.func @transform_2(%arg0: i32) -> (i32, i32) {
    %c0_i32 = arith.constant 0 : i32
    %c0_i32_0 = arith.constant 0 : i32
    %c0_i32_1 = arith.constant 0 : i32
    return %c0_i32, %c0_i32_0 : i32, i32
  }
  func.func @transform_3(%arg0: i32) -> (i32, i32, i32) {
    %c0_i32 = arith.constant 0 : i32
    %c0_i32_0 = arith.constant 0 : i32
    %c0_i32_1 = arith.constant 0 : i32
    %c0_i32_2 = arith.constant 0 : i32
    return %c0_i32, %c0_i32_0, %c0_i32_1 : i32, i32, i32
  }
  func.func @transform_4(%arg0: i32) -> (i32, i32, i32) {
    %c0_i32 = arith.constant 0 : i32
    %c0_i32_0 = arith.constant 0 : i32
    %c0_i32_1 = arith.constant 0 : i32
    return %arg0, %c0_i32, %c0_i32_0 : i32, i32, i32
  }
  func.func @transform_5(%arg0: i32) -> (i32, i32, i32) {
    %c0_i32 = arith.constant 0 : i32
    %c0_i32_0 = arith.constant 0 : i32
    %c0_i32_1 = arith.constant 0 : i32
    return %arg0, %c0_i32, %c0_i32_0 : i32, i32, i32
  }
}

module attributes {stable_mosaic.version = 11 : i64} {
  func.func @_conv_stage_kernel(%arg0: i32, %arg1: memref<1x16x16x128xf32, #tpu.memory_space<vmem>>, %arg2: memref<1x128xf32, #tpu.memory_space<vmem>>, %arg3: memref<1x128xf32, #tpu.memory_space<vmem>>, %arg4: memref<9x128x128xf32, #tpu.memory_space<vmem>>, %arg5: memref<1x256x128xf32, #tpu.memory_space<vmem>>, %arg6: memref<1x2x128xf32, #tpu.memory_space<vmem>>, %arg7: memref<18x18x128xf32, #tpu.memory_space<vmem>>) attributes {dimension_semantics = [#tpu.dimension_semantics<parallel>], iteration_bounds = array<i64: 2>, scalar_prefetch = 0 : i64, scratch_operands = 1 : i64, tpu.core_type = #tpu.core_type<tc>, window_params = [{transform_indices = @transform_0, window_bounds = array<i64: 1, 16, 16, 128>}, {pipeline_mode = #tpu.pipeline_mode<synchronous>, transform_indices = @transform_1, window_bounds = array<i64: 1, 128>}, {pipeline_mode = #tpu.pipeline_mode<synchronous>, transform_indices = @transform_2, window_bounds = array<i64: 1, 128>}, {pipeline_mode = #tpu.pipeline_mode<synchronous>, transform_indices = @transform_3, window_bounds = array<i64: 9, 128, 128>}, {transform_indices = @transform_4, window_bounds = array<i64: 1, 256, 128>}, {transform_indices = @transform_5, window_bounds = array<i64: 1, 2, 128>}]} {
    %c0 = arith.constant 0 : index
    %c0_0 = arith.constant 0 : index
    %c0_1 = arith.constant 0 : index
    %c0_2 = arith.constant 0 : index
    %0 = vector.load %arg1[%c0, %c0_0, %c0_1, %c0_2] : memref<1x16x16x128xf32, #tpu.memory_space<vmem>>, vector<1x16x16x128xf32>
    %1 = vector.shape_cast %0 : vector<1x16x16x128xf32> to vector<16x16x128xf32>
    %c0_3 = arith.constant 0 : index
    %c0_4 = arith.constant 0 : index
    %2 = vector.load %arg2[%c0_3, %c0_4] : memref<1x128xf32, #tpu.memory_space<vmem>>, vector<1x128xf32>
    %3 = vector.shape_cast %2 : vector<1x128xf32> to vector<1x1x128xf32>
    %4 = vector.broadcast %3 : vector<1x1x128xf32> to vector<16x16x128xf32>
    %5 = arith.mulf %1, %4 : vector<16x16x128xf32>
    %c0_5 = arith.constant 0 : index
    %c0_6 = arith.constant 0 : index
    %6 = vector.load %arg3[%c0_5, %c0_6] : memref<1x128xf32, #tpu.memory_space<vmem>>, vector<1x128xf32>
    %7 = vector.shape_cast %6 : vector<1x128xf32> to vector<1x1x128xf32>
    %8 = vector.broadcast %7 : vector<1x1x128xf32> to vector<16x16x128xf32>
    %9 = arith.addf %5, %8 : vector<16x16x128xf32>
    %cst = arith.constant 0.000000e+00 : f32
    %10 = vector.broadcast %cst : f32 to vector<16x16x128xf32>
    %11 = arith.cmpf ogt, %9, %10 : vector<16x16x128xf32>
    %cst_7 = arith.constant 2.000000e-01 : f32
    %12 = vector.broadcast %cst_7 : f32 to vector<16x16x128xf32>
    %13 = arith.mulf %12, %9 : vector<16x16x128xf32>
    %14 = arith.select %11, %9, %13 : vector<16x16x128xi1>, vector<16x16x128xf32>
    %cst_8 = arith.constant 0.000000e+00 : f32
    %15 = vector.broadcast %cst_8 : f32 to vector<1x18x128xf32>
    %c0_9 = arith.constant 0 : index
    %c0_10 = arith.constant 0 : index
    %c0_11 = arith.constant 0 : index
    %16 = vector.load %arg7[%c0_9, %c0_10, %c0_11] : memref<18x18x128xf32, #tpu.memory_space<vmem>>, vector<1x18x128xf32>
    tpu.vector_store %arg7[%c0_9, %c0_10, %c0_11], %15 {strides = array<i32>} : memref<18x18x128xf32, #tpu.memory_space<vmem>>, vector<1x18x128xf32>,
    %c17 = arith.constant 17 : index
    %c0_12 = arith.constant 0 : index
    %c0_13 = arith.constant 0 : index
    %17 = vector.load %arg7[%c17, %c0_12, %c0_13] : memref<18x18x128xf32, #tpu.memory_space<vmem>>, vector<1x18x128xf32>
    tpu.vector_store %arg7[%c17, %c0_12, %c0_13], %15 {strides = array<i32>} : memref<18x18x128xf32, #tpu.memory_space<vmem>>, vector<1x18x128xf32>,
    %cst_14 = arith.constant 0.000000e+00 : f32
    %18 = vector.broadcast %cst_14 : f32 to vector<16x1x128xf32>
    %c1 = arith.constant 1 : index
    %c0_15 = arith.constant 0 : index
    %c0_16 = arith.constant 0 : index
    %19 = vector.load %arg7[%c1, %c0_15, %c0_16] : memref<18x18x128xf32, #tpu.memory_space<vmem>>, vector<16x1x128xf32>
    tpu.vector_store %arg7[%c1, %c0_15, %c0_16], %18 {strides = array<i32>} : memref<18x18x128xf32, #tpu.memory_space<vmem>>, vector<16x1x128xf32>,
    %c1_17 = arith.constant 1 : index
    %c17_18 = arith.constant 17 : index
    %c0_19 = arith.constant 0 : index
    %20 = vector.load %arg7[%c1_17, %c17_18, %c0_19] : memref<18x18x128xf32, #tpu.memory_space<vmem>>, vector<16x1x128xf32>
    tpu.vector_store %arg7[%c1_17, %c17_18, %c0_19], %18 {strides = array<i32>} : memref<18x18x128xf32, #tpu.memory_space<vmem>>, vector<16x1x128xf32>,
    %c1_20 = arith.constant 1 : index
    %c1_21 = arith.constant 1 : index
    %c0_22 = arith.constant 0 : index
    %21 = vector.load %arg7[%c1_20, %c1_21, %c0_22] : memref<18x18x128xf32, #tpu.memory_space<vmem>>, vector<16x16x128xf32>
    tpu.vector_store %arg7[%c1_20, %c1_21, %c0_22], %14 {strides = array<i32>} : memref<18x18x128xf32, #tpu.memory_space<vmem>>, vector<16x16x128xf32>,
    %c0_23 = arith.constant 0 : index
    %c0_24 = arith.constant 0 : index
    %c0_25 = arith.constant 0 : index
    %22 = vector.load %arg7[%c0_23, %c0_24, %c0_25] : memref<18x18x128xf32, #tpu.memory_space<vmem>>, vector<16x16x128xf32>
    %23 = vector.shape_cast %22 : vector<16x16x128xf32> to vector<256x128xf32>
    %c0_26 = arith.constant 0 : index
    %c0_27 = arith.constant 0 : index
    %c0_28 = arith.constant 0 : index
    %24 = vector.load %arg4[%c0_26, %c0_27, %c0_28] : memref<9x128x128xf32, #tpu.memory_space<vmem>>, vector<1x128x128xf32>
    %25 = vector.shape_cast %24 : vector<1x128x128xf32> to vector<128x128xf32>
    %cst_29 = arith.constant dense<0.000000e+00> : vector<256x128xf32>
    %26 = tpu.matmul %23, %25, %cst_29 {dimension_numbers = #tpu.dot_dimension_numbers<[1], [0], [0], [1], [0, 0, 1, 1], [], []>} : vector<256x128xf32>, vector<128x128xf32>, vector<256x128xf32> -> vector<256x128xf32>
    %c0_30 = arith.constant 0 : index
    %c1_31 = arith.constant 1 : index
    %c0_32 = arith.constant 0 : index
    %27 = vector.load %arg7[%c0_30, %c1_31, %c0_32] : memref<18x18x128xf32, #tpu.memory_space<vmem>>, vector<16x16x128xf32>
    %28 = vector.shape_cast %27 : vector<16x16x128xf32> to vector<256x128xf32>
    %c1_33 = arith.constant 1 : index
    %c0_34 = arith.constant 0 : index
    %c0_35 = arith.constant 0 : index
    %29 = vector.load %arg4[%c1_33, %c0_34, %c0_35] : memref<9x128x128xf32, #tpu.memory_space<vmem>>, vector<1x128x128xf32>
    %30 = vector.shape_cast %29 : vector<1x128x128xf32> to vector<128x128xf32>
    %cst_36 = arith.constant dense<0.000000e+00> : vector<256x128xf32>
    %31 = tpu.matmul %28, %30, %cst_36 {dimension_numbers = #tpu.dot_dimension_numbers<[1], [0], [0], [1], [0, 0, 1, 1], [], []>} : vector<256x128xf32>, vector<128x128xf32>, vector<256x128xf32> -> vector<256x128xf32>
    %32 = arith.addf %26, %31 : vector<256x128xf32>
    %c0_37 = arith.constant 0 : index
    %c2 = arith.constant 2 : index
    %c0_38 = arith.constant 0 : index
    %33 = vector.load %arg7[%c0_37, %c2, %c0_38] : memref<18x18x128xf32, #tpu.memory_space<vmem>>, vector<16x16x128xf32>
    %34 = vector.shape_cast %33 : vector<16x16x128xf32> to vector<256x128xf32>
    %c2_39 = arith.constant 2 : index
    %c0_40 = arith.constant 0 : index
    %c0_41 = arith.constant 0 : index
    %35 = vector.load %arg4[%c2_39, %c0_40, %c0_41] : memref<9x128x128xf32, #tpu.memory_space<vmem>>, vector<1x128x128xf32>
    %36 = vector.shape_cast %35 : vector<1x128x128xf32> to vector<128x128xf32>
    %cst_42 = arith.constant dense<0.000000e+00> : vector<256x128xf32>
    %37 = tpu.matmul %34, %36, %cst_42 {dimension_numbers = #tpu.dot_dimension_numbers<[1], [0], [0], [1], [0, 0, 1, 1], [], []>} : vector<256x128xf32>, vector<128x128xf32>, vector<256x128xf32> -> vector<256x128xf32>
    %38 = arith.addf %32, %37 : vector<256x128xf32>
    %c1_43 = arith.constant 1 : index
    %c0_44 = arith.constant 0 : index
    %c0_45 = arith.constant 0 : index
    %39 = vector.load %arg7[%c1_43, %c0_44, %c0_45] : memref<18x18x128xf32, #tpu.memory_space<vmem>>, vector<16x16x128xf32>
    %40 = vector.shape_cast %39 : vector<16x16x128xf32> to vector<256x128xf32>
    %c3 = arith.constant 3 : index
    %c0_46 = arith.constant 0 : index
    %c0_47 = arith.constant 0 : index
    %41 = vector.load %arg4[%c3, %c0_46, %c0_47] : memref<9x128x128xf32, #tpu.memory_space<vmem>>, vector<1x128x128xf32>
    %42 = vector.shape_cast %41 : vector<1x128x128xf32> to vector<128x128xf32>
    %cst_48 = arith.constant dense<0.000000e+00> : vector<256x128xf32>
    %43 = tpu.matmul %40, %42, %cst_48 {dimension_numbers = #tpu.dot_dimension_numbers<[1], [0], [0], [1], [0, 0, 1, 1], [], []>} : vector<256x128xf32>, vector<128x128xf32>, vector<256x128xf32> -> vector<256x128xf32>
    %44 = arith.addf %38, %43 : vector<256x128xf32>
    %c1_49 = arith.constant 1 : index
    %c1_50 = arith.constant 1 : index
    %c0_51 = arith.constant 0 : index
    %45 = vector.load %arg7[%c1_49, %c1_50, %c0_51] : memref<18x18x128xf32, #tpu.memory_space<vmem>>, vector<16x16x128xf32>
    %46 = vector.shape_cast %45 : vector<16x16x128xf32> to vector<256x128xf32>
    %c4 = arith.constant 4 : index
    %c0_52 = arith.constant 0 : index
    %c0_53 = arith.constant 0 : index
    %47 = vector.load %arg4[%c4, %c0_52, %c0_53] : memref<9x128x128xf32, #tpu.memory_space<vmem>>, vector<1x128x128xf32>
    %48 = vector.shape_cast %47 : vector<1x128x128xf32> to vector<128x128xf32>
    %cst_54 = arith.constant dense<0.000000e+00> : vector<256x128xf32>
    %49 = tpu.matmul %46, %48, %cst_54 {dimension_numbers = #tpu.dot_dimension_numbers<[1], [0], [0], [1], [0, 0, 1, 1], [], []>} : vector<256x128xf32>, vector<128x128xf32>, vector<256x128xf32> -> vector<256x128xf32>
    %50 = arith.addf %44, %49 : vector<256x128xf32>
    %c1_55 = arith.constant 1 : index
    %c2_56 = arith.constant 2 : index
    %c0_57 = arith.constant 0 : index
    %51 = vector.load %arg7[%c1_55, %c2_56, %c0_57] : memref<18x18x128xf32, #tpu.memory_space<vmem>>, vector<16x16x128xf32>
    %52 = vector.shape_cast %51 : vector<16x16x128xf32> to vector<256x128xf32>
    %c5 = arith.constant 5 : index
    %c0_58 = arith.constant 0 : index
    %c0_59 = arith.constant 0 : index
    %53 = vector.load %arg4[%c5, %c0_58, %c0_59] : memref<9x128x128xf32, #tpu.memory_space<vmem>>, vector<1x128x128xf32>
    %54 = vector.shape_cast %53 : vector<1x128x128xf32> to vector<128x128xf32>
    %cst_60 = arith.constant dense<0.000000e+00> : vector<256x128xf32>
    %55 = tpu.matmul %52, %54, %cst_60 {dimension_numbers = #tpu.dot_dimension_numbers<[1], [0], [0], [1], [0, 0, 1, 1], [], []>} : vector<256x128xf32>, vector<128x128xf32>, vector<256x128xf32> -> vector<256x128xf32>
    %56 = arith.addf %50, %55 : vector<256x128xf32>
    %c2_61 = arith.constant 2 : index
    %c0_62 = arith.constant 0 : index
    %c0_63 = arith.constant 0 : index
    %57 = vector.load %arg7[%c2_61, %c0_62, %c0_63] : memref<18x18x128xf32, #tpu.memory_space<vmem>>, vector<16x16x128xf32>
    %58 = vector.shape_cast %57 : vector<16x16x128xf32> to vector<256x128xf32>
    %c6 = arith.constant 6 : index
    %c0_64 = arith.constant 0 : index
    %c0_65 = arith.constant 0 : index
    %59 = vector.load %arg4[%c6, %c0_64, %c0_65] : memref<9x128x128xf32, #tpu.memory_space<vmem>>, vector<1x128x128xf32>
    %60 = vector.shape_cast %59 : vector<1x128x128xf32> to vector<128x128xf32>
    %cst_66 = arith.constant dense<0.000000e+00> : vector<256x128xf32>
    %61 = tpu.matmul %58, %60, %cst_66 {dimension_numbers = #tpu.dot_dimension_numbers<[1], [0], [0], [1], [0, 0, 1, 1], [], []>} : vector<256x128xf32>, vector<128x128xf32>, vector<256x128xf32> -> vector<256x128xf32>
    %62 = arith.addf %56, %61 : vector<256x128xf32>
    %c2_67 = arith.constant 2 : index
    %c1_68 = arith.constant 1 : index
    %c0_69 = arith.constant 0 : index
    %63 = vector.load %arg7[%c2_67, %c1_68, %c0_69] : memref<18x18x128xf32, #tpu.memory_space<vmem>>, vector<16x16x128xf32>
    %64 = vector.shape_cast %63 : vector<16x16x128xf32> to vector<256x128xf32>
    %c7 = arith.constant 7 : index
    %c0_70 = arith.constant 0 : index
    %c0_71 = arith.constant 0 : index
    %65 = vector.load %arg4[%c7, %c0_70, %c0_71] : memref<9x128x128xf32, #tpu.memory_space<vmem>>, vector<1x128x128xf32>
    %66 = vector.shape_cast %65 : vector<1x128x128xf32> to vector<128x128xf32>
    %cst_72 = arith.constant dense<0.000000e+00> : vector<256x128xf32>
    %67 = tpu.matmul %64, %66, %cst_72 {dimension_numbers = #tpu.dot_dimension_numbers<[1], [0], [0], [1], [0, 0, 1, 1], [], []>} : vector<256x128xf32>, vector<128x128xf32>, vector<256x128xf32> -> vector<256x128xf32>
    %68 = arith.addf %62, %67 : vector<256x128xf32>
    %c2_73 = arith.constant 2 : index
    %c2_74 = arith.constant 2 : index
    %c0_75 = arith.constant 0 : index
    %69 = vector.load %arg7[%c2_73, %c2_74, %c0_75] : memref<18x18x128xf32, #tpu.memory_space<vmem>>, vector<16x16x128xf32>
    %70 = vector.shape_cast %69 : vector<16x16x128xf32> to vector<256x128xf32>
    %c8 = arith.constant 8 : index
    %c0_76 = arith.constant 0 : index
    %c0_77 = arith.constant 0 : index
    %71 = vector.load %arg4[%c8, %c0_76, %c0_77] : memref<9x128x128xf32, #tpu.memory_space<vmem>>, vector<1x128x128xf32>
    %72 = vector.shape_cast %71 : vector<1x128x128xf32> to vector<128x128xf32>
    %cst_78 = arith.constant dense<0.000000e+00> : vector<256x128xf32>
    %73 = tpu.matmul %70, %72, %cst_78 {dimension_numbers = #tpu.dot_dimension_numbers<[1], [0], [0], [1], [0, 0, 1, 1], [], []>} : vector<256x128xf32>, vector<128x128xf32>, vector<256x128xf32> -> vector<256x128xf32>
    %74 = arith.addf %68, %73 : vector<256x128xf32>
    %c0_79 = arith.constant 0 : index
    %c0_80 = arith.constant 0 : index
    %c0_81 = arith.constant 0 : index
    %75 = vector.load %arg5[%c0_79, %c0_80, %c0_81] : memref<1x256x128xf32, #tpu.memory_space<vmem>>, vector<1x256x128xf32>
    %76 = vector.shape_cast %75 : vector<1x256x128xf32> to vector<256x128xf32>
    %77 = vector.shape_cast %74 : vector<256x128xf32> to vector<1x256x128xf32>
    tpu.vector_store %arg5[%c0_79, %c0_80, %c0_81], %77 {strides = array<i32>} : memref<1x256x128xf32, #tpu.memory_space<vmem>>, vector<1x256x128xf32>,
    %cst_82 = arith.constant dense<0.000000e+00> : vector<128xf32>
    %78 = vector.multi_reduction <add>, %74, %cst_82 [0] : vector<256x128xf32> to vector<128xf32>
    %79 = vector.shape_cast %78 : vector<128xf32> to vector<1x128xf32>
    %c0_83 = arith.constant 0 : index
    %c0_84 = arith.constant 0 : index
    %c0_85 = arith.constant 0 : index
    %80 = vector.load %arg6[%c0_83, %c0_84, %c0_85] : memref<1x2x128xf32, #tpu.memory_space<vmem>>, vector<1x1x128xf32>
    %81 = vector.shape_cast %80 : vector<1x1x128xf32> to vector<1x128xf32>
    %82 = vector.shape_cast %79 : vector<1x128xf32> to vector<1x1x128xf32>
    tpu.vector_store %arg6[%c0_83, %c0_84, %c0_85], %82 {strides = array<i32>} : memref<1x2x128xf32, #tpu.memory_space<vmem>>, vector<1x1x128xf32>,
    %83 = arith.mulf %74, %74 : vector<256x128xf32>
    %cst_86 = arith.constant dense<0.000000e+00> : vector<128xf32>
    %84 = vector.multi_reduction <add>, %83, %cst_86 [0] : vector<256x128xf32> to vector<128xf32>
    %85 = vector.shape_cast %84 : vector<128xf32> to vector<1x128xf32>
    %c0_87 = arith.constant 0 : index
    %c1_88 = arith.constant 1 : index
    %c0_89 = arith.constant 0 : index
    %86 = vector.load %arg6[%c0_87, %c1_88, %c0_89] : memref<1x2x128xf32, #tpu.memory_space<vmem>>, vector<1x1x128xf32>
    %87 = vector.shape_cast %86 : vector<1x1x128xf32> to vector<1x128xf32>
    %88 = vector.shape_cast %85 : vector<1x128xf32> to vector<1x1x128xf32>
    tpu.vector_store %arg6[%c0_87, %c1_88, %c0_89], %88 {strides = array<i32>} : memref<1x2x128xf32, #tpu.memory_space<vmem>>, vector<1x1x128xf32>,
    return
  }
  func.func @transform_0(%arg0: i32) -> (i32, i32, i32, i32) {
    %c0_i32 = arith.constant 0 : i32
    %c0_i32_0 = arith.constant 0 : i32
    %c0_i32_1 = arith.constant 0 : i32
    %c0_i32_2 = arith.constant 0 : i32
    return %arg0, %c0_i32, %c0_i32_0, %c0_i32_1 : i32, i32, i32, i32
  }
  func.func @transform_1(%arg0: i32) -> (i32, i32) {
    %c0_i32 = arith.constant 0 : i32
    %c0_i32_0 = arith.constant 0 : i32
    %c0_i32_1 = arith.constant 0 : i32
    return %c0_i32, %c0_i32_0 : i32, i32
  }
  func.func @transform_2(%arg0: i32) -> (i32, i32) {
    %c0_i32 = arith.constant 0 : i32
    %c0_i32_0 = arith.constant 0 : i32
    %c0_i32_1 = arith.constant 0 : i32
    return %c0_i32, %c0_i32_0 : i32, i32
  }
  func.func @transform_3(%arg0: i32) -> (i32, i32, i32) {
    %c0_i32 = arith.constant 0 : i32
    %c0_i32_0 = arith.constant 0 : i32
    %c0_i32_1 = arith.constant 0 : i32
    %c0_i32_2 = arith.constant 0 : i32
    return %c0_i32, %c0_i32_0, %c0_i32_1 : i32, i32, i32
  }
  func.func @transform_4(%arg0: i32) -> (i32, i32, i32) {
    %c0_i32 = arith.constant 0 : i32
    %c0_i32_0 = arith.constant 0 : i32
    %c0_i32_1 = arith.constant 0 : i32
    return %arg0, %c0_i32, %c0_i32_0 : i32, i32, i32
  }
  func.func @transform_5(%arg0: i32) -> (i32, i32, i32) {
    %c0_i32 = arith.constant 0 : i32
    %c0_i32_0 = arith.constant 0 : i32
    %c0_i32_1 = arith.constant 0 : i32
    return %arg0, %c0_i32, %c0_i32_0 : i32, i32, i32
  }
}

module attributes {stable_mosaic.version = 11 : i64} {
  func.func @_affine_lrelu_kernel(%arg0: i32, %arg1: memref<1x256x128xf32, #tpu.memory_space<vmem>>, %arg2: memref<1x128xf32, #tpu.memory_space<vmem>>, %arg3: memref<1x128xf32, #tpu.memory_space<vmem>>, %arg4: memref<1x256x128xf32, #tpu.memory_space<vmem>>) attributes {dimension_semantics = [#tpu.dimension_semantics<parallel>], iteration_bounds = array<i64: 2>, scalar_prefetch = 0 : i64, scratch_operands = 0 : i64, tpu.core_type = #tpu.core_type<tc>, window_params = [{transform_indices = @transform_0, window_bounds = array<i64: 1, 256, 128>}, {pipeline_mode = #tpu.pipeline_mode<synchronous>, transform_indices = @transform_1, window_bounds = array<i64: 1, 128>}, {pipeline_mode = #tpu.pipeline_mode<synchronous>, transform_indices = @transform_2, window_bounds = array<i64: 1, 128>}, {transform_indices = @transform_3, window_bounds = array<i64: 1, 256, 128>}]} {
    %c0 = arith.constant 0 : index
    %c0_0 = arith.constant 0 : index
    %c0_1 = arith.constant 0 : index
    %0 = vector.load %arg1[%c0, %c0_0, %c0_1] : memref<1x256x128xf32, #tpu.memory_space<vmem>>, vector<1x256x128xf32>
    %1 = vector.shape_cast %0 : vector<1x256x128xf32> to vector<256x128xf32>
    %c0_2 = arith.constant 0 : index
    %c0_3 = arith.constant 0 : index
    %2 = vector.load %arg2[%c0_2, %c0_3] : memref<1x128xf32, #tpu.memory_space<vmem>>, vector<1x128xf32>
    %3 = vector.broadcast %2 : vector<1x128xf32> to vector<256x128xf32>
    %4 = arith.mulf %1, %3 : vector<256x128xf32>
    %c0_4 = arith.constant 0 : index
    %c0_5 = arith.constant 0 : index
    %5 = vector.load %arg3[%c0_4, %c0_5] : memref<1x128xf32, #tpu.memory_space<vmem>>, vector<1x128xf32>
    %6 = vector.broadcast %5 : vector<1x128xf32> to vector<256x128xf32>
    %7 = arith.addf %4, %6 : vector<256x128xf32>
    %cst = arith.constant 0.000000e+00 : f32
    %8 = vector.broadcast %cst : f32 to vector<256x128xf32>
    %9 = arith.cmpf ogt, %7, %8 : vector<256x128xf32>
    %cst_6 = arith.constant 2.000000e-01 : f32
    %10 = vector.broadcast %cst_6 : f32 to vector<256x128xf32>
    %11 = arith.mulf %10, %7 : vector<256x128xf32>
    %12 = arith.select %9, %7, %11 : vector<256x128xi1>, vector<256x128xf32>
    %c0_7 = arith.constant 0 : index
    %c0_8 = arith.constant 0 : index
    %c0_9 = arith.constant 0 : index
    %13 = vector.load %arg4[%c0_7, %c0_8, %c0_9] : memref<1x256x128xf32, #tpu.memory_space<vmem>>, vector<1x256x128xf32>
    %14 = vector.shape_cast %13 : vector<1x256x128xf32> to vector<256x128xf32>
    %15 = vector.shape_cast %12 : vector<256x128xf32> to vector<1x256x128xf32>
    tpu.vector_store %arg4[%c0_7, %c0_8, %c0_9], %15 {strides = array<i32>} : memref<1x256x128xf32, #tpu.memory_space<vmem>>, vector<1x256x128xf32>,
    return
  }
  func.func @transform_0(%arg0: i32) -> (i32, i32, i32) {
    %c0_i32 = arith.constant 0 : i32
    %c0_i32_0 = arith.constant 0 : i32
    %c0_i32_1 = arith.constant 0 : i32
    return %arg0, %c0_i32, %c0_i32_0 : i32, i32, i32
  }
  func.func @transform_1(%arg0: i32) -> (i32, i32) {
    %c0_i32 = arith.constant 0 : i32
    %c0_i32_0 = arith.constant 0 : i32
    %c0_i32_1 = arith.constant 0 : i32
    return %c0_i32, %c0_i32_0 : i32, i32
  }
  func.func @transform_2(%arg0: i32) -> (i32, i32) {
    %c0_i32 = arith.constant 0 : i32
    %c0_i32_0 = arith.constant 0 : i32
    %c0_i32_1 = arith.constant 0 : i32
    return %c0_i32, %c0_i32_0 : i32, i32
  }
  func.func @transform_3(%arg0: i32) -> (i32, i32, i32) {
    %c0_i32 = arith.constant 0 : i32
    %c0_i32_0 = arith.constant 0 : i32
    %c0_i32_1 = arith.constant 0 : i32
    return %arg0, %c0_i32, %c0_i32_0 : i32, i32, i32
  }
}

</mosaic_0001>

<bundles_post_ra>
// kernel: conv_block_forward.5
= control target key start
LH: loop header
LB: loop body
LE: loop exit
PB: predicated region body
PF: predicated region fallthrough
CT: control target
= control target key end

     0   :  { %s515_s12 = smov 0   ;;  %s677_s0 = inlined_call_operand.vmem [shape: f32[2,256,128], index: 0, kind: input, shape index: {}]   ;;  %s678_s1 = inlined_call_operand.vmem [shape: f32[1,128], index: 1, kind: input, shape index: {}]   ;;  %s679_s2 = inlined_call_operand.vmem [shape: f32[1,128], index: 2, kind: input, shape index: {}]   ;;  %s680_s3 = inlined_call_operand.vmem [shape: f32[2,256,128], index: 3, kind: output, shape index: {}]  }
   0x1 LB: > { %s464_s13 = sadd.s32 4294967295, %s493_s12   ;;  %p468_p0 = scmp.ge.s32.totalorder %s493_s12, 1  ;;  %s493_s12 = sphi %s515_s12, %s13_s12  }
   0x2   : > { %p137_p1 = scmp.lt.s32.totalorder %s493_s12, 3 }
   0x4   : > { %p138_p2 = pnand %p468_p0, %p137_p1 }
   0x5   : > { %p161_p3 = scmp.lt.s32.totalorder (!%p138_p2), %s464_s13, 1  ;;  %v529_v0 = vld [vmem:[%s678_s1] ss:$0 sm:$0xff] (!%p138_p2) }
   0x6   : > { %141 = sbr.rel (%p138_p2) target bundleno = 62 (0x3e), region = 32  ;;  %v539_v1 = vld [vmem:[%s679_s2] ss:$0 sm:$0xff] (!%p138_p2) }
   0xd   : > { %s682_s13 = smov (!%p161_p3, %s464_s13), 1 }
   0xe   : > { %s477_s14 = sshll.u32 %s682_s13, 8 }
   0xf   : > { %s534_s19 = scalar_lea.vmem %s677_s0, %s477_s14  ;;  %s567_s24 = scalar_lea.vmem %s680_s3, %s477_s14 }
  0x10   : > { %v171_v2 = vld [vmem:[%s534_s19] sm:$0xff]  ;;  %v172_v3 = vld [vmem:[%s534_s19 + $0x8] sm:$0xff]  ;;  %v173_v4 = vld [vmem:[%s534_s19 + $0x10] sm:$0xff] }
  0x11   : > { %v210_v5 = vmul.f32 %v529_v0, %v171_v2  ;;  %v211_v6 = vmul.f32 %v529_v0, %v172_v3  ;;  %v212_v7 = vmul.f32 %v529_v0, %v173_v4  ;;  %v174_v8 = vld [vmem:[%s534_s19 + $0x18] sm:$0xff]  ;;  %v175_v9 = vld [vmem:[%s534_s19 + $0x20] sm:$0xff]  ;;  %v176_v10 = vld [vmem:[%s534_s19 + $0x28] sm:$0xff] }
  0x12   : > { %v213_v11 = vmul.f32 %v529_v0, %v174_v8  ;;  %v214_v12 = vmul.f32 %v529_v0, %v175_v9  ;;  %v215_v13 = vmul.f32 %v529_v0, %v176_v10  ;;  %v177_v14 = vld [vmem:[%s534_s19 + $0x30] sm:$0xff]  ;;  %v178_v15 = vld [vmem:[%s534_s19 + $0x38] sm:$0xff]  ;;  %v179_v24 = vld [vmem:[%s534_s19 + $0x40] sm:$0xff] }
  0x13   : > { %v249_v16 = vadd.f32 %v539_v1, %v210_v5  ;;  %v250_v17 = vadd.f32 %v539_v1, %v211_v6  ;;  %v251_v18 = vadd.f32 %v539_v1, %v212_v7  ;;  %v216_v19 = vmul.f32 %v529_v0, %v177_v14  ;;  %v180_v32 = vld [vmem:[%s534_s19 + $0x48] sm:$0xff]  ;;  %v181_v33 = vld [vmem:[%s534_s19 + $0x50] sm:$0xff]  ;;  %v182_v34 = vld [vmem:[%s534_s19 + $0x58] sm:$0xff] }
  0x14   : > { %v252_v20 = vadd.f32 %v539_v1, %v213_v11  ;;  %v253_v21 = vadd.f32 %v539_v1, %v214_v12  ;;  %v254_v22 = vadd.f32 %v539_v1, %v215_v13  ;;  %v217_v23 = vmul.f32 %v529_v0, %v178_v15  ;;  %v183_v46 = vld [vmem:[%s534_s19 + $0x60] sm:$0xff]  ;;  %v184_v47 = vld [vmem:[%s534_s19 + $0x68] sm:$0xff]  ;;  %v185_v58 = vld [vmem:[%s534_s19 + $0x70] sm:$0xff] }
  0x15   : > { %vm281_vm0 = vcmp.gt.f32.partialorder %v249_v16, 0.0  ;;  %v313_v25 = vmul.f32 0.2, %v249_v16  ;;  %vm282_vm1 = vcmp.gt.f32.partialorder %v250_v17, 0.0  ;;  %v314_v26 = vmul.f32 0.2, %v250_v17 }
  0x16   : > { %vm283_vm2 = vcmp.gt.f32.partialorder %v251_v18, 0.0  ;;  %v315_v27 = vmul.f32 0.2, %v251_v18  ;;  %vm284_vm3 = vcmp.gt.f32.partialorder %v252_v20, 0.0  ;;  %v316_v28 = vmul.f32 0.2, %v252_v20 }
  0x17   : > { %v345_v29 = vsel %vm281_vm0, %v249_v16, %v313_v25  ;;  %v346_v30 = vsel %vm282_vm1, %v250_v17, %v314_v26  ;;  %vm285_vm4 = vcmp.gt.f32.partialorder %v253_v21, 0.0  ;;  %v317_v31 = vmul.f32 0.2, %v253_v21  ;;  %v186_v59 = vld [vmem:[%s534_s19 + $0x78] sm:$0xff]  ;;  %v187_v6 = vld [vmem:[%s534_s19 + $0x80] sm:$0xff]  ;;  %v188_v7 = vld [vmem:[%s534_s19 + $0x88] sm:$0xff] }
  0x18   : > { %377 = vst [vmem:[%s567_s24] sm:$0xff] %v345_v29  ;;  %378 = vst [vmem:[%s567_s24 + $0x8] sm:$0xff] %v346_v30  ;;  %v347_v35 = vsel %vm283_vm2, %v251_v18, %v315_v27  ;;  %v348_v36 = vsel %vm284_vm3, %v252_v20, %v316_v28  ;;  %vm286_vm5 = vcmp.gt.f32.partialorder %v254_v22, 0.0  ;;  %v318_v37 = vmul.f32 0.2, %v254_v22  ;;  %v189_v12 = vld [vmem:[%s534_s19 + $0x90] sm:$0xff]  ;;  %v190_v13 = vld [vmem:[%s534_s19 + $0x98] sm:$0xff] }
  0x19   : > { %379 = vst [vmem:[%s567_s24 + $0x10] sm:$0xff] %v347_v35  ;;  %380 = vst [vmem:[%s567_s24 + $0x18] sm:$0xff] %v348_v36  ;;  %v349_v38 = vsel %vm285_vm4, %v253_v21, %v317_v31  ;;  %v255_v39 = vadd.f32 %v539_v1, %v216_v19  ;;  %v256_v40 = vadd.f32 %v539_v1, %v217_v23  ;;  %v192_v25 = vld [vmem:[%s534_s19 + $0xa8] sm:$0xff]  ;;  %v193_v36 = vld [vmem:[%s534_s19 + $0xb0] sm:$0xff] }
  0x1a   : > { %v218_v41 = vmul.f32 %v529_v0, %v179_v24  ;;  %381 = vst [vmem:[%s567_s24 + $0x20] sm:$0xff] %v349_v38  ;;  %v350_v42 = vsel %vm286_vm5, %v254_v22, %v318_v37  ;;  %v219_v43 = vmul.f32 %v529_v0, %v180_v32  ;;  %v220_v44 = vmul.f32 %v529_v0, %v181_v33  ;;  %v191_v24 = vld [vmem:[%s534_s19 + $0xa0] sm:$0xff]  ;;  %v194_v37 = vld [vmem:[%s534_s19 + $0xb8] sm:$0xff] }
  0x1b   : > { %v221_v45 = vmul.f32 %v529_v0, %v182_v34  ;;  %382 = vst [vmem:[%s567_s24 + $0x28] sm:$0xff] %v350_v42  ;;  %vm287_vm6 = vcmp.gt.f32.partialorder %v255_v39, 0.0  ;;  %v319_v48 = vmul.f32 0.2, %v255_v39  ;;  %vm288_vm7 = vcmp.gt.f32.partialorder %v256_v40, 0.0 }
  0x1c   : > { %v320_v49 = vmul.f32 0.2, %v256_v40  ;;  %v257_v50 = vadd.f32 %v539_v1, %v218_v41  ;;  %v258_v51 = vadd.f32 %v539_v1, %v219_v43  ;;  %v259_v52 = vadd.f32 %v539_v1, %v220_v44 }
  0x1d   : > { %v260_v53 = vadd.f32 %v539_v1, %v221_v45  ;;  %v351_v54 = vsel %vm287_vm6, %v255_v39, %v319_v48  ;;  %v222_v56 = vmul.f32 %v529_v0, %v183_v46  ;;  %v223_v57 = vmul.f32 %v529_v0, %v184_v47  ;;  %v195_v46 = vld [vmem:[%s534_s19 + $0xc0] sm:$0xff]  ;;  %v196_v47 = vld [vmem:[%s534_s19 + $0xc8] sm:$0xff] }
  0x1e   : > { %v352_v55 = vsel %vm288_vm7, %v256_v40, %v320_v49  ;;  %383 = vst [vmem:[%s567_s24 + $0x30] sm:$0xff] %v351_v54  ;;  %vm289_vm8 = vcmp.gt.f32.partialorder %v257_v50, 0.0  ;;  %v321_v60 = vmul.f32 0.2, %v257_v50  ;;  %vm290_vm9 = vcmp.gt.f32.partialorder %v258_v51, 0.0 }
  0x1f   : > { %384 = vst [vmem:[%s567_s24 + $0x38] sm:$0xff] %v352_v55  ;;  %v322_v61 = vmul.f32 0.2, %v258_v51  ;;  %vm291_vm10 = vcmp.gt.f32.partialorder %v259_v52, 0.0  ;;  %v323_v62 = vmul.f32 0.2, %v259_v52  ;;  %v261_v4 = vadd.f32 %v539_v1, %v222_v56 }
  0x20   : > { %vm292_vm11 = vcmp.gt.f32.partialorder %v260_v53, 0.0  ;;  %v324_v63 = vmul.f32 0.2, %v260_v53  ;;  %v353_v2 = vsel %vm289_vm8, %v257_v50, %v321_v60  ;;  %v262_v5 = vadd.f32 %v539_v1, %v223_v57 }
  0x21   : > { %v354_v3 = vsel %vm290_vm9, %v258_v51, %v322_v61  ;;  %385 = vst [vmem:[%s567_s24 + $0x40] sm:$0xff] %v353_v2  ;;  %v355_v8 = vsel %vm291_vm10, %v259_v52, %v323_v62  ;;  %v224_v10 = vmul.f32 %v529_v0, %v185_v58  ;;  %v225_v11 = vmul.f32 %v529_v0, %v186_v59  ;;  %v197_v52 = vld [vmem:[%s534_s19 + $0xd0] sm:$0xff]  ;;  %v199_v2 = vld [vmem:[%s534_s19 + $0xe0] sm:$0xff] }
  0x22   : > { %386 = vst [vmem:[%s567_s24 + $0x48] sm:$0xff] %v354_v3  ;;  %v356_v9 = vsel %vm292_vm11, %v260_v53, %v324_v63  ;;  %387 = vst [vmem:[%s567_s24 + $0x50] sm:$0xff] %v355_v8  ;;  %vm293_vm12 = vcmp.gt.f32.partialorder %v261_v4, 0.0  ;;  %v325_v14 = vmul.f32 0.2, %v261_v4  ;;  %vm294_vm13 = vcmp.gt.f32.partialorder %v262_v5, 0.0 }
  0x23   : > { %388 = vst [vmem:[%s567_s24 + $0x58] sm:$0xff] %v356_v9  ;;  %v326_v15 = vmul.f32 0.2, %v262_v5  ;;  %v263_v16 = vadd.f32 %v539_v1, %v224_v10  ;;  %v264_v17 = vadd.f32 %v539_v1, %v225_v11  ;;  %v226_v18 = vmul.f32 %v529_v0, %v187_v6  ;;  %v198_v53 = vld [vmem:[%s534_s19 + $0xd8] sm:$0xff]  ;;  %v200_v3 = vld [vmem:[%s534_s19 + $0xe8] sm:$0xff] }
  0x24   : > { %v227_v19 = vmul.f32 %v529_v0, %v188_v7  ;;  %v357_v20 = vsel %vm293_vm12, %v261_v4, %v325_v14  ;;  %v228_v22 = vmul.f32 %v529_v0, %v189_v12  ;;  %v229_v23 = vmul.f32 %v529_v0, %v190_v13  ;;  %v201_v14 = vld [vmem:[%s534_s19 + $0xf0] sm:$0xff] }
  0x25   : > { %v358_v21 = vsel %vm294_vm13, %v262_v5, %v326_v15  ;;  %389 = vst [vmem:[%s567_s24 + $0x60] sm:$0xff] %v357_v20  ;;  %vm295_vm14 = vcmp.gt.f32.partialorder %v263_v16, 0.0  ;;  %v327_v26 = vmul.f32 0.2, %v263_v16  ;;  %vm296_vm15 = vcmp.gt.f32.partialorder %v264_v17, 0.0  ;;  %v202_v15 = vld [vmem:[%s534_s19 + $0xf8] sm:$0xff] }
  0x26   : > { %390 = vst [vmem:[%s567_s24 + $0x68] sm:$0xff] %v358_v21  ;;  %v328_v27 = vmul.f32 0.2, %v264_v17  ;;  %v265_v28 = vadd.f32 %v539_v1, %v226_v18  ;;  %v266_v29 = vadd.f32 %v539_v1, %v227_v19  ;;  %v267_v30 = vadd.f32 %v539_v1, %v228_v22 }
  0x27   : > { %v268_v31 = vadd.f32 %v539_v1, %v229_v23  ;;  %v359_v32 = vsel %vm295_vm14, %v263_v16, %v327_v26  ;;  %v230_v34 = vmul.f32 %v529_v0, %v191_v24  ;;  %v231_v35 = vmul.f32 %v529_v0, %v192_v25 }
  0x28   : > { %v360_v33 = vsel %vm296_vm15, %v264_v17, %v328_v27  ;;  %391 = vst [vmem:[%s567_s24 + $0x70] sm:$0xff] %v359_v32  ;;  %vm297_vm0 = vcmp.gt.f32.partialorder %v265_v28, 0.0  ;;  %v329_v38 = vmul.f32 0.2, %v265_v28  ;;  %vm298_vm1 = vcmp.gt.f32.partialorder %v266_v29, 0.0 }
  0x29   : > { %392 = vst [vmem:[%s567_s24 + $0x78] sm:$0xff] %v360_v33  ;;  %v330_v39 = vmul.f32 0.2, %v266_v29  ;;  %vm299_vm2 = vcmp.gt.f32.partialorder %v267_v30, 0.0  ;;  %v331_v40 = vmul.f32 0.2, %v267_v30  ;;  %v269_v44 = vadd.f32 %v539_v1, %v230_v34 }
  0x2a   : > { %vm300_vm3 = vcmp.gt.f32.partialorder %v268_v31, 0.0  ;;  %v332_v41 = vmul.f32 0.2, %v268_v31  ;;  %v361_v42 = vsel %vm297_vm0, %v265_v28, %v329_v38  ;;  %v270_v45 = vadd.f32 %v539_v1, %v231_v35 }
  0x2b   : > { %v362_v43 = vsel %vm298_vm1, %v266_v29, %v330_v39  ;;  %393 = vst [vmem:[%s567_s24 + $0x80] sm:$0xff] %v361_v42  ;;  %v363_v48 = vsel %vm299_vm2, %v267_v30, %v331_v40  ;;  %v232_v50 = vmul.f32 %v529_v0, %v193_v36  ;;  %v233_v51 = vmul.f32 %v529_v0, %v194_v37 }
  0x2c   : > { %394 = vst [vmem:[%s567_s24 + $0x88] sm:$0xff] %v362_v43  ;;  %v364_v49 = vsel %vm300_vm3, %v268_v31, %v332_v41  ;;  %395 = vst [vmem:[%s567_s24 + $0x90] sm:$0xff] %v363_v48  ;;  %vm301_vm4 = vcmp.gt.f32.partialorder %v269_v44, 0.0  ;;  %v333_v54 = vmul.f32 0.2, %v269_v44  ;;  %vm302_vm5 = vcmp.gt.f32.partialorder %v270_v45, 0.0 }
  0x2d   : > { %396 = vst [vmem:[%s567_s24 + $0x98] sm:$0xff] %v364_v49  ;;  %v334_v55 = vmul.f32 0.2, %v270_v45  ;;  %v271_v56 = vadd.f32 %v539_v1, %v232_v50  ;;  %v272_v57 = vadd.f32 %v539_v1, %v233_v51  ;;  %v234_v58 = vmul.f32 %v529_v0, %v195_v46 }
  0x2e   : > { %v235_v59 = vmul.f32 %v529_v0, %v196_v47  ;;  %v365_v60 = vsel %vm301_vm4, %v269_v44, %v333_v54  ;;  %v236_v62 = vmul.f32 %v529_v0, %v197_v52  ;;  %v237_v63 = vmul.f32 %v529_v0, %v198_v53 }
  0x2f   : > { %v366_v61 = vsel %vm302_vm5, %v270_v45, %v334_v55  ;;  %397 = vst [vmem:[%s567_s24 + $0xa0] sm:$0xff] %v365_v60  ;;  %vm303_vm6 = vcmp.gt.f32.partialorder %v271_v56, 0.0  ;;  %v335_v4 = vmul.f32 0.2, %v271_v56  ;;  %vm304_vm7 = vcmp.gt.f32.partialorder %v272_v57, 0.0 }
  0x30   : > { %398 = vst [vmem:[%s567_s24 + $0xa8] sm:$0xff] %v366_v61  ;;  %v336_v5 = vmul.f32 0.2, %v272_v57  ;;  %v273_v6 = vadd.f32 %v539_v1, %v234_v58  ;;  %v274_v7 = vadd.f32 %v539_v1, %v235_v59  ;;  %v275_v8 = vadd.f32 %v539_v1, %v236_v62 }
  0x31   : > { %v276_v9 = vadd.f32 %v539_v1, %v237_v63  ;;  %v367_v10 = vsel %vm303_vm6, %v271_v56, %v335_v4  ;;  %v238_v12 = vmul.f32 %v529_v0, %v199_v2  ;;  %v239_v13 = vmul.f32 %v529_v0, %v200_v3 }
  0x32   : > { %v368_v11 = vsel %vm304_vm7, %v272_v57, %v336_v5  ;;  %399 = vst [vmem:[%s567_s24 + $0xb0] sm:$0xff] %v367_v10  ;;  %vm305_vm8 = vcmp.gt.f32.partialorder %v273_v6, 0.0  ;;  %v337_v16 = vmul.f32 0.2, %v273_v6  ;;  %vm306_vm9 = vcmp.gt.f32.partialorder %v274_v7, 0.0 }
  0x33   : > { %400 = vst [vmem:[%s567_s24 + $0xb8] sm:$0xff] %v368_v11  ;;  %v338_v17 = vmul.f32 0.2, %v274_v7  ;;  %vm307_vm10 = vcmp.gt.f32.partialorder %v275_v8, 0.0  ;;  %v339_v18 = vmul.f32 0.2, %v275_v8  ;;  %v277_v22 = vadd.f32 %v539_v1, %v238_v12 }
  0x34   : > { %vm308_vm11 = vcmp.gt.f32.partialorder %v276_v9, 0.0  ;;  %v340_v19 = vmul.f32 0.2, %v276_v9  ;;  %v369_v20 = vsel %vm305_vm8, %v273_v6, %v337_v16  ;;  %v278_v23 = vadd.f32 %v539_v1, %v239_v13 }
  0x35   : > { %v370_v21 = vsel %vm306_vm9, %v274_v7, %v338_v17  ;;  %401 = vst [vmem:[%s567_s24 + $0xc0] sm:$0xff] %v369_v20  ;;  %v371_v24 = vsel %vm307_vm10, %v275_v8, %v339_v18  ;;  %v240_v26 = vmul.f32 %v529_v0, %v201_v14  ;;  %v241_v27 = vmul.f32 %v529_v0, %v202_v15 }
  0x36   : > { %402 = vst [vmem:[%s567_s24 + $0xc8] sm:$0xff] %v370_v21  ;;  %v372_v25 = vsel %vm308_vm11, %v276_v9, %v340_v19  ;;  %403 = vst [vmem:[%s567_s24 + $0xd0] sm:$0xff] %v371_v24  ;;  %vm309_vm12 = vcmp.gt.f32.partialorder %v277_v22, 0.0  ;;  %v341_v28 = vmul.f32 0.2, %v277_v22  ;;  %vm310_vm13 = vcmp.gt.f32.partialorder %v278_v23, 0.0 }
  0x37   : > { %404 = vst [vmem:[%s567_s24 + $0xd8] sm:$0xff] %v372_v25  ;;  %v342_v29 = vmul.f32 0.2, %v278_v23  ;;  %v279_v30 = vadd.f32 %v539_v1, %v240_v26  ;;  %v280_v31 = vadd.f32 %v539_v1, %v241_v27 }
  0x38   : > { %v373_v32 = vsel %vm309_vm12, %v277_v22, %v341_v28 }
  0x39   : > { %v374_v33 = vsel %vm310_vm13, %v278_v23, %v342_v29  ;;  %405 = vst [vmem:[%s567_s24 + $0xe0] sm:$0xff] %v373_v32  ;;  %vm311_vm14 = vcmp.gt.f32.partialorder %v279_v30, 0.0  ;;  %v343_v34 = vmul.f32 0.2, %v279_v30  ;;  %vm312_vm15 = vcmp.gt.f32.partialorder %v280_v31, 0.0 }
  0x3a   : > { %406 = vst [vmem:[%s567_s24 + $0xe8] sm:$0xff] %v374_v33  ;;  %v344_v0 = vmul.f32 0.2, %v280_v31 }
  0x3b   : > { %v375_v35 = vsel %vm311_vm14, %v279_v30, %v343_v34 }
  0x3c   : > { %v376_v36 = vsel %vm312_vm15, %v280_v31, %v344_v0  ;;  %407 = vst [vmem:[%s567_s24 + $0xf0] sm:$0xff] %v375_v35 }
  0x3d   : > { %408 = vst [vmem:[%s567_s24 + $0xf8] sm:$0xff] %v376_v36 }
  0x3e PF: > { %s13_s12 = sadd.s32 1, %s493_s12  }
  0x3f   : > { %p10_p4 = scmp.ge.s32.totalorder %s13_s12, 4  }
  0x41   :  { %12 = sbr.rel (!%p10_p4) target bundleno = 1 (0x1), region = 62 }

// kernel: conv_block_forward.4
= control target key start
LH: loop header
LB: loop body
LE: loop exit
PB: predicated region body
PF: predicated region fallthrough
CT: control target
= control target key end

     0   :  { %s5335_s18 = smov 0   ;;  %s6563_s0 = inlined_call_operand.vmem [shape: f32[2,16,16,128], index: 0, kind: input, shape index: {}]   ;;  %s6564_s1 = inlined_call_operand.vmem [shape: f32[1,128], index: 1, kind: input, shape index: {}]   ;;  %s6565_s2 = inlined_call_operand.vmem [shape: f32[1,128], index: 2, kind: input, shape index: {}]   ;;  %s6566_s3 = inlined_call_operand.vmem [shape: f32[9,128,128], index: 3, kind: input, shape index: {}]   ;;  %s6567_s4 = inlined_call_operand.vmem [shape: f32[2,256,128], index: 4, kind: output, shape index: {0}]   ;;  %s6568_s5 = inlined_call_operand.vmem [shape: f32[2,2,128], index: 5, kind: output, shape index: {1}]  }
   0x1 LB: > { %s3430_s19 = sadd.s32 4294967295, %s5302_s18   ;;  %p3434_p0 = scmp.ge.s32.totalorder %s5302_s18, 1  ;;  %s5302_s18 = sphi %s5335_s18, %s16_s18  }
   0x2   : > { %p190_p1 = scmp.lt.s32.totalorder %s5302_s18, 3 }
   0x4   : > { %p191_p2 = pnand %p3434_p0, %p190_p1 }
   0x6   : > { %194 = sbr.rel (%p191_p2) target bundleno = 570 (0x23a), region = 36 }
   0xd   : > { %v3442_v0 = vld [vmem:[%s6566_s3 + $0x80] sm:$0xff]  ;;  %v3443_v1 = vld [vmem:[%s6566_s3 + $0x88] sm:$0xff]  ;;  %p5354_p3 = scmp.lt.s32.totalorder %s3430_s19, 1  ;;  %v3444_v5 = vld [vmem:[%s6566_s3 + $0x90] sm:$0xff]  ;;  %v5304_v7 = vmov 0.0  }
   0xe   : > { %v3490_v2 = vld [vmem:[%s6566_s3 + $0x200] sm:$0xff]  ;;  %v4726_v3 = vpack.c.bf16 %v3443_v1, %v3442_v0  ;;  %v3491_v4 = vld [vmem:[%s6566_s3 + $0x208] sm:$0xff]  ;;  %v3445_v6 = vld [vmem:[%s6566_s3 + $0x98] sm:$0xff]  ;;  %442 = vst [vmem:[#allocation2] sm:$0xff] %v5304_v7 }
   0xf   : > { %443 = vst [vmem:[#allocation2 + $0x8] sm:$0xff] %v5304_v7  ;;  %444 = vst [vmem:[#allocation2 + $0x10] sm:$0x3] %v5304_v7  ;;  %v5367_v8 = vpack.c.bf16 %v3491_v4, %v3490_v2  ;;  %v4730_v9 = vpack.c.bf16 %v3445_v6, %v3444_v5  ;;  %v3492_v10 = vld [vmem:[%s6566_s3 + $0x210] sm:$0xff]  ;;  %v3493_v11 = vld [vmem:[%s6566_s3 + $0x218] sm:$0xff]  ;;  %s6633_s19 = smov (!%p5354_p3, %s3430_s19), 1 }
  0x10   : > { %446 = vst [vmem:[#allocation2 + $0x198] sm:$0xff] %v5304_v7  ;;  %447 = vst [vmem:[#allocation2 + $0x1a0] sm:$0xff] %v5304_v7  ;;  %v3446_v12 = vld [vmem:[%s6566_s3 + $0xa0] sm:$0xff]  ;;  %4727 = vmatprep.subr.bf16.mxu1 %v4726_v3  ;;  %v5384_v13 = vpack.c.bf16 %v3493_v11, %v3492_v10  ;;  %v3447_v14 = vld [vmem:[%s6566_s3 + $0xa8] sm:$0xff]  ;;  %s3572_s22 = sshll.u32 %s6633_s19, 8 }
  0x11   : > { %448 = vst [vmem:[#allocation2 + $0x1a8] sm:$0x3] %v5304_v7  ;;  %450 = vst [vmem:[#allocation2 + $0x18] sm:$0x1] %v5304_v7  ;;  %v3494_v15 = vld [vmem:[%s6566_s3 + $0x220] sm:$0xff]  ;;  %v3495_v16 = vld [vmem:[%s6566_s3 + $0x228] sm:$0xff]  ;;  %4855 = vmatprep.subr.bf16.mxu0 %v5367_v8  ;;  %4729 = vmatpush3.bf16.msra.mxu1 %v4726_v3  ;;  %v4734_v17 = vpack.c.bf16 %v3447_v14, %v3446_v12  ;;  %s5418_s8 = scalar_lea.vmem %s6563_s0, %s3572_s22 }
  0x12   : > { %451 = vst [vmem:[#allocation2 + $0x30] sm:$0x1] %v5304_v7  ;;  %452 = vst [vmem:[#allocation2 + $0x48] sm:$0x1] %v5304_v7  ;;  %4857 = vmatpush3.bf16.msra.mxu0 %v5367_v8  ;;  %4731 = vmatprep.subr.bf16.mxu1 %v4730_v9  ;;  %v5399_v18 = vpack.c.bf16 %v3495_v16, %v3494_v15  ;;  %v3448_v19 = vld [vmem:[%s6566_s3 + $0xb0] sm:$0xff]  ;;  %v3449_v20 = vld [vmem:[%s6566_s3 + $0xb8] sm:$0xff] }
  0x13   : > { %453 = vst [vmem:[#allocation2 + $0x60] sm:$0x1] %v5304_v7  ;;  %454 = vst [vmem:[#allocation2 + $0x78] sm:$0x1] %v5304_v7  ;;  %4859 = vmatprep.subr.bf16.mxu0 %v5384_v13  ;;  %v3496_v21 = vld [vmem:[%s6566_s3 + $0x230] sm:$0xff]  ;;  %v3497_v22 = vld [vmem:[%s6566_s3 + $0x238] sm:$0xff]  ;;  %v4738_v23 = vpack.c.bf16 %v3449_v20, %v3448_v19 }
  0x14   : > { %455 = vst [vmem:[#allocation2 + $0x90] sm:$0x1] %v5304_v7  ;;  %456 = vst [vmem:[#allocation2 + $0xa8] sm:$0x1] %v5304_v7  ;;  %v3450_v24 = vld [vmem:[%s6566_s3 + $0xc0] sm:$0xff]  ;;  %v3451_v25 = vld [vmem:[%s6566_s3 + $0xc8] sm:$0xff]  ;;  %v5431_v27 = vpack.c.bf16 %v3497_v22, %v3496_v21 }
  0x15   : > { %457 = vst [vmem:[#allocation2 + $0xc0] sm:$0x1] %v5304_v7  ;;  %458 = vst [vmem:[#allocation2 + $0xd8] sm:$0x1] %v5304_v7  ;;  %4733 = vmatpush3.bf16.msra.mxu1 %v4730_v9  ;;  %v3498_v26 = vld [vmem:[%s6566_s3 + $0x240] sm:$0xff]  ;;  %v3499_v28 = vld [vmem:[%s6566_s3 + $0x248] sm:$0xff]  ;;  %v4742_v38 = vpack.c.bf16 %v3451_v25, %v3450_v24 }
  0x16   : > { %459 = vst [vmem:[#allocation2 + $0xf0] sm:$0x1] %v5304_v7  ;;  %460 = vst [vmem:[#allocation2 + $0x108] sm:$0x1] %v5304_v7  ;;  %4861 = vmatpush3.bf16.msra.mxu0 %v5384_v13  ;;  %4735 = vmatprep.subr.bf16.mxu1 %v4734_v17  ;;  %v3452_v29 = vld [vmem:[%s6566_s3 + $0xd0] sm:$0xff]  ;;  %v562_v30 = vld [vmem:[#allocation2 + $0x1] sm:$0xff]  ;;  %v5469_v42 = vpack.c.bf16 %v3499_v28, %v3498_v26 }
  0x17   : > { %461 = vst [vmem:[#allocation2 + $0x120] sm:$0x1] %v5304_v7  ;;  %462 = vst [vmem:[#allocation2 + $0x138] sm:$0x1] %v5304_v7  ;;  %4863 = vmatprep.subr.bf16.mxu0 %v5399_v18  ;;  %4038 = vmatprep.mubr.f32.mxu1 %v562_v30  ;;  %v236_v31 = vld [vmem:[%s5418_s8] sm:$0xff]  ;;  %v3453_v34 = vld [vmem:[%s6566_s3 + $0xd8] sm:$0xff] }
  0x18   : > { %463 = vst [vmem:[#allocation2 + $0x150] sm:$0x1] %v5304_v7  ;;  %464 = vst [vmem:[#allocation2 + $0x168] sm:$0x1] %v5304_v7  ;;  %v5443_v32 = vld [vmem:[%s6564_s1] ss:$0 sm:$0xff]  ;;  %v5475_v47 = vpack.c.bf16 %v3453_v34, %v3452_v29 }
  0x19   : > { %465 = vst [vmem:[#allocation2 + $0x180] sm:$0x1] %v5304_v7  ;;  %466 = vst [vmem:[#allocation2 + $0x29] sm:$0x1] %v5304_v7  ;;  %v5448_v33 = vld [vmem:[%s6565_s2] ss:$0 sm:$0xff]  ;;  %4737 = vmatpush3.bf16.msra.mxu1 %v4734_v17  ;;  %v275_v37 = vmul.f32 %v5443_v32, %v236_v31 }
  0x1a   : > { %467 = vst [vmem:[#allocation2 + $0x41] sm:$0x1] %v5304_v7  ;;  %468 = vst [vmem:[#allocation2 + $0x59] sm:$0x1] %v5304_v7  ;;  %v3500_v35 = vld [vmem:[%s6566_s3 + $0x250] sm:$0xff]  ;;  %v3501_v36 = vld [vmem:[%s6566_s3 + $0x258] sm:$0xff]  ;;  %4865 = vmatpush3.bf16.msra.mxu0 %v5399_v18  ;;  %4739 = vmatprep.subr.bf16.mxu1 %v4738_v23 }
  0x1b   : > { %469 = vst [vmem:[#allocation2 + $0x71] sm:$0x1] %v5304_v7  ;;  %470 = vst [vmem:[#allocation2 + $0x89] sm:$0x1] %v5304_v7  ;;  %v3454_v39 = vld [vmem:[%s6566_s3 + $0xe0] sm:$0xff]  ;;  %v3455_v40 = vld [vmem:[%s6566_s3 + $0xe8] sm:$0xff]  ;;  %4867 = vmatprep.subr.bf16.mxu0 %v5431_v27  ;;  %v314_v43 = vadd.f32 %v5448_v33, %v275_v37  ;;  %v5477_v48 = vpack.c.bf16 %v3501_v36, %v3500_v35 }
  0x1c   : > { %471 = vst [vmem:[#allocation2 + $0xa1] sm:$0x1] %v5304_v7  ;;  %472 = vst [vmem:[#allocation2 + $0xb9] sm:$0x1] %v5304_v7  ;;  %v237_v41 = vld [vmem:[%s5418_s8 + $0x8] sm:$0xff]  ;;  %v238_v45 = vld [vmem:[%s5418_s8 + $0x10] sm:$0xff]  ;;  %v5488_v54 = vpack.c.bf16 %v3455_v40, %v3454_v39 }
  0x1d   : > { %473 = vst [vmem:[#allocation2 + $0xd1] sm:$0x1] %v5304_v7  ;;  %474 = vst [vmem:[#allocation2 + $0xe9] sm:$0x1] %v5304_v7  ;;  %v276_v44 = vmul.f32 %v5443_v32, %v237_v41  ;;  %v239_v46 = vld [vmem:[%s5418_s8 + $0x18] sm:$0xff]  ;;  %v3502_v49 = vld [vmem:[%s6566_s3 + $0x260] sm:$0xff]  ;;  %v277_v51 = vmul.f32 %v5443_v32, %v238_v45  ;;  %4741 = vmatpush3.bf16.msra.mxu1 %v4738_v23 }
  0x1e   : > { %475 = vst [vmem:[#allocation2 + $0x101] sm:$0x1] %v5304_v7  ;;  %476 = vst [vmem:[#allocation2 + $0x119] sm:$0x1] %v5304_v7  ;;  %v3503_v50 = vld [vmem:[%s6566_s3 + $0x268] sm:$0xff]  ;;  %v278_v52 = vmul.f32 %v5443_v32, %v239_v46  ;;  %v240_v53 = vld [vmem:[%s5418_s8 + $0x20] sm:$0xff]  ;;  %4869 = vmatpush3.bf16.msra.mxu0 %v5431_v27  ;;  %4743 = vmatprep.subr.bf16.mxu1 %v4742_v38 }
  0x1f   : > { %477 = vst [vmem:[#allocation2 + $0x131] sm:$0x1] %v5304_v7  ;;  %478 = vst [vmem:[#allocation2 + $0x149] sm:$0x1] %v5304_v7  ;;  %vm346_vm0 = vcmp.gt.f32.partialorder %v314_v43, 0.0  ;;  %v315_v56 = vadd.f32 %v5448_v33, %v276_v44  ;;  %v3456_v57 = vld [vmem:[%s6566_s3 + $0xf0] sm:$0xff]  ;;  %v316_v59 = vadd.f32 %v5448_v33, %v277_v51  ;;  %v279_v61 = vmul.f32 %v5443_v32, %v240_v53 }
  0x20   : > { %479 = vst [vmem:[#allocation2 + $0x161] sm:$0x1] %v5304_v7  ;;  %480 = vst [vmem:[#allocation2 + $0x179] sm:$0x1] %v5304_v7  ;;  %v378_v55 = vmul.f32 0.2, %v314_v43  ;;  %v317_v60 = vadd.f32 %v5448_v33, %v278_v52  ;;  %4871 = vmatprep.subr.bf16.mxu0 %v5469_v42  ;;  %v5503_v63 = vpack.c.bf16 %v3503_v50, %v3502_v49 }
  0x21   : > { %481 = vst [vmem:[#allocation2 + $0x191] sm:$0x1] %v5304_v7  ;;  %6594 = vst [vmem:[#allocation3_spill] sm:$0xff] %v5431_v27  ;;  %v3457_v58 = vld [vmem:[%s6566_s3 + $0xf8] sm:$0xff]  ;;  %v241_v62 = vld [vmem:[%s5418_s8 + $0x28] sm:$0xff]  ;;  %vm347_vm1 = vcmp.gt.f32.partialorder %v315_v56, 0.0  ;;  %4745 = vmatpush3.bf16.msra.mxu1 %v4742_v38  ;;  %v318_v14 = vadd.f32 %v5448_v33, %v279_v61 }
  0x22   : > { %6595 = vst [vmem:[#allocation4_spill] sm:$0xff] %v5469_v42  ;;  %6596 = vst [vmem:[#allocation5_spill] sm:$0xff] %v5477_v48  ;;  %v3504_v0 = vld [vmem:[%s6566_s3 + $0x270] sm:$0xff]  ;;  %v3505_v1 = vld [vmem:[%s6566_s3 + $0x278] sm:$0xff]  ;;  %v5511_v2 = vsel %vm346_vm0, %v314_v43, %v378_v55  ;;  %v379_v3 = vmul.f32 0.2, %v315_v56  ;;  %v5517_v9 = vpack.c.bf16 %v3457_v58, %v3456_v57  ;;  %v280_v15 = vmul.f32 %v5443_v32, %v241_v62 }
  0x23   : > { %6597 = vst [vmem:[#allocation6_spill] sm:$0xff] %v5503_v63  ;;  %v242_v4 = vld [vmem:[%s5418_s8 + $0x30] sm:$0xff]  ;;  %v243_v5 = vld [vmem:[%s5418_s8 + $0x38] sm:$0xff]  ;;  %482 = vst [vmem:[#allocation2 + $0x19] sm:$0xff] %v5511_v2  ;;  %4358 = vmatprep.mubr.f32.mxu0 %v5511_v2  ;;  %vm348_vm2 = vcmp.gt.f32.partialorder %v316_v59, 0.0  ;;  %vm349_vm3 = vcmp.gt.f32.partialorder %v317_v60, 0.0  ;;  %4873 = vmatpush3.bf16.msra.mxu0 %v5469_v42  ;;  %v5544_v25 = vpack.c.bf16 %v3505_v1, %v3504_v0 }
  0x24   : > { %v380_v6 = vmul.f32 0.2, %v316_v59  ;;  %v381_v7 = vmul.f32 0.2, %v317_v60  ;;  %v546_v10 = vld [vmem:[%s6566_s3] sm:$0xff]  ;;  %v547_v11 = vld [vmem:[%s6566_s3 + $0x8] sm:$0xff]  ;;  %v5525_v12 = vsel %vm347_vm1, %v315_v56, %v379_v3  ;;  %4747 = vmatprep.subr.bf16.mxu1 %v5475_v47  ;;  %v281_v20 = vmul.f32 %v5443_v32, %v242_v4  ;;  %4875 = vmatprep.subr.bf16.mxu0 %v5477_v48 }
  0x25   : > { %v244_v16 = vld [vmem:[%s5418_s8 + $0x40] sm:$0xff]  ;;  %483 = vst [vmem:[#allocation2 + $0x21] sm:$0xff] %v5525_v12  ;;  %vm350_vm4 = vcmp.gt.f32.partialorder %v318_v14, 0.0  ;;  %v382_v21 = vmul.f32 0.2, %v318_v14  ;;  %v319_v22 = vadd.f32 %v5448_v33, %v280_v15  ;;  %v282_v23 = vmul.f32 %v5443_v32, %v243_v5  ;;  %v245_v24 = vld [vmem:[%s5418_s8 + $0x48] sm:$0xff]  ;;  %4749 = vmatpush3.bf16.msra.mxu1 %v5475_v47 }
  0x26   : > { %v5533_v17 = vsel %vm348_vm2, %v316_v59, %v380_v6  ;;  %v5535_v19 = vsel %vm349_vm3, %v317_v60, %v381_v7  ;;  %6598 = vst [vmem:[#allocation7_spill] sm:$0xff] %v5544_v25  ;;  %v5546_v26 = vpack.c.bf16 %v547_v11, %v546_v10  ;;  %v3506_v28 = vld [vmem:[%s6566_s3 + $0x280] sm:$0xff]  ;;  %v3507_v29 = vld [vmem:[%s6566_s3 + $0x288] sm:$0xff]  ;;  %v320_v30 = vadd.f32 %v5448_v33, %v281_v20  ;;  %v3508_v34 = vld [vmem:[%s6566_s3 + $0x290] sm:$0xff] }
  0x27   : > { %484 = vst [vmem:[#allocation2 + $0x31] sm:$0xff] %v5533_v17  ;;  %485 = vst [vmem:[#allocation2 + $0x39] sm:$0xff] %v5535_v19  ;;  %v283_v31 = vmul.f32 %v5443_v32, %v244_v16  ;;  %v5560_v35 = vsel %vm350_vm4, %v318_v14, %v382_v21  ;;  %vm351_vm5 = vcmp.gt.f32.partialorder %v319_v22, 0.0  ;;  %v383_v36 = vmul.f32 0.2, %v319_v22  ;;  %4877 = vmatpush3.bf16.msra.mxu0 %v5477_v48  ;;  %v3509_v38 = vld [vmem:[%s6566_s3 + $0x298] sm:$0xff] }
  0x28   : > { %v321_v37 = vadd.f32 %v5448_v33, %v282_v23  ;;  %4751 = vmatprep.subr.bf16.mxu1 %v5488_v54  ;;  %486 = vst [vmem:[#allocation2 + $0x49] sm:$0xff] %v5560_v35  ;;  %vm352_vm6 = vcmp.gt.f32.partialorder %v320_v30, 0.0  ;;  %v384_v39 = vmul.f32 0.2, %v320_v30  ;;  %v284_v41 = vmul.f32 %v5443_v32, %v245_v24  ;;  %v246_v43 = vld [vmem:[%s5418_s8 + $0x50] sm:$0xff]  ;;  %v247_v44 = vld [vmem:[%s5418_s8 + $0x58] sm:$0xff]  ;;  %4879 = vmatprep.subr.bf16.mxu0 %v5503_v63 }
  0x29   : > { %v322_v40 = vadd.f32 %v5448_v33, %v283_v31  ;;  %v5574_v45 = vpack.c.bf16 %v3507_v29, %v3506_v28  ;;  %v5576_v46 = vsel %vm351_vm5, %v319_v22, %v383_v36  ;;  %v248_v49 = vld [vmem:[%s5418_s8 + $0x60] sm:$0xff]  ;;  %v548_v50 = vld [vmem:[%s6566_s3 + $0x10] sm:$0xff]  ;;  %v549_v51 = vld [vmem:[%s6566_s3 + $0x18] sm:$0xff]  ;;  %4753 = vmatpush3.bf16.msra.mxu1 %v5488_v54  ;;  %v5591_v57 = vpack.c.bf16 %v3509_v38, %v3508_v34 }
  0x2a   : > { %vm353_vm7 = vcmp.gt.f32.partialorder %v321_v37, 0.0  ;;  %v385_v47 = vmul.f32 0.2, %v321_v37  ;;  %487 = vst [vmem:[#allocation2 + $0x51] sm:$0xff] %v5576_v46  ;;  %v5586_v52 = vsel %vm352_vm6, %v320_v30, %v384_v39  ;;  %v323_v55 = vadd.f32 %v5448_v33, %v284_v41  ;;  %v249_v56 = vld [vmem:[%s5418_s8 + $0x68] sm:$0xff]  ;;  %v3510_v58 = vld [vmem:[%s6566_s3 + $0x2a0] sm:$0xff]  ;;  %4755 = vmatprep.subr.bf16.mxu1 %v5517_v9 }
  0x2b   : > { %vm354_vm8 = vcmp.gt.f32.partialorder %v322_v40, 0.0  ;;  %v386_v53 = vmul.f32 0.2, %v322_v40  ;;  %v3511_v59 = vld [vmem:[%s6566_s3 + $0x2a8] sm:$0xff]  ;;  %488 = vst [vmem:[#allocation2 + $0x61] sm:$0xff] %v5586_v52  ;;  %v285_v61 = vmul.f32 %v5443_v32, %v246_v43  ;;  %v286_v62 = vmul.f32 %v5443_v32, %v247_v44  ;;  %v250_v54 = vld [vmem:[%s5418_s8 + $0x70] sm:$0xff]  ;;  %4881 = vmatpush3.bf16.msra.mxu0 %v5503_v63 }
  0x2c   : > { %v5601_v60 = vsel %vm353_vm7, %v321_v37, %v385_v47  ;;  %vm355_vm9 = vcmp.gt.f32.partialorder %v323_v55, 0.0  ;;  %v387_v1 = vmul.f32 0.2, %v323_v55  ;;  %v287_v3 = vmul.f32 %v5443_v32, %v248_v49  ;;  %4883 = vmatprep.subr.bf16.mxu0 %v5544_v25  ;;  %v563_v4 = vld [vmem:[#allocation2 + $0x9] sm:$0xff]  ;;  %v3513_v15 = vld [vmem:[%s6566_s3 + $0x2b8] sm:$0xff]  ;;  %v550_v16 = vld [vmem:[%s6566_s3 + $0x20] sm:$0xff] }
  0x2d   : > { %489 = vst [vmem:[#allocation2 + $0x69] sm:$0xff] %v5601_v60  ;;  %v5610_v0 = vsel %vm354_vm8, %v322_v40, %v386_v53  ;;  %v5614_v5 = vpack.c.bf16 %v549_v51, %v548_v50  ;;  %v3512_v6 = vld [vmem:[%s6566_s3 + $0x2b0] sm:$0xff]  ;;  %v324_v7 = vadd.f32 %v5448_v33, %v285_v61  ;;  %v325_v10 = vadd.f32 %v5448_v33, %v286_v62  ;;  %v251_v23 = vld [vmem:[%s5418_s8 + $0x78] sm:$0xff]  ;;  %v551_v29 = vld [vmem:[%s6566_s3 + $0x28] sm:$0xff] }
  0x2e   : > { %490 = vst [vmem:[#allocation2 + $0x79] sm:$0xff] %v5610_v0  ;;  %v288_v11 = vmul.f32 %v5443_v32, %v249_v56  ;;  %v5623_v14 = vpack.c.bf16 %v3511_v59, %v3510_v58  ;;  %v5631_v20 = vsel %vm355_vm9, %v323_v55, %v387_v1  ;;  %v326_v21 = vadd.f32 %v5448_v33, %v287_v3  ;;  %v3515_v30 = vld [vmem:[%s6566_s3 + $0x2c8] sm:$0xff]  ;;  %v252_v41 = vld [vmem:[%s5418_s8 + $0x80] sm:$0xff]  ;;  %v254_v49 = vld [vmem:[%s5418_s8 + $0x90] sm:$0xff] }
  0x2f   : > { %v289_v22 = vmul.f32 %v5443_v32, %v250_v54  ;;  %4757 = vmatpush3.bf16.msra.mxu1 %v5517_v9  ;;  %491 = vst [vmem:[#allocation2 + $0x81] sm:$0xff] %v5631_v20  ;;  %vm356_vm10 = vcmp.gt.f32.partialorder %v324_v7, 0.0  ;;  %v388_v24 = vmul.f32 0.2, %v324_v7  ;;  %vm357_vm11 = vcmp.gt.f32.partialorder %v325_v10, 0.0  ;;  %4885 = vmatpush3.bf16.msra.mxu0 %v5544_v25  ;;  %v3514_v9 = vld [vmem:[%s6566_s3 + $0x2c0] sm:$0xff] }
  0x30   : > { %v389_v28 = vmul.f32 0.2, %v325_v10  ;;  %4759 = vmatprep.subr.bf16.mxu1 %v5546_v26  ;;  %vm358_vm12 = vcmp.gt.f32.partialorder %v326_v21, 0.0  ;;  %v390_v31 = vmul.f32 0.2, %v326_v21  ;;  %v327_v34 = vadd.f32 %v5448_v33, %v288_v11  ;;  %4887 = vmatprep.subr.bf16.mxu0 %v5574_v45  ;;  %v253_v43 = vld [vmem:[%s5418_s8 + $0x88] sm:$0xff] }
  0x31   : > { %v328_v36 = vadd.f32 %v5448_v33, %v289_v22  ;;  %v5652_v37 = vpack.c.bf16 %v3513_v15, %v3512_v6  ;;  %v5654_v38 = vsel %vm356_vm10, %v324_v7, %v388_v24  ;;  %v290_v40 = vmul.f32 %v5443_v32, %v251_v23  ;;  %v255_v56 = vld [vmem:[%s5418_s8 + $0x98] sm:$0xff]  ;;  %v3516_v58 = vld [vmem:[%s6566_s3 + $0x2d0] sm:$0xff]  ;;  %v256_v15 = vld [vmem:[%s5418_s8 + $0xa0] sm:$0xff] }
  0x32   : > { %v5656_v39 = vsel %vm357_vm11, %v325_v10, %v389_v28  ;;  %4039 = vmatmul.mubr.f32.vlgmr.msra.gmra.mrb[0].mxu1 %v563_v4  ;;  %492 = vst [vmem:[#allocation2 + $0x91] sm:$0xff] %v5654_v38  ;;  %v5663_v44 = vsel %vm358_vm12, %v326_v21, %v390_v31  ;;  %vm359_vm13 = vcmp.gt.f32.partialorder %v327_v34, 0.0  ;;  %v391_v47 = vmul.f32 0.2, %v327_v34  ;;  %4359 = vmatmul.mubr.f32.vlgmr.msra.gmra.mrb[0].mxu0 %v5525_v12  ;;  %v552_v1 = vld [vmem:[%s6566_s3 + $0x30] sm:$0xff]  ;;  %v553_v3 = vld [vmem:[%s6566_s3 + $0x38] sm:$0xff] }
  0x33   : > { %493 = vst [vmem:[#allocation2 + $0x99] sm:$0xff] %v5656_v39  ;;  %vm360_vm14 = vcmp.gt.f32.partialorder %v328_v36, 0.0  ;;  %4761 = vmatpush3.bf16.msra.mxu1 %v5546_v26  ;;  %v5668_v50 = vpack.c.bf16 %v551_v29, %v550_v16  ;;  %v5670_v51 = vpack.c.bf16 %v3515_v30, %v3514_v9  ;;  %494 = vst [vmem:[#allocation2 + $0xa9] sm:$0xff] %v5663_v44  ;;  %v392_v53 = vmul.f32 0.2, %v328_v36  ;;  %v3517_v26 = vld [vmem:[%s6566_s3 + $0x2d8] sm:$0xff] }
  0x34   : > { %v329_v55 = vadd.f32 %v5448_v33, %v290_v40  ;;  %4889 = vmatpush3.bf16.msra.mxu0 %v5574_v45  ;;  %4041 = vmatprep.mubr.f32.mxu1 %v5511_v2  ;;  %v5684_v59 = vsel %vm359_vm13, %v327_v34, %v391_v47  ;;  %v291_v61 = vmul.f32 %v5443_v32, %v252_v41  ;;  %v257_v16 = vld [vmem:[%s5418_s8 + $0xa8] sm:$0xff]  ;;  %v258_v28 = vld [vmem:[%s5418_s8 + $0xb0] sm:$0xff]  ;;  %v259_v29 = vld [vmem:[%s5418_s8 + $0xb8] sm:$0xff] }
  0x35   : > { %v292_v62 = vmul.f32 %v5443_v32, %v253_v43  ;;  %4361 = vmatprep.mubr.f32.mxu0 %v5533_v17  ;;  %4891 = vmatprep.subr.bf16.mxu0 %v5591_v57  ;;  %495 = vst [vmem:[#allocation2 + $0xb1] sm:$0xff] %v5684_v59  ;;  %v5692_v2 = vsel %vm360_vm14, %v328_v36, %v392_v53  ;;  %v555_v9 = vld [vmem:[%s6566_s3 + $0x48] sm:$0xff]  ;;  %v557_v40 = vld [vmem:[%s6566_s3 + $0x58] sm:$0xff] }
  0x36   : > { %vm361_vm15 = vcmp.gt.f32.partialorder %v329_v55, 0.0  ;;  %v393_v45 = vmul.f32 0.2, %v329_v55  ;;  %v293_v54 = vmul.f32 %v5443_v32, %v254_v49  ;;  %4042 = vmatmul.mubr.f32.gmra.mrb[2].mxu1 %v5525_v12  ;;  %4763 = vmatprep.subr.bf16.mxu1 %v5614_v5  ;;  %496 = vst [vmem:[#allocation2 + $0xc1] sm:$0xff] %v5692_v2  ;;  %v330_v4 = vadd.f32 %v5448_v33, %v291_v61  ;;  %v261_v61 = vld [vmem:[%s5418_s8 + $0xc8] sm:$0xff]  ;;  %v3545_v48 = vld [vmem:[%s6566_s3 + $0x3b8] sm:$0xff] }
  0x37   : > { %v331_v6 = vadd.f32 %v5448_v33, %v292_v62  ;;  %v294_v7 = vmul.f32 %v5443_v32, %v255_v56  ;;  %4362 = vmatmul.mubr.f32.gmra.mrb[2].mxu0 %v5535_v19  ;;  %4044 = vmatprep.mubr.f32.mxu1 %v5533_v17  ;;  %v5709_v12 = vpack.c.bf16 %v3517_v26, %v3516_v58  ;;  %v3475_v25 = vld [vmem:[%s6566_s3 + $0x188] sm:$0xff] }
  0x38   : > { %v5711_v10 = vsel %vm361_vm15, %v329_v55, %v393_v45  ;;  %v332_v11 = vadd.f32 %v5448_v33, %v293_v54  ;;  %4893 = vmatpush3.bf16.msra.mxu0 %v5591_v57  ;;  %4364 = vmatprep.mubr.f32.mxu0 %v5560_v35  ;;  %vm362_vm0 = vcmp.gt.f32.partialorder %v330_v4, 0.0  ;;  %v394_v21 = vmul.f32 0.2, %v330_v4  ;;  %v554_v57 = vld [vmem:[%s6566_s3 + $0x40] sm:$0xff]  ;;  %v262_v45 = vld [vmem:[%s5418_s8 + $0xd0] sm:$0xff]  ;;  %v263_v54 = vld [vmem:[%s5418_s8 + $0xd8] sm:$0xff] }
  0x39   : > { %497 = vst [vmem:[#allocation2 + $0xc9] sm:$0xff] %v5711_v10  ;;  %vm363_vm1 = vcmp.gt.f32.partialorder %v331_v6, 0.0  ;;  %v395_v17 = vmul.f32 0.2, %v331_v6  ;;  %4895 = vmatprep.subr.bf16.mxu0 %v5623_v14  ;;  %4765 = vmatpush3.bf16.msra.mxu1 %v5614_v5  ;;  %v4770_v22 = vpack.c.bf16 %v553_v3, %v552_v1  ;;  %v333_v24 = vadd.f32 %v5448_v33, %v294_v7  ;;  %v3547_v42 = vld [vmem:[%s6566_s3 + $0x3c8] sm:$0xff] }
  0x3a   : > { %vm364_vm2 = vcmp.gt.f32.partialorder %v332_v11, 0.0  ;;  %v396_v23 = vmul.f32 0.2, %v332_v11  ;;  %4045 = vmatmul.mubr.f32.gmra.mrb[4].mxu1 %v5535_v19  ;;  %4767 = vmatprep.subr.bf16.mxu1 %v5668_v50  ;;  %v5733_v5 = vsel %vm362_vm0, %v330_v4, %v394_v21  ;;  %v295_v31 = vmul.f32 %v5443_v32, %v256_v15  ;;  %v3519_v4 = vld [vmem:[%s6566_s3 + $0x2e8] sm:$0xff] }
  0x3b   : > { %v5735_v30 = vsel %vm363_vm1, %v331_v6, %v395_v17  ;;  %4365 = vmatmul.mubr.f32.gmra.mrb[4].mxu0 %v5576_v46  ;;  %4047 = vmatprep.mubr.f32.mxu1 %v5560_v35  ;;  %498 = vst [vmem:[#allocation2 + $0xd9] sm:$0xff] %v5733_v5  ;;  %vm365_vm3 = vcmp.gt.f32.partialorder %v333_v24, 0.0  ;;  %v397_v34 = vmul.f32 0.2, %v333_v24  ;;  %v296_v36 = vmul.f32 %v5443_v32, %v257_v16  ;;  %v556_v35 = vld [vmem:[%s6566_s3 + $0x50] sm:$0xff]  ;;  %v558_v16 = vld [vmem:[%s6566_s3 + $0x60] sm:$0xff] }
  0x3c   : > { %499 = vst [vmem:[#allocation2 + $0xe1] sm:$0xff] %v5735_v30  ;;  %v5743_v19 = vsel %vm364_vm2, %v332_v11, %v396_v23  ;;  %4897 = vmatpush3.bf16.msra.mxu0 %v5623_v14  ;;  %4367 = vmatprep.mubr.f32.mxu0 %v5586_v52  ;;  %v334_v41 = vadd.f32 %v5448_v33, %v295_v31  ;;  %v260_v14 = vld [vmem:[%s5418_s8 + $0xc0] sm:$0xff]  ;;  %v559_v21 = vld [vmem:[%s6566_s3 + $0x68] sm:$0xff]  ;;  %v3520_v31 = vld [vmem:[%s6566_s3 + $0x2f0] sm:$0xff] }
  0x3d   : > { %500 = vst [vmem:[#allocation2 + $0xf1] sm:$0xff] %v5743_v19  ;;  %v297_v43 = vmul.f32 %v5443_v32, %v258_v28  ;;  %v298_v47 = vmul.f32 %v5443_v32, %v259_v29  ;;  %4899 = vmatprep.subr.bf16.mxu0 %v5652_v37  ;;  %4769 = vmatpush3.bf16.msra.mxu1 %v5668_v50  ;;  %v6146_v63 = vld [vmem:[#allocation2 + $0xc0] sm:$0xff] }
  0x3e   : > { %v4774_v49 = vpack.c.bf16 %v555_v9, %v554_v57  ;;  %v5761_v53 = vsel %vm365_vm3, %v333_v24, %v397_v34  ;;  %v335_v55 = vadd.f32 %v5448_v33, %v296_v36  ;;  %4048 = vmatmul.mubr.f32.gmra.mrb[6].mxu1 %v5576_v46  ;;  %4771 = vmatprep.subr.bf16.mxu1 %v4770_v22  ;;  %vm366_vm4 = vcmp.gt.f32.partialorder %v334_v41, 0.0  ;;  %v264_v57 = vld [vmem:[%s5418_s8 + $0xe0] sm:$0xff]  ;;  %v265_v9 = vld [vmem:[%s5418_s8 + $0xe8] sm:$0xff] }
  0x3f   : > { %501 = vst [vmem:[#allocation2 + $0xf9] sm:$0xff] %v5761_v53  ;;  %v398_v56 = vmul.f32 0.2, %v334_v41  ;;  %v336_v58 = vadd.f32 %v5448_v33, %v297_v43  ;;  %v337_v26 = vadd.f32 %v5448_v33, %v298_v47  ;;  %4368 = vmatmul.mubr.f32.gmra.mrb[6].mxu0 %v5601_v60  ;;  %4050 = vmatprep.mubr.f32.mxu1 %v5586_v52  ;;  %v3518_v52 = vld [vmem:[%s6566_s3 + $0x2e0] sm:$0xff]  ;;  %v560_v47 = vld [vmem:[%s6566_s3 + $0x70] sm:$0xff]  ;;  %6611 = vst [vmem:[#allocation20_spill] sm:$0xff] %v6146_v63 }
  0x40   : > { %v5771_v50 = vpack.c.bf16 %v557_v40, %v556_v35  ;;  %vm367_vm5 = vcmp.gt.f32.partialorder %v335_v55, 0.0  ;;  %v399_v62 = vmul.f32 0.2, %v335_v55  ;;  %v299_v46 = vmul.f32 %v5443_v32, %v260_v14  ;;  %4901 = vmatpush3.bf16.msra.mxu0 %v5652_v37  ;;  %4370 = vmatprep.mubr.f32.mxu0 %v5610_v0 }
  0x41   : > { %v5778_v1 = vsel %vm366_vm4, %v334_v41, %v398_v56  ;;  %vm368_vm6 = vcmp.gt.f32.partialorder %v336_v58, 0.0  ;;  %v400_v3 = vmul.f32 0.2, %v336_v58  ;;  %vm369_vm7 = vcmp.gt.f32.partialorder %v337_v26, 0.0  ;;  %4903 = vmatprep.subr.bf16.mxu0 %v5670_v51  ;;  %4773 = vmatpush3.bf16.msra.mxu1 %v4770_v22 }
  0x42   : > { %502 = vst [vmem:[#allocation2 + $0x109] sm:$0xff] %v5778_v1  ;;  %v5789_v37 = vsel %vm367_vm5, %v335_v55, %v399_v62  ;;  %v401_v6 = vmul.f32 0.2, %v337_v26  ;;  %v338_v7 = vadd.f32 %v5448_v33, %v299_v46  ;;  %v300_v11 = vmul.f32 %v5443_v32, %v261_v61  ;;  %4051 = vmatmul.mubr.f32.gmra.mrb[8].mxu1 %v5601_v60  ;;  %v3458_v62 = vld [vmem:[%s6566_s3 + $0x100] sm:$0xff] }
  0x43   : > { %4775 = vmatprep.subr.bf16.mxu1 %v4774_v49  ;;  %503 = vst [vmem:[#allocation2 + $0x111] sm:$0xff] %v5789_v37  ;;  %v5795_v15 = vsel %vm368_vm6, %v336_v58, %v400_v3  ;;  %v301_v17 = vmul.f32 %v5443_v32, %v262_v45  ;;  %v302_v22 = vmul.f32 %v5443_v32, %v263_v54  ;;  %v3522_v58 = vld [vmem:[%s6566_s3 + $0x300] sm:$0xff]  ;;  %v266_v45 = vld [vmem:[%s5418_s8 + $0xf0] sm:$0xff]  ;;  %v267_v54 = vld [vmem:[%s5418_s8 + $0xf8] sm:$0xff]  ;;  %s6517_s8 = scalar_lea.vmem %s6567_s4, %s3572_s22  ;;  %s3439_s22 = sshll.u32 %s6633_s19, 1 }
  0x44   : > { %4371 = vmatmul.mubr.f32.gmra.mrb[8].mxu0 %v5631_v20  ;;  %4053 = vmatprep.mubr.f32.mxu1 %v5610_v0  ;;  %504 = vst [vmem:[#allocation2 + $0x121] sm:$0xff] %v5795_v15  ;;  %v5809_v60 = vsel %vm369_vm7, %v337_v26, %v401_v6  ;;  %vm370_vm8 = vcmp.gt.f32.partialorder %v338_v7, 0.0  ;;  %v402_v23 = vmul.f32 0.2, %v338_v7  ;;  %v339_v24 = vadd.f32 %v5448_v33, %v300_v11  ;;  %s235_s14 = scalar_lea.vmem %s6568_s5, %s3439_s22 }
  0x45   : > { %4905 = vmatpush3.bf16.msra.mxu0 %v5670_v51  ;;  %4373 = vmatprep.mubr.f32.mxu0 %v5654_v38  ;;  %v4910_v28 = vpack.c.bf16 %v3519_v4, %v3518_v52  ;;  %505 = vst [vmem:[#allocation2 + $0x129] sm:$0xff] %v5809_v60  ;;  %v340_v29 = vadd.f32 %v5448_v33, %v301_v17  ;;  %v3521_v51 = vld [vmem:[%s6566_s3 + $0x2f8] sm:$0xff] }
  0x46   : > { %v341_v0 = vadd.f32 %v5448_v33, %v302_v22  ;;  %4907 = vmatprep.subr.bf16.mxu0 %v5709_v12  ;;  %4777 = vmatpush3.bf16.msra.mxu1 %v4774_v49  ;;  %v4782_v34 = vpack.c.bf16 %v559_v21, %v558_v16  ;;  %v5827_v36 = vsel %vm370_vm8, %v338_v7, %v402_v23  ;;  %vm371_vm9 = vcmp.gt.f32.partialorder %v339_v24, 0.0  ;;  %v5874_v4 = vld [vmem:[#allocation2 + $0x1a] sm:$0xff]  ;;  %v5897_v22 = vld [vmem:[#allocation2 + $0x22] sm:$0xff] }
  0x47   : > { %v403_v35 = vmul.f32 0.2, %v339_v24  ;;  %4054 = vmatmul.mubr.f32.gmra.mrb[10].mxu1 %v5631_v20  ;;  %4779 = vmatprep.subr.bf16.mxu1 %v5771_v50  ;;  %506 = vst [vmem:[#allocation2 + $0x139] sm:$0xff] %v5827_v36  ;;  %vm372_vm10 = vcmp.gt.f32.partialorder %v340_v29, 0.0  ;;  %v404_v40 = vmul.f32 0.2, %v340_v29  ;;  %v303_v14 = vmul.f32 %v5443_v32, %v264_v57 }
  0x48   : > { %vm373_vm11 = vcmp.gt.f32.partialorder %v341_v0, 0.0  ;;  %v405_v41 = vmul.f32 0.2, %v341_v0  ;;  %4374 = vmatmul.mubr.f32.gmra.mrb[10].mxu0 %v5656_v39  ;;  %4056 = vmatprep.mubr.f32.mxu1 %v5654_v38  ;;  %v561_v20 = vld [vmem:[%s6566_s3 + $0x78] sm:$0xff]  ;;  %v304_v49 = vmul.f32 %v5443_v32, %v265_v9  ;;  %v4914_v56 = vpack.c.bf16 %v3521_v51, %v3520_v31  ;;  %v5920_v9 = vld [vmem:[#allocation2 + $0x4a] sm:$0xff] }
  0x49   : > { %v5834_v43 = vsel %vm371_vm9, %v339_v24, %v403_v35  ;;  %4909 = vmatpush3.bf16.msra.mxu0 %v5709_v12  ;;  %4376 = vmatprep.mubr.f32.mxu0 %v5663_v44  ;;  %v5847_v38 = vsel %vm372_vm10, %v340_v29, %v404_v40  ;;  %v3523_v12 = vld [vmem:[%s6566_s3 + $0x308] sm:$0xff]  ;;  %v342_v26 = vadd.f32 %v5448_v33, %v303_v14  ;;  %v3525_v16 = vld [vmem:[%s6566_s3 + $0x318] sm:$0xff]  ;;  %v3530_v40 = vld [vmem:[%s6566_s3 + $0x340] sm:$0xff] }
  0x4a   : > { %507 = vst [vmem:[#allocation2 + $0x141] sm:$0xff] %v5834_v43  ;;  %v5849_v55 = vsel %vm373_vm11, %v341_v0, %v405_v41  ;;  %4911 = vmatprep.subr.bf16.mxu0 %v4910_v28  ;;  %4781 = vmatpush3.bf16.msra.mxu1 %v5771_v50  ;;  %508 = vst [vmem:[#allocation2 + $0x151] sm:$0xff] %v5847_v38  ;;  %v343_v61 = vadd.f32 %v5448_v33, %v304_v49  ;;  %v3459_v50 = vld [vmem:[%s6566_s3 + $0x108] sm:$0xff]  ;;  %v5900_v24 = vld [vmem:[#allocation2 + $0x32] sm:$0xff] }
  0x4b   : > { %509 = vst [vmem:[#allocation2 + $0x159] sm:$0xff] %v5849_v55  ;;  %4057 = vmatmul.mubr.f32.gmra.mrb[12].mxu1 %v5656_v39  ;;  %4783 = vmatprep.subr.bf16.mxu1 %v4782_v34  ;;  %v4786_v46 = vpack.c.bf16 %v561_v20, %v560_v47  ;;  %vm374_vm12 = vcmp.gt.f32.partialorder %v342_v26, 0.0  ;;  %v406_v3 = vmul.f32 0.2, %v342_v26  ;;  %v4918_v39 = vpack.c.bf16 %v3523_v12, %v3522_v58  ;;  %v3527_v29 = vld [vmem:[%s6566_s3 + $0x328] sm:$0xff]  ;;  %v3529_v51 = vld [vmem:[%s6566_s3 + $0x338] sm:$0xff] }
  0x4c   : > { %4377 = vmatmul.mubr.f32.gmra.mrb[12].mxu0 %v5684_v59  ;;  %4059 = vmatprep.mubr.f32.mxu1 %v5663_v44  ;;  %vm375_vm13 = vcmp.gt.f32.partialorder %v343_v61, 0.0  ;;  %v407_v52 = vmul.f32 0.2, %v343_v61  ;;  %v305_v11 = vmul.f32 %v5443_v32, %v266_v45  ;;  %v3524_v44 = vld [vmem:[%s6566_s3 + $0x310] sm:$0xff]  ;;  %v5890_v21 = vpack.c.bf16 %v3459_v50, %v3458_v62  ;;  %v5935_v35 = vld [vmem:[#allocation2 + $0x62] sm:$0xff]  ;;  %v5949_v47 = vld [vmem:[#allocation2 + $0x7a] sm:$0xff] }
  0x4d   : > { %4913 = vmatpush3.bf16.msra.mxu0 %v4910_v28  ;;  %4379 = vmatprep.mubr.f32.mxu0 %v5692_v2  ;;  %v5876_v6 = vsel %vm374_vm12, %v342_v26, %v406_v3  ;;  %v306_v17 = vmul.f32 %v5443_v32, %v267_v54  ;;  %v4922_v28 = vpack.c.bf16 %v3525_v16, %v3524_v44  ;;  %v3531_v41 = vld [vmem:[%s6566_s3 + $0x348] sm:$0xff]  ;;  %v3532_v20 = vld [vmem:[%s6566_s3 + $0x350] sm:$0xff]  ;;  %v3533_v14 = vld [vmem:[%s6566_s3 + $0x358] sm:$0xff] }
  0x4e   : > { %4915 = vmatprep.subr.bf16.mxu0 %v4914_v56  ;;  %4785 = vmatpush3.bf16.msra.mxu1 %v4782_v34  ;;  %6599 = vst [vmem:[#allocation8_spill] sm:$0xff] %v5876_v6  ;;  %v5878_v7 = vsel %vm375_vm13, %v343_v61, %v407_v52  ;;  %510 = vst [vmem:[#allocation2 + $0x169] sm:$0xff] %v5876_v6  ;;  %v5933_v34 = vld [vmem:[#allocation2 + $0x52] sm:$0xff]  ;;  %v3535_v58 = vld [vmem:[%s6566_s3 + $0x368] sm:$0xff] }
  0x4f   : > { %6600 = vst [vmem:[#allocation9_spill] sm:$0xff] %v5878_v7  ;;  %4060 = vmatmul.mubr.f32.gmra.mrb[14].mxu1 %v5684_v59  ;;  %4787 = vmatprep.subr.bf16.mxu1 %v4786_v46  ;;  %511 = vst [vmem:[#allocation2 + $0x171] sm:$0xff] %v5878_v7  ;;  %v344_v59 = vadd.f32 %v5448_v33, %v305_v11  ;;  %v345_v23 = vadd.f32 %v5448_v33, %v306_v17  ;;  %v5963_v49 = vld [vmem:[#allocation2 + $0x92] sm:$0xff]  ;;  %v5977_v12 = vld [vmem:[#allocation2 + $0xaa] sm:$0xff] }
  0x50   : > { %4380 = vmatmul.mubr.f32.gmra.mrb[14].mxu0 %v5711_v10  ;;  %4062 = vmatprep.mubr.f32.mxu1 %v5692_v2  ;;  %v3526_v2 = vld [vmem:[%s6566_s3 + $0x320] sm:$0xff]  ;;  %v3536_v26 = vld [vmem:[%s6566_s3 + $0x370] sm:$0xff]  ;;  %v3537_v61 = vld [vmem:[%s6566_s3 + $0x378] sm:$0xff] }
  0x51   : > { %4917 = vmatpush3.bf16.msra.mxu0 %v4914_v56  ;;  %4438 = vmatprep.mubr.f32.mxu0 %v5874_v4  ;;  %vm376_vm14 = vcmp.gt.f32.partialorder %v344_v59, 0.0  ;;  %v408_v32 = vmul.f32 0.2, %v344_v59  ;;  %vm377_vm15 = vcmp.gt.f32.partialorder %v345_v23, 0.0  ;;  %v409_v33 = vmul.f32 0.2, %v345_v23 }
  0x52   : > { %4919 = vmatprep.subr.bf16.mxu0 %v4918_v39  ;;  %4789 = vmatpush3.bf16.msra.mxu1 %v4786_v46  ;;  %v4926_v31 = vpack.c.bf16 %v3527_v29, %v3526_v2  ;;  %v3534_v56 = vld [vmem:[%s6566_s3 + $0x360] sm:$0xff]  ;;  %v3539_v50 = vld [vmem:[%s6566_s3 + $0x388] sm:$0xff]  ;;  %v3460_v54 = vld [vmem:[%s6566_s3 + $0x110] sm:$0xff] }
  0x53   : > { %4063 = vmatmul.mubr.f32.gmra.mrb[16].mxu1 %v5711_v10  ;;  %4791 = vmatprep.subr.bf16.mxu1 %v5890_v21  ;;  %v5912_v0 = vsel %vm376_vm14, %v344_v59, %v408_v32  ;;  %v5915_v10 = vld [vmem:[#allocation2 + $0x3a] sm:$0xff]  ;;  %v5917_v57 = vsel %vm377_vm15, %v345_v23, %v409_v33  ;;  %v5991_v62 = vld [vmem:[#allocation2 + $0xc2] sm:$0xff]  ;;  %v6025_v44 = vld [vmem:[#allocation2 + $0xf2] sm:$0xff] }
  0x54   : > { %4439 = vmatmul.mubr.f32.vlgmr.msra.gmra.mrb[0].mxu0 %v5897_v22  ;;  %4065 = vmatprep.mubr.f32.mxu1 %v5733_v5  ;;  %6601 = vst [vmem:[#allocation10_spill] sm:$0xff] %v5912_v0  ;;  %6602 = vst [vmem:[#allocation11_spill] sm:$0xff] %v5917_v57  ;;  %v3528_v5 = vld [vmem:[%s6566_s3 + $0x330] sm:$0xff]  ;;  %v3538_v46 = vld [vmem:[%s6566_s3 + $0x380] sm:$0xff] }
  0x55   : > { %4921 = vmatpush3.bf16.msra.mxu0 %v4918_v39  ;;  %4441 = vmatprep.mubr.f32.mxu0 %v5900_v24  ;;  %512 = vst [vmem:[#allocation2 + $0x181] sm:$0xff] %v5912_v0  ;;  %513 = vst [vmem:[#allocation2 + $0x189] sm:$0xff] %v5917_v57  ;;  %v6005_v45 = vld [vmem:[#allocation2 + $0xda] sm:$0xff]  ;;  %v6021_v39 = vld [vmem:[#allocation2 + $0xe2] sm:$0xff] }
  0x56   : > { %4923 = vmatprep.subr.bf16.mxu0 %v4922_v28  ;;  %v3461_v3 = vld [vmem:[%s6566_s3 + $0x118] sm:$0xff]  ;;  %v6017_v52 = vld [vmem:[#allocation2] sm:$0xff]  ;;  %v3463_v59 = vld [vmem:[%s6566_s3 + $0x128] sm:$0xff] }
  0x57   : > { %4066 = vmatmul.mubr.f32.gmra.mrb[18].mxu1 %v5735_v30  ;;  %v4930_v30 = vpack.c.bf16 %v3529_v51, %v3528_v5  ;;  %v6023_v11 = vld [vmem:[#allocation2 + $0x18] sm:$0xff]  ;;  %v4794_v16 = vpack.c.bf16 %v3461_v3, %v3460_v54  ;;  %v3462_v17 = vld [vmem:[%s6566_s3 + $0x120] sm:$0xff]  ;;  %v6043_v32 = vld [vmem:[#allocation2 + $0x30] sm:$0xff] }
  0x58   : > { %4442 = vmatmul.mubr.f32.gmra.mrb[2].mxu0 %v5915_v10  ;;  %4068 = vmatprep.mubr.f32.mxu1 %v5743_v19  ;;  %v5947_v19 = vld [vmem:[#allocation2 + $0x6a] sm:$0xff]  ;;  %v6037_v23 = vld [vmem:[#allocation2 + $0x20] sm:$0xff]  ;;  %v4798_v29 = vpack.c.bf16 %v3463_v59, %v3462_v17  ;;  %v3465_v33 = vld [vmem:[%s6566_s3 + $0x138] sm:$0xff] }
  0x59   : > { %4444 = vmatprep.mubr.f32.mxu0 %v5920_v9  ;;  %4925 = vmatpush3.bf16.msra.mxu0 %v4922_v28  ;;  %v6041_v28 = vld [vmem:[#allocation2 + $0xfa] sm:$0xff]  ;;  %v6045_v2 = vld [vmem:[#allocation2 + $0x10a] sm:$0xff]  ;;  %v6059_v5 = vld [vmem:[#allocation2 + $0x112] sm:$0xff] }
  0x5a   : > { %4927 = vmatprep.subr.bf16.mxu0 %v4926_v31  ;;  %v6061_v51 = vld [vmem:[#allocation2 + $0x48] sm:$0xff]  ;;  %v3470_v3 = vld [vmem:[%s6566_s3 + $0x160] sm:$0xff]  ;;  %v6144_v57 = vld [vmem:[#allocation2 + $0xb0] sm:$0xff] }
  0x5b   : > { %4069 = vmatmul.mubr.f32.gmra.mrb[20].mxu1 %v5761_v53  ;;  %v4934_v53 = vpack.c.bf16 %v3531_v41, %v3530_v40  ;;  %v3466_v41 = vld [vmem:[%s6566_s3 + $0x140] sm:$0xff]  ;;  %6610 = vst [vmem:[#allocation19_spill] sm:$0xff] %v6144_v57  ;;  %v3541_v0 = vld [vmem:[%s6566_s3 + $0x398] sm:$0xff]  ;;  %v6202_v27 = vld [vmem:[#allocation2 + $0x110] sm:$0xff] }
  0x5c   : > { %4445 = vmatmul.mubr.f32.gmra.mrb[4].mxu0 %v5933_v34  ;;  %4071 = vmatprep.mubr.f32.mxu1 %v5778_v1  ;;  %v5961_v1 = vld [vmem:[#allocation2 + $0x82] sm:$0xff]  ;;  %v6113_v59 = vld [vmem:[#allocation2 + $0x15a] sm:$0xff] }
  0x5d   : > { %4447 = vmatprep.mubr.f32.mxu0 %v5935_v35  ;;  %4929 = vmatpush3.bf16.msra.mxu0 %v4926_v31  ;;  %v6056_v31 = vld [vmem:[#allocation2 + $0x38] sm:$0xff]  ;;  %v6110_v17 = vld [vmem:[#allocation2 + $0x80] sm:$0xff] }
  0x5e   : > { %4931 = vmatprep.subr.bf16.mxu0 %v4930_v30  ;;  %6606 = vst [vmem:[#allocation15_spill] sm:$0xff] %v6110_v17 }
  0x5f   : > { %4072 = vmatmul.mubr.f32.gmra.mrb[22].mxu1 %v5789_v37  ;;  %v4938_v37 = vpack.c.bf16 %v3533_v14, %v3532_v20  ;;  %v6074_v20 = vld [vmem:[#allocation2 + $0x50] sm:$0xff] }
  0x60   : > { %4448 = vmatmul.mubr.f32.gmra.mrb[6].mxu0 %v5947_v19  ;;  %4074 = vmatprep.mubr.f32.mxu1 %v5795_v15  ;;  %v5975_v15 = vld [vmem:[#allocation2 + $0x9a] sm:$0xff]  ;;  %v6077_v14 = vld [vmem:[#allocation2 + $0x12a] sm:$0xff] }
  0x61   : > { %4450 = vmatprep.mubr.f32.mxu0 %v5949_v47  ;;  %4933 = vmatpush3.bf16.msra.mxu0 %v4930_v30  ;;  %v6063_v30 = vld [vmem:[#allocation2 + $0x122] sm:$0xff] }
  0x62   : > { %4935 = vmatprep.subr.bf16.mxu0 %v4934_v53 }
  0x63   : > { %4075 = vmatmul.mubr.f32.gmra.mrb[24].mxu1 %v5809_v60  ;;  %v4942_v60 = vpack.c.bf16 %v3535_v58, %v3534_v56  ;;  %v6081_v56 = vld [vmem:[#allocation2 + $0x13a] sm:$0xff] }
  0x64   : > { %4451 = vmatmul.mubr.f32.gmra.mrb[8].mxu0 %v5961_v1  ;;  %4077 = vmatprep.mubr.f32.mxu1 %v5827_v36  ;;  %v5989_v36 = vld [vmem:[#allocation2 + $0xb2] sm:$0xff] }
  0x65   : > { %4453 = vmatprep.mubr.f32.mxu0 %v5963_v49  ;;  %4937 = vmatpush3.bf16.msra.mxu0 %v4934_v53  ;;  %v3467_v53 = vld [vmem:[%s6566_s3 + $0x148] sm:$0xff] }
  0x66   : > { %4939 = vmatprep.subr.bf16.mxu0 %v4938_v37  ;;  %v4806_v58 = vpack.c.bf16 %v3467_v53, %v3466_v41  ;;  %v3473_v41 = vld [vmem:[%s6566_s3 + $0x178] sm:$0xff] }
  0x67   : > { %4078 = vmatmul.mubr.f32.gmra.mrb[26].mxu1 %v5834_v43  ;;  %v4946_v43 = vpack.c.bf16 %v3537_v61, %v3536_v26  ;;  %v3469_v26 = vld [vmem:[%s6566_s3 + $0x158] sm:$0xff]  ;;  %v6092_v61 = vld [vmem:[#allocation2 + $0x68] sm:$0xff] }
  0x68   : > { %4454 = vmatmul.mubr.f32.gmra.mrb[10].mxu0 %v5975_v15  ;;  %4080 = vmatprep.mubr.f32.mxu1 %v5847_v38  ;;  %v6003_v38 = vld [vmem:[#allocation2 + $0xca] sm:$0xff]  ;;  %6604 = vst [vmem:[#allocation13_spill] sm:$0xff] %v6092_v61  ;;  %v6128_v53 = vld [vmem:[#allocation2 + $0x98] sm:$0xff] }
  0x69   : > { %4456 = vmatprep.mubr.f32.mxu0 %v5977_v12  ;;  %4941 = vmatpush3.bf16.msra.mxu0 %v4938_v37  ;;  %v6079_v37 = vld [vmem:[#allocation2 + $0x60] sm:$0xff]  ;;  %6608 = vst [vmem:[#allocation17_spill] sm:$0xff] %v6128_v53 }
  0x6a   : > { %4943 = vmatprep.subr.bf16.mxu0 %v4942_v60  ;;  %6603 = vst [vmem:[#allocation12_spill] sm:$0xff] %v6079_v37 }
  0x6b   : > { %4081 = vmatmul.mubr.f32.gmra.mrb[28].mxu1 %v5849_v55  ;;  %v6007_v55 = vpack.c.bf16 %v3539_v50, %v3538_v46  ;;  %v6097_v46 = vld [vmem:[#allocation2 + $0x78] sm:$0xff] }
  0x6c   : > { %4457 = vmatmul.mubr.f32.gmra.mrb[12].mxu0 %v5989_v36  ;;  %4083 = vmatprep.mubr.f32.mxu1 %v5876_v6  ;;  %6605 = vst [vmem:[#allocation14_spill] sm:$0xff] %v6097_v46  ;;  %v6099_v50 = vld [vmem:[#allocation2 + $0x152] sm:$0xff]  ;;  %v3546_v6 = vld [vmem:[%s6566_s3 + $0x3c0] sm:$0xff] }
  0x6d   : > { %4459 = vmatprep.mubr.f32.mxu0 %v5991_v62  ;;  %4945 = vmatpush3.bf16.msra.mxu0 %v4942_v60  ;;  %v3468_v60 = vld [vmem:[%s6566_s3 + $0x150] sm:$0xff] }
  0x6e   : > { %4947 = vmatprep.subr.bf16.mxu0 %v4946_v43  ;;  %v4810_v54 = vpack.c.bf16 %v3469_v26, %v3468_v60  ;;  %v6133_v60 = vld [vmem:[#allocation2 + $0xa8] sm:$0xff] }
  0x6f   : > { %4084 = vmatmul.mubr.f32.gmra.mrb[30].mxu1 %v5878_v7  ;;  %6609 = vst [vmem:[#allocation18_spill] sm:$0xff] %v6133_v60  ;;  %v2009_v26 = vld [vmem:[#allocation2 + $0x182] sm:$0xff] }
  0x70   : > { %4460 = vmatmul.mubr.f32.gmra.mrb[14].mxu0 %v6003_v38  ;;  %4118 = vmatprep.mubr.f32.mxu1 %v6017_v52  ;;  %v6173_v7 = vld [vmem:[#allocation2 + $0xe0] sm:$0xff] }
  0x71   : > { %4462 = vmatprep.mubr.f32.mxu0 %v6005_v45  ;;  %4949 = vmatpush3.bf16.msra.mxu0 %v4946_v43  ;;  %v6095_v43 = vld [vmem:[#allocation2 + $0x142] sm:$0xff] }
  0x72   : > { %4951 = vmatprep.subr.bf16.mxu0 %v6007_v55 }
  0x73   : > { %4119 = vmatmul.mubr.f32.vlgmr.msra.gmra.mrb[0].mxu1 %v6017_v52 }
  0x74   : > { %4463 = vmatmul.mubr.f32.gmra.mrb[16].mxu0 %v6021_v39  ;;  %4793 = vmatpush3.bf16.msra.mxu1 %v5890_v21  ;;  %v3464_v21 = vld [vmem:[%s6566_s3 + $0x130] sm:$0xff] }
  0x75   : > { %4121 = vmatprep.mubr.f32.mxu1 %v6023_v11  ;;  %4465 = vmatprep.mubr.f32.mxu0 %v6025_v44  ;;  %v4802_v40 = vpack.c.bf16 %v3465_v33, %v3464_v21  ;;  %v6117_v21 = vld [vmem:[#allocation2 + $0x16a] sm:$0xff] }
  0x76   : > { %4795 = vmatprep.subr.bf16.mxu1 %v4794_v16 }
  0x77   : > { %4122 = vmatmul.mubr.f32.gmra.mrb[2].mxu1 %v6037_v23 }
  0x78   : > { %4466 = vmatmul.mubr.f32.gmra.mrb[18].mxu0 %v6041_v28  ;;  %4124 = vmatprep.mubr.f32.mxu1 %v6043_v32 }
  0x79   : > { %4468 = vmatprep.mubr.f32.mxu0 %v6045_v2  ;;  %4797 = vmatpush3.bf16.msra.mxu1 %v4794_v16  ;;  %v3471_v16 = vld [vmem:[%s6566_s3 + $0x168] sm:$0xff] }
  0x7a   : > { %4799 = vmatprep.subr.bf16.mxu1 %v4798_v29  ;;  %v4814_v33 = vpack.c.bf16 %v3471_v16, %v3470_v3  ;;  %v3474_v16 = vld [vmem:[%s6566_s3 + $0x180] sm:$0xff] }
  0x7b   : > { %4125 = vmatmul.mubr.f32.gmra.mrb[4].mxu1 %v6056_v31 }
  0x7c   : > { %4469 = vmatmul.mubr.f32.gmra.mrb[20].mxu0 %v6059_v5  ;;  %4127 = vmatprep.mubr.f32.mxu1 %v6061_v51 }
  0x7d   : > { %4471 = vmatprep.mubr.f32.mxu0 %v6063_v30  ;;  %4801 = vmatpush3.bf16.msra.mxu1 %v4798_v29  ;;  %v6115_v29 = vld [vmem:[#allocation2 + $0x90] sm:$0xff] }
  0x7e   : > { %4803 = vmatprep.subr.bf16.mxu1 %v4802_v40  ;;  %6607 = vst [vmem:[#allocation16_spill] sm:$0xff] %v6115_v29 }
  0x7f   : > { %4128 = vmatmul.mubr.f32.gmra.mrb[6].mxu1 %v6074_v20 }
  0x80   : > { %4472 = vmatmul.mubr.f32.gmra.mrb[22].mxu0 %v6077_v14  ;;  %4130 = vmatprep.mubr.f32.mxu1 %v6079_v37 }
  0x81   : > { %4474 = vmatprep.mubr.f32.mxu0 %v6081_v56  ;;  %4805 = vmatpush3.bf16.msra.mxu1 %v4802_v40  ;;  %v3472_v40 = vld [vmem:[%s6566_s3 + $0x170] sm:$0xff] }
  0x82   : > { %4807 = vmatprep.subr.bf16.mxu1 %v4806_v58  ;;  %v4818_v3 = vpack.c.bf16 %v3473_v41, %v3472_v40  ;;  %v6148_v40 = vpack.c.bf16 %v3475_v25, %v3474_v16  ;;  %v3540_v41 = vld [vmem:[%s6566_s3 + $0x390] sm:$0xff]  ;;  %v3542_v16 = vld [vmem:[%s6566_s3 + $0x3a0] sm:$0xff] }
  0x83   : > { %4131 = vmatmul.mubr.f32.gmra.mrb[8].mxu1 %v6092_v61  ;;  %v4954_v25 = vpack.c.bf16 %v3541_v0, %v3540_v41  ;;  %v6177_v0 = vld [vmem:[#allocation2 + $0xf0] sm:$0xff] }
  0x84   : > { %4475 = vmatmul.mubr.f32.gmra.mrb[24].mxu0 %v6095_v43  ;;  %4133 = vmatprep.mubr.f32.mxu1 %v6097_v46  ;;  %v3544_v41 = vld [vmem:[%s6566_s3 + $0x3b0] sm:$0xff] }
  0x85   : > { %4477 = vmatprep.mubr.f32.mxu0 %v6099_v50  ;;  %4809 = vmatpush3.bf16.msra.mxu1 %v4806_v58  ;;  %v6131_v58 = vld [vmem:[#allocation2 + $0x172] sm:$0xff] }
  0x86   : > { %4811 = vmatprep.subr.bf16.mxu1 %v4810_v54 }
  0x87   : > { %4134 = vmatmul.mubr.f32.gmra.mrb[10].mxu1 %v6110_v17 }
  0x88   : > { %4478 = vmatmul.mubr.f32.gmra.mrb[26].mxu0 %v6113_v59  ;;  %4136 = vmatprep.mubr.f32.mxu1 %v6115_v29 }
  0x89   : > { %4480 = vmatprep.mubr.f32.mxu0 %v6117_v21  ;;  %4813 = vmatpush3.bf16.msra.mxu1 %v4810_v54  ;;  %v2010_v54 = vld [vmem:[#allocation2 + $0x18a] sm:$0xff] }
  0x8a   : > { %4815 = vmatprep.subr.bf16.mxu1 %v4814_v33 }
  0x8b   : > { %4137 = vmatmul.mubr.f32.gmra.mrb[12].mxu1 %v6128_v53 }
  0x8c   : > { %4481 = vmatmul.mubr.f32.gmra.mrb[28].mxu0 %v6131_v58  ;;  %4139 = vmatprep.mubr.f32.mxu1 %v6133_v60 }
  0x8d   : > { %4483 = vmatprep.mubr.f32.mxu0 %v2009_v26  ;;  %4817 = vmatpush3.bf16.msra.mxu1 %v4814_v33  ;;  %v6158_v26 = vld [vmem:[#allocation2 + $0xc8] sm:$0xff]  ;;  %v6161_v33 = vld [vmem:[#allocation2 + $0xd8] sm:$0xff] }
  0x8e   : > { %4819 = vmatprep.subr.bf16.mxu1 %v4818_v3  ;;  %6612 = vst [vmem:[#allocation21_spill] sm:$0xff] %v6158_v26 }
  0x8f   : > { %4140 = vmatmul.mubr.f32.gmra.mrb[14].mxu1 %v6144_v57 }
  0x90   : > { %4484 = vmatmul.mubr.f32.gmra.mrb[30].mxu0 %v2010_v54  ;;  %4142 = vmatprep.mubr.f32.mxu1 %v6146_v63  ;;  %v3543_v54 = vld [vmem:[%s6566_s3 + $0x3a8] sm:$0xff] }
  0x91   : > { %4518 = vmatprep.mubr.f32.mxu0 %v6043_v32  ;;  %4821 = vmatpush3.bf16.msra.mxu1 %v4818_v3  ;;  %v4958_v3 = vpack.c.bf16 %v3543_v54, %v3542_v16  ;;  %v6191_v16 = vld [vmem:[#allocation2 + $0x108] sm:$0xff]  ;;  %v4962_v54 = vpack.c.bf16 %v3545_v48, %v3544_v41  ;;  %v4966_v48 = vpack.c.bf16 %v3547_v42, %v3546_v6  ;;  %v3548_v41 = vld [vmem:[%s6566_s3 + $0x3d0] sm:$0xff]  ;;  %v3550_v6 = vld [vmem:[%s6566_s3 + $0x3e0] sm:$0xff] }
  0x92   : > { %4823 = vmatprep.subr.bf16.mxu1 %v6148_v40 }
  0x93   : > { %4143 = vmatmul.mubr.f32.gmra.mrb[16].mxu1 %v6158_v26 }
  0x94   : > { %4519 = vmatmul.mubr.f32.vlgmr.msra.gmra.mrb[0].mxu0 %v6056_v31  ;;  %4145 = vmatprep.mubr.f32.mxu1 %v6161_v33 }
  0x95   : > { %4953 = vmatpush3.bf16.msra.mxu0 %v6007_v55  ;;  %4521 = vmatprep.mubr.f32.mxu0 %v6061_v51  ;;  %v6188_v55 = vld [vmem:[#allocation2 + $0xf8] sm:$0xff] }
  0x96   : > { %4955 = vmatprep.subr.bf16.mxu0 %v4954_v25 }
  0x97   : > { %4146 = vmatmul.mubr.f32.gmra.mrb[18].mxu1 %v6173_v7 }
  0x98   : > { %4522 = vmatmul.mubr.f32.gmra.mrb[2].mxu0 %v6074_v20  ;;  %4148 = vmatprep.mubr.f32.mxu1 %v6177_v0 }
  0x99   : > { %4524 = vmatprep.mubr.f32.mxu0 %v6079_v37  ;;  %4957 = vmatpush3.bf16.msra.mxu0 %v4954_v25  ;;  %v6205_v25 = vld [vmem:[#allocation2 + $0x120] sm:$0xff]  ;;  %v1062_v37 = vld [vmem:[#allocation2 + $0xa] sm:$0xff] }
  0x9a   : > { %4959 = vmatprep.subr.bf16.mxu0 %v4958_v3 }
  0x9b   : > { %4149 = vmatmul.mubr.f32.gmra.mrb[20].mxu1 %v6188_v55 }
  0x9c   : > { %4525 = vmatmul.mubr.f32.gmra.mrb[4].mxu0 %v6092_v61  ;;  %4151 = vmatprep.mubr.f32.mxu1 %v6191_v16  ;;  %v3549_v61 = vld [vmem:[%s6566_s3 + $0x3d8] sm:$0xff] }
  0x9d   : > { %4527 = vmatprep.mubr.f32.mxu0 %v6097_v46  ;;  %4961 = vmatpush3.bf16.msra.mxu0 %v4958_v3  ;;  %v6216_v46 = vld [vmem:[#allocation2 + $0x128] sm:$0xff]  ;;  %v6219_v3 = vld [vmem:[#allocation2 + $0x138] sm:$0xff]  ;;  %v4970_v42 = vpack.c.bf16 %v3549_v61, %v3548_v41  ;;  %v3552_v41 = vld [vmem:[%s6566_s3 + $0x3f0] sm:$0xff] }
  0x9e   : > { %4963 = vmatprep.subr.bf16.mxu0 %v4962_v54 }
  0x9f   : > { %4152 = vmatmul.mubr.f32.gmra.mrb[22].mxu1 %v6202_v27 }
  0xa0   : > { %4528 = vmatmul.mubr.f32.gmra.mrb[6].mxu0 %v6110_v17  ;;  %4154 = vmatprep.mubr.f32.mxu1 %v6205_v25  ;;  %v3551_v17 = vld [vmem:[%s6566_s3 + $0x3e8] sm:$0xff] }
  0xa1   : > { %4530 = vmatprep.mubr.f32.mxu0 %v6115_v29  ;;  %4965 = vmatpush3.bf16.msra.mxu0 %v4962_v54  ;;  %v6230_v29 = vld [vmem:[#allocation2 + $0x140] sm:$0xff]  ;;  %v6233_v54 = vld [vmem:[#allocation2 + $0x150] sm:$0xff]  ;;  %v4974_v61 = vpack.c.bf16 %v3551_v17, %v3550_v6 }
  0xa2   : > { %4967 = vmatprep.subr.bf16.mxu0 %v4966_v48  ;;  %v3554_v6 = vld [vmem:[%s6566_s3 + $0x400] sm:$0xff] }
  0xa3   : > { %4155 = vmatmul.mubr.f32.gmra.mrb[24].mxu1 %v6216_v46 }
  0xa4   : > { %4531 = vmatmul.mubr.f32.gmra.mrb[8].mxu0 %v6128_v53  ;;  %4157 = vmatprep.mubr.f32.mxu1 %v6219_v3  ;;  %v3553_v53 = vld [vmem:[%s6566_s3 + $0x3f8] sm:$0xff] }
  0xa5   : > { %4533 = vmatprep.mubr.f32.mxu0 %v6133_v60  ;;  %4969 = vmatpush3.bf16.msra.mxu0 %v4966_v48  ;;  %v6244_v60 = vld [vmem:[#allocation2 + $0x158] sm:$0xff]  ;;  %v6247_v48 = vld [vmem:[#allocation2 + $0x168] sm:$0xff]  ;;  %v4978_v17 = vpack.c.bf16 %v3553_v53, %v3552_v41  ;;  %v3476_v41 = vld [vmem:[%s6566_s3 + $0x190] sm:$0xff] }
  0xa6   : > { %4971 = vmatprep.subr.bf16.mxu0 %v4970_v42 }
  0xa7   : > { %4158 = vmatmul.mubr.f32.gmra.mrb[26].mxu1 %v6230_v29 }
  0xa8   : > { %4534 = vmatmul.mubr.f32.gmra.mrb[10].mxu0 %v6144_v57  ;;  %4160 = vmatprep.mubr.f32.mxu1 %v6233_v54  ;;  %v3555_v57 = vld [vmem:[%s6566_s3 + $0x408] sm:$0xff] }
  0xa9   : > { %4536 = vmatprep.mubr.f32.mxu0 %v6146_v63  ;;  %4973 = vmatpush3.bf16.msra.mxu0 %v4970_v42  ;;  %v6258_v63 = vld [vmem:[#allocation2 + $0x170] sm:$0xff]  ;;  %v1061_v42 = vld [vmem:[#allocation2 + $0x2] sm:$0xff]  ;;  %v6261_v53 = vpack.c.bf16 %v3555_v57, %v3554_v6 }
  0xaa   : > { %4975 = vmatprep.subr.bf16.mxu0 %v4974_v61  ;;  %v3478_v57 = vld [vmem:[%s6566_s3 + $0x1a0] sm:$0xff]  ;;  %v3479_v6 = vld [vmem:[%s6566_s3 + $0x1a8] sm:$0xff] }
  0xab   : > { %4161 = vmatmul.mubr.f32.gmra.mrb[28].mxu1 %v6244_v60 }
  0xac   : > { %4537 = vmatmul.mubr.f32.gmra.mrb[12].mxu0 %v6158_v26  ;;  %4163 = vmatprep.mubr.f32.mxu1 %v6247_v48  ;;  %v3477_v26 = vld [vmem:[%s6566_s3 + $0x198] sm:$0xff] }
  0xad   : > { %4539 = vmatprep.mubr.f32.mxu0 %v6161_v33  ;;  %4977 = vmatpush3.bf16.msra.mxu0 %v4974_v61  ;;  %v4826_v61 = vpack.c.bf16 %v3477_v26, %v3476_v41  ;;  %v4830_v26 = vpack.c.bf16 %v3479_v6, %v3478_v57  ;;  %v3487_v41 = vld [vmem:[%s6566_s3 + $0x1e8] sm:$0xff]  ;;  %v3489_v57 = vld [vmem:[%s6566_s3 + $0x1f8] sm:$0xff] }
  0xae   : > { %4979 = vmatprep.subr.bf16.mxu0 %v4978_v17 }
  0xaf   : > { %4164 = vmatmul.mubr.f32.gmra.mrb[30].mxu1 %v6258_v63 }
  0xb0   : > { %4540 = vmatmul.mubr.f32.gmra.mrb[14].mxu0 %v6173_v7  ;;  %4198 = vmatprep.mubr.f32.mxu1 %v1061_v42  ;;  %v3485_v42 = vld [vmem:[%s6566_s3 + $0x1d8] sm:$0xff] }
  0xb1   : > { %4542 = vmatprep.mubr.f32.mxu0 %v6177_v0  ;;  %4981 = vmatpush3.bf16.msra.mxu0 %v4978_v17  ;;  %v3481_v17 = vld [vmem:[%s6566_s3 + $0x1b8] sm:$0xff] }
  0xb2   : > { %4983 = vmatprep.subr.bf16.mxu0 %v6261_v53 }
  0xb3   : > { %4199 = vmatmul.mubr.f32.vlgmr.msra.gmra.mrb[0].mxu1 %v1062_v37  ;;  %v3480_v37 = vld [vmem:[%s6566_s3 + $0x1b0] sm:$0xff] }
  0xb4   : > { %4543 = vmatmul.mubr.f32.gmra.mrb[16].mxu0 %v6188_v55  ;;  %4825 = vmatpush3.bf16.msra.mxu1 %v6148_v40  ;;  %v3483_v40 = vld [vmem:[%s6566_s3 + $0x1c8] sm:$0xff] }
  0xb5   : > { %4201 = vmatprep.mubr.f32.mxu1 %v5874_v4  ;;  %4545 = vmatprep.mubr.f32.mxu0 %v6191_v16  ;;  %v4834_v4 = vpack.c.bf16 %v3481_v17, %v3480_v37  ;;  %v3559_v17 = vld [vmem:[%s6566_s3 + $0x428] sm:$0xff] }
  0xb6   : > { %4827 = vmatprep.subr.bf16.mxu1 %v4826_v61 }
  0xb7   : > { %4202 = vmatmul.mubr.f32.gmra.mrb[2].mxu1 %v5897_v22  ;;  %v3482_v22 = vld [vmem:[%s6566_s3 + $0x1c0] sm:$0xff] }
  0xb8   : > { %4546 = vmatmul.mubr.f32.gmra.mrb[18].mxu0 %v6202_v27  ;;  %4204 = vmatprep.mubr.f32.mxu1 %v5900_v24  ;;  %v4838_v24 = vpack.c.bf16 %v3483_v40, %v3482_v22  ;;  %v3561_v22 = vld [vmem:[%s6566_s3 + $0x438] sm:$0xff] }
  0xb9   : > { %4548 = vmatprep.mubr.f32.mxu0 %v6205_v25  ;;  %4829 = vmatpush3.bf16.msra.mxu1 %v4826_v61 }
  0xba   : > { %4831 = vmatprep.subr.bf16.mxu1 %v4830_v26 }
  0xbb   : > { %4205 = vmatmul.mubr.f32.gmra.mrb[4].mxu1 %v5915_v10  ;;  %v3484_v10 = vld [vmem:[%s6566_s3 + $0x1d0] sm:$0xff] }
  0xbc   : > { %4549 = vmatmul.mubr.f32.gmra.mrb[20].mxu0 %v6216_v46  ;;  %4207 = vmatprep.mubr.f32.mxu1 %v5920_v9  ;;  %v4842_v9 = vpack.c.bf16 %v3485_v42, %v3484_v10  ;;  %v2600_v10 = vld [vmem:[#allocation2 + $0x91] sm:$0xff] }
  0xbd   : > { %4551 = vmatprep.mubr.f32.mxu0 %v6219_v3  ;;  %4833 = vmatpush3.bf16.msra.mxu1 %v4830_v26  ;;  %v3557_v26 = vld [vmem:[%s6566_s3 + $0x418] sm:$0xff] }
  0xbe   : > { %4835 = vmatprep.subr.bf16.mxu1 %v4834_v4 }
  0xbf   : > { %4208 = vmatmul.mubr.f32.gmra.mrb[6].mxu1 %v5933_v34  ;;  %v3486_v34 = vld [vmem:[%s6566_s3 + $0x1e0] sm:$0xff] }
  0xc0   : > { %4552 = vmatmul.mubr.f32.gmra.mrb[22].mxu0 %v6230_v29  ;;  %4210 = vmatprep.mubr.f32.mxu1 %v5935_v35  ;;  %v6323_v35 = vld [vmem:[#allocation2 + $0x180] sm:$0xff]  ;;  %v4846_v61 = vpack.c.bf16 %v3487_v41, %v3486_v34  ;;  %v2602_v34 = vld [vmem:[#allocation2 + $0xa9] sm:$0xff] }
  0xc1   : > { %4554 = vmatprep.mubr.f32.mxu0 %v6233_v54  ;;  %4837 = vmatpush3.bf16.msra.mxu1 %v4834_v4 }
  0xc2   : > { %4839 = vmatprep.subr.bf16.mxu1 %v4838_v24 }
  0xc3   : > { %4211 = vmatmul.mubr.f32.gmra.mrb[8].mxu1 %v5947_v19  ;;  %v3488_v19 = vld [vmem:[%s6566_s3 + $0x1f0] sm:$0xff] }
  0xc4   : > { %4555 = vmatmul.mubr.f32.gmra.mrb[24].mxu0 %v6244_v60  ;;  %4213 = vmatprep.mubr.f32.mxu1 %v5949_v47  ;;  %v6335_v47 = vld [vmem:[#allocation2 + $0x188] sm:$0xff]  ;;  %v4850_v6 = vpack.c.bf16 %v3489_v57, %v3488_v19 }
  0xc5   : > { %4557 = vmatprep.mubr.f32.mxu0 %v6247_v48  ;;  %4841 = vmatpush3.bf16.msra.mxu1 %v4838_v24  ;;  %v3563_v24 = vld [vmem:[%s6566_s3 + $0x448] sm:$0xff] }
  0xc6   : > { %4843 = vmatprep.subr.bf16.mxu1 %v4842_v9  ;;  %v2604_v19 = vld [vmem:[#allocation2 + $0xc1] sm:$0xff] }
  0xc7   : > { %4214 = vmatmul.mubr.f32.gmra.mrb[10].mxu1 %v5961_v1  ;;  %v2592_v1 = vld [vmem:[#allocation2 + $0x31] sm:$0xff] }
  0xc8   : > { %4558 = vmatmul.mubr.f32.gmra.mrb[26].mxu0 %v6258_v63  ;;  %4216 = vmatprep.mubr.f32.mxu1 %v5963_v49  ;;  %v3556_v49 = vld [vmem:[%s6566_s3 + $0x410] sm:$0xff] }
  0xc9   : > { %4560 = vmatprep.mubr.f32.mxu0 %v6323_v35  ;;  %4845 = vmatpush3.bf16.msra.mxu1 %v4842_v9  ;;  %v4986_v37 = vpack.c.bf16 %v3557_v26, %v3556_v49  ;;  %v3565_v9 = vld [vmem:[%s6566_s3 + $0x458] sm:$0xff] }
  0xca   : > { %4847 = vmatprep.subr.bf16.mxu1 %v4846_v61  ;;  %v6407_v26 = vld [vmem:[#allocation2 + $0xf1] sm:$0xff] }
  0xcb   : > { %4217 = vmatmul.mubr.f32.gmra.mrb[12].mxu1 %v5975_v15  ;;  %v2593_v15 = vld [vmem:[#allocation2 + $0x39] sm:$0xff] }
  0xcc   : > { %4561 = vmatmul.mubr.f32.gmra.mrb[28].mxu0 %v6335_v47  ;;  %4219 = vmatprep.mubr.f32.mxu1 %v5977_v12  ;;  %v2594_v12 = vld [vmem:[#allocation2 + $0x49] sm:$0xff] }
  0xcd   : > { %4563 = vmatprep.mubr.f32.mxu0 %v6017_v52  ;;  %4849 = vmatpush3.bf16.msra.mxu1 %v4846_v61  ;;  %v3567_v61 = vld [vmem:[%s6566_s3 + $0x468] sm:$0xff] }
  0xce   : > { %4851 = vmatprep.subr.bf16.mxu1 %v4850_v6 }
  0xcf   : > { %4220 = vmatmul.mubr.f32.gmra.mrb[14].mxu1 %v5989_v36  ;;  %v3558_v36 = vld [vmem:[%s6566_s3 + $0x420] sm:$0xff] }
  0xd0   : > { %4564 = vmatmul.mubr.f32.gmra.mrb[30].mxu0 %v6017_v52  ;;  %4222 = vmatprep.mubr.f32.mxu1 %v5991_v62  ;;  %v2595_v62 = vld [vmem:[#allocation2 + $0x51] sm:$0xff]  ;;  %v2596_v52 = vld [vmem:[#allocation2 + $0x61] sm:$0xff]  ;;  %v4990_v4 = vpack.c.bf16 %v3559_v17, %v3558_v36 }
  0xd1   : > { %4598 = vmatprep.mubr.f32.mxu0 %v2592_v1  ;;  %4853 = vmatpush3.bf16.msra.mxu1 %v4850_v6  ;;  %v3569_v6 = vld [vmem:[%s6566_s3 + $0x478] sm:$0xff]  ;;  %v6621_v17 = vld [vmem:[#allocation5_spill] sm:$0xff] }
  0xd2   : > { %5014 = vmatprep.subr.bf16.mxu1 %v5367_v8  ;;  %v6400_v1 = vld [vmem:[#allocation2 + $0xd9] sm:$0xff] }
  0xd3   : > { %4223 = vmatmul.mubr.f32.gmra.mrb[16].mxu1 %v6003_v38  ;;  %v3560_v38 = vld [vmem:[%s6566_s3 + $0x430] sm:$0xff]  ;;  %v6620_v36 = vld [vmem:[#allocation8_spill] sm:$0xff] }
  0xd4   : > { %4599 = vmatmul.mubr.f32.vlgmr.msra.gmra.mrb[0].mxu0 %v2593_v15  ;;  %4225 = vmatprep.mubr.f32.mxu1 %v6005_v45  ;;  %v2597_v45 = vld [vmem:[#allocation2 + $0x69] sm:$0xff]  ;;  %v4994_v40 = vpack.c.bf16 %v3561_v22, %v3560_v38  ;;  %v2622_v22 = vld [vmem:[#allocation2 + $0x199] sm:$0xff] }
  0xd5   : > { %4985 = vmatpush3.bf16.msra.mxu0 %v6261_v53  ;;  %4601 = vmatprep.mubr.f32.mxu0 %v2594_v12  ;;  %v2598_v53 = vld [vmem:[#allocation2 + $0x79] sm:$0xff]  ;;  %v6616_v15 = vld [vmem:[#allocation14_spill] sm:$0xff] }
  0xd6   : > { %4987 = vmatprep.subr.bf16.mxu0 %v4986_v37  ;;  %v6617_v12 = vld [vmem:[#allocation4_spill] sm:$0xff]  ;;  %v6625_v38 = vld [vmem:[#allocation10_spill] sm:$0xff] }
  0xd7   : > { %4226 = vmatmul.mubr.f32.gmra.mrb[18].mxu1 %v6021_v39  ;;  %v3562_v39 = vld [vmem:[%s6566_s3 + $0x440] sm:$0xff] }
  0xd8   : > { %4602 = vmatmul.mubr.f32.gmra.mrb[2].mxu0 %v2595_v62  ;;  %4228 = vmatprep.mubr.f32.mxu1 %v6025_v44  ;;  %v2599_v44 = vld [vmem:[#allocation2 + $0x81] sm:$0xff]  ;;  %v4998_v42 = vpack.c.bf16 %v3563_v24, %v3562_v39  ;;  %v6629_v39 = vld [vmem:[#allocation20_spill] sm:$0xff] }
  0xd9   : > { %4604 = vmatprep.mubr.f32.mxu0 %v2596_v52  ;;  %4989 = vmatpush3.bf16.msra.mxu0 %v4986_v37  ;;  %v6618_v37 = vld [vmem:[#allocation15_spill] sm:$0xff]  ;;  %v6622_v62 = vld [vmem:[#allocation17_spill] sm:$0xff] }
  0xda   : > { %4991 = vmatprep.subr.bf16.mxu0 %v4990_v4  ;;  %v6623_v52 = vld [vmem:[#allocation9_spill] sm:$0xff] }
  0xdb   : > { %4229 = vmatmul.mubr.f32.gmra.mrb[20].mxu1 %v6041_v28  ;;  %v3564_v28 = vld [vmem:[%s6566_s3 + $0x450] sm:$0xff]  ;;  %v2623_v24 = vld [vmem:[#allocation2 + $0x1a1] sm:$0xff] }
  0xdc   : > { %4605 = vmatmul.mubr.f32.gmra.mrb[4].mxu0 %v2597_v45  ;;  %4231 = vmatprep.mubr.f32.mxu1 %v6045_v2  ;;  %v2601_v2 = vld [vmem:[#allocation2 + $0x99] sm:$0xff]  ;;  %v5002_v41 = vpack.c.bf16 %v3565_v9, %v3564_v28  ;;  %v6626_v45 = vld [vmem:[#allocation6_spill] sm:$0xff] }
  0xdd   : > { %4607 = vmatprep.mubr.f32.mxu0 %v2598_v53  ;;  %4993 = vmatpush3.bf16.msra.mxu0 %v4990_v4  ;;  %v6624_v4 = vld [vmem:[#allocation18_spill] sm:$0xff]  ;;  %v6627_v53 = vld [vmem:[#allocation19_spill] sm:$0xff]  ;;  %v2899_v28 = vld [vmem:[#allocation2 + $0x3a] sm:$0xff] }
  0xde   : > { %4995 = vmatprep.subr.bf16.mxu0 %v4994_v40  ;;  %v2900_v9 = vld [vmem:[#allocation2 + $0x4a] sm:$0xff] }
  0xdf   : > { %4232 = vmatmul.mubr.f32.gmra.mrb[22].mxu1 %v6059_v5  ;;  %v3566_v5 = vld [vmem:[%s6566_s3 + $0x460] sm:$0xff] }
  0xe0   : > { %4608 = vmatmul.mubr.f32.gmra.mrb[6].mxu0 %v2599_v44  ;;  %4234 = vmatprep.mubr.f32.mxu1 %v6063_v30  ;;  %v2603_v30 = vld [vmem:[#allocation2 + $0xb1] sm:$0xff]  ;;  %v5006_v57 = vpack.c.bf16 %v3567_v61, %v3566_v5  ;;  %v2921_v61 = vld [vmem:[#allocation2 + $0x142] sm:$0xff] }
  0xe1   : > { %4610 = vmatprep.mubr.f32.mxu0 %v2600_v10  ;;  %4997 = vmatpush3.bf16.msra.mxu0 %v4994_v40  ;;  %v6628_v40 = vld [vmem:[#allocation11_spill] sm:$0xff] }
  0xe2   : > { %4999 = vmatprep.subr.bf16.mxu0 %v4998_v42  ;;  %v2898_v44 = vld [vmem:[#allocation2 + $0x32] sm:$0xff] }
  0xe3   : > { %4235 = vmatmul.mubr.f32.gmra.mrb[24].mxu1 %v6077_v14  ;;  %v3568_v14 = vld [vmem:[%s6566_s3 + $0x470] sm:$0xff] }
  0xe4   : > { %4611 = vmatmul.mubr.f32.gmra.mrb[8].mxu0 %v2601_v2  ;;  %4237 = vmatprep.mubr.f32.mxu1 %v6081_v56  ;;  %v2605_v56 = vld [vmem:[#allocation2 + $0xc9] sm:$0xff]  ;;  %v5010_v49 = vpack.c.bf16 %v3569_v6, %v3568_v14  ;;  %v2901_v2 = vld [vmem:[#allocation2 + $0x52] sm:$0xff] }
  0xe5   : > { %4613 = vmatprep.mubr.f32.mxu0 %v2602_v34  ;;  %5001 = vmatpush3.bf16.msra.mxu0 %v4998_v42  ;;  %v6630_v10 = vld [vmem:[#allocation7_spill] sm:$0xff]  ;;  %v6631_v42 = vld [vmem:[#allocation21_spill] sm:$0xff] }
  0xe6   : > { %5003 = vmatprep.subr.bf16.mxu0 %v5002_v41  ;;  %v2902_v34 = vld [vmem:[#allocation2 + $0x62] sm:$0xff]  ;;  %v2906_v5 = vld [vmem:[#allocation2 + $0x92] sm:$0xff] }
  0xe7   : > { %4238 = vmatmul.mubr.f32.gmra.mrb[26].mxu1 %v6095_v43  ;;  %v6405_v43 = vld [vmem:[#allocation2 + $0xe1] sm:$0xff]  ;;  %v2925_v14 = vld [vmem:[#allocation2 + $0x172] sm:$0xff]  ;;  %v1701_v6 = vld [vmem:[#allocation2 + $0x169] sm:$0xff] }
  0xe8   : > { %4614 = vmatmul.mubr.f32.gmra.mrb[10].mxu0 %v2603_v30  ;;  %4240 = vmatprep.mubr.f32.mxu1 %v6099_v50  ;;  %v6413_v50 = vld [vmem:[#allocation2 + $0xf9] sm:$0xff] }
  0xe9   : > { %4616 = vmatprep.mubr.f32.mxu0 %v2604_v19  ;;  %5005 = vmatpush3.bf16.msra.mxu0 %v5002_v41  ;;  %v2904_v41 = vld [vmem:[#allocation2 + $0x7a] sm:$0xff]  ;;  %v2922_v30 = vld [vmem:[#allocation2 + $0x152] sm:$0xff] }
  0xea   : > { %5007 = vmatprep.subr.bf16.mxu0 %v5006_v57  ;;  %v2923_v19 = vld [vmem:[#allocation2 + $0x15a] sm:$0xff] }
  0xeb   : > { %4241 = vmatmul.mubr.f32.gmra.mrb[28].mxu1 %v6113_v59  ;;  %v6415_v59 = vld [vmem:[#allocation2 + $0x109] sm:$0xff] }
  0xec   : > { %4617 = vmatmul.mubr.f32.gmra.mrb[12].mxu0 %v2605_v56  ;;  %4243 = vmatprep.mubr.f32.mxu1 %v6117_v21  ;;  %v6422_v21 = vld [vmem:[#allocation2 + $0x111] sm:$0xff]  ;;  %v2926_v56 = vld [vmem:[#allocation2 + $0x182] sm:$0xff] }
  0xed   : > { %4619 = vmatprep.mubr.f32.mxu0 %v6400_v1  ;;  %5009 = vmatpush3.bf16.msra.mxu0 %v5006_v57  ;;  %v2924_v57 = vld [vmem:[#allocation2 + $0x16a] sm:$0xff] }
  0xee   : > { %5011 = vmatprep.subr.bf16.mxu0 %v5010_v49 }
  0xef   : > { %4244 = vmatmul.mubr.f32.gmra.mrb[30].mxu1 %v6131_v58  ;;  %v6614_v58 = vld [vmem:[#allocation3_spill] sm:$0xff] }
  0xf0   : > { %4620 = vmatmul.mubr.f32.gmra.mrb[14].mxu0 %v6405_v43  ;;  %4278 = vmatprep.mubr.f32.mxu1 %v6023_v11  ;;  %v6424_v11 = vld [vmem:[#allocation2 + $0x121] sm:$0xff] }
  0xf1   : > { %4622 = vmatprep.mubr.f32.mxu0 %v6407_v26  ;;  %5013 = vmatpush3.bf16.msra.mxu0 %v5010_v49  ;;  %v2927_v49 = vld [vmem:[#allocation2 + $0x18a] sm:$0xff] }
  0xf3   : > { %4279 = vmatmul.mubr.f32.vlgmr.msra.gmra.mrb[0].mxu1 %v6037_v23  ;;  %v6431_v23 = vld [vmem:[#allocation2 + $0x129] sm:$0xff] }
  0xf4   : > { %4623 = vmatmul.mubr.f32.gmra.mrb[16].mxu0 %v6413_v50  ;;  %5022 = vmatpush3.bf16.msra.mxu1 %v5367_v8  ;;  %v6434_v8 = vld [vmem:[#allocation2 + $0x139] sm:$0xff] }
  0xf5   : > { %4281 = vmatprep.mubr.f32.mxu1 %v6043_v32  ;;  %4625 = vmatprep.mubr.f32.mxu0 %v6415_v59  ;;  %v6613_v32 = vld [vmem:[#allocation12_spill] sm:$0xff] }
  0xf6   : > { %5015 = vmatprep.subr.bf16.mxu1 %v5384_v13 }
  0xf7   : > { %4282 = vmatmul.mubr.f32.gmra.mrb[2].mxu1 %v6056_v31  ;;  %v6441_v31 = vld [vmem:[#allocation2 + $0x141] sm:$0xff] }
  0xf8   : > { %4626 = vmatmul.mubr.f32.gmra.mrb[18].mxu0 %v6422_v21  ;;  %4284 = vmatprep.mubr.f32.mxu1 %v6061_v51  ;;  %v6444_v51 = vld [vmem:[#allocation2 + $0x151] sm:$0xff] }
  0xf9   : > { %4628 = vmatprep.mubr.f32.mxu0 %v6424_v11  ;;  %5023 = vmatpush3.bf16.msra.mxu1 %v5384_v13  ;;  %v6615_v13 = vld [vmem:[#allocation13_spill] sm:$0xff] }
  0xfa   : > { %5016 = vmatprep.subr.bf16.mxu1 %v5399_v18 }
  0xfb   : > { %4285 = vmatmul.mubr.f32.gmra.mrb[4].mxu1 %v6074_v20  ;;  %v6451_v20 = vld [vmem:[#allocation2 + $0x159] sm:$0xff] }
  0xfc   : > { %4629 = vmatmul.mubr.f32.gmra.mrb[20].mxu0 %v6431_v23  ;;  %4287 = vmatprep.mubr.f32.mxu1 %v6613_v32 }
  0xfd   : > { %4631 = vmatprep.mubr.f32.mxu0 %v6434_v8  ;;  %5024 = vmatpush3.bf16.msra.mxu1 %v5399_v18  ;;  %v6619_v18 = vld [vmem:[#allocation16_spill] sm:$0xff] }
  0xfe   : > { %5017 = vmatprep.subr.bf16.mxu1 %v6614_v58 }
  0xff   : > { %4288 = vmatmul.mubr.f32.gmra.mrb[6].mxu1 %v6615_v13 }
 0x100   : > { %4632 = vmatmul.mubr.f32.gmra.mrb[22].mxu0 %v6441_v31  ;;  %4290 = vmatprep.mubr.f32.mxu1 %v6616_v15 }
 0x101   : > { %4634 = vmatprep.mubr.f32.mxu0 %v6444_v51  ;;  %5025 = vmatpush3.bf16.msra.mxu1 %v6614_v58 }
 0x102   : > { %5018 = vmatprep.subr.bf16.mxu1 %v6617_v12 }
 0x103   : > { %4291 = vmatmul.mubr.f32.gmra.mrb[8].mxu1 %v6618_v37 }
 0x104   : > { %4635 = vmatmul.mubr.f32.gmra.mrb[24].mxu0 %v6451_v20  ;;  %4293 = vmatprep.mubr.f32.mxu1 %v6619_v18 }
 0x105   : > { %4637 = vmatprep.mubr.f32.mxu0 %v6620_v36  ;;  %5026 = vmatpush3.bf16.msra.mxu1 %v6617_v12 }
 0x106   : > { %5019 = vmatprep.subr.bf16.mxu1 %v6621_v17 }
 0x107   : > { %4294 = vmatmul.mubr.f32.gmra.mrb[10].mxu1 %v6622_v62 }
 0x108   : > { %4638 = vmatmul.mubr.f32.gmra.mrb[26].mxu0 %v6623_v52  ;;  %4296 = vmatprep.mubr.f32.mxu1 %v6624_v4 }
 0x109   : > { %4640 = vmatprep.mubr.f32.mxu0 %v6625_v38  ;;  %5027 = vmatpush3.bf16.msra.mxu1 %v6621_v17 }
 0x10a   : > { %5020 = vmatprep.subr.bf16.mxu1 %v6626_v45 }
 0x10b   : > { %4297 = vmatmul.mubr.f32.gmra.mrb[12].mxu1 %v6627_v53 }
 0x10c   : > { %4641 = vmatmul.mubr.f32.gmra.mrb[28].mxu0 %v6628_v40  ;;  %4299 = vmatprep.mubr.f32.mxu1 %v6629_v39 }
 0x10d   : > { %4643 = vmatprep.mubr.f32.mxu0 %v2622_v22  ;;  %5028 = vmatpush3.bf16.msra.mxu1 %v6626_v45 }
 0x10e   : > { %5021 = vmatprep.subr.bf16.mxu1 %v6630_v10 }
 0x10f   : > { %4300 = vmatmul.mubr.f32.gmra.mrb[14].mxu1 %v6631_v42 }
 0x110   : > { %4644 = vmatmul.mubr.f32.gmra.mrb[30].mxu0 %v2623_v24  ;;  %4302 = vmatprep.mubr.f32.mxu1 %v6161_v33  ;;  %v2903_v33 = vld [vmem:[#allocation2 + $0x6a] sm:$0xff] }
 0x111   : > { %4678 = vmatprep.mubr.f32.mxu0 %v2898_v44  ;;  %5029 = vmatpush3.bf16.msra.mxu1 %v6630_v10 }
 0x113   : > { %4303 = vmatmul.mubr.f32.gmra.mrb[16].mxu1 %v6173_v7  ;;  %v2905_v7 = vld [vmem:[#allocation2 + $0x82] sm:$0xff] }
 0x114   : > { %4679 = vmatmul.mubr.f32.vlgmr.msra.gmra.mrb[0].mxu0 %v2899_v28  ;;  %4305 = vmatprep.mubr.f32.mxu1 %v6177_v0  ;;  %v2907_v0 = vld [vmem:[#allocation2 + $0x9a] sm:$0xff] }
 0x115   : > { %4681 = vmatprep.mubr.f32.mxu0 %v2900_v9 }
 0x117   : > { %4306 = vmatmul.mubr.f32.gmra.mrb[18].mxu1 %v6188_v55  ;;  %v2908_v55 = vld [vmem:[#allocation2 + $0xaa] sm:$0xff] }
 0x118   : > { %4682 = vmatmul.mubr.f32.gmra.mrb[2].mxu0 %v2901_v2  ;;  %4308 = vmatprep.mubr.f32.mxu1 %v6191_v16  ;;  %v2910_v16 = vld [vmem:[#allocation2 + $0xc2] sm:$0xff] }
 0x119   : > { %4684 = vmatprep.mubr.f32.mxu0 %v2902_v34 }
 0x11b   : > { %4309 = vmatmul.mubr.f32.gmra.mrb[20].mxu1 %v6202_v27  ;;  %v2909_v27 = vld [vmem:[#allocation2 + $0xb2] sm:$0xff] }
 0x11c   : > { %4685 = vmatmul.mubr.f32.gmra.mrb[4].mxu0 %v2903_v33  ;;  %4311 = vmatprep.mubr.f32.mxu1 %v6205_v25  ;;  %v2912_v25 = vld [vmem:[#allocation2 + $0xda] sm:$0xff] }
 0x11d   : > { %4687 = vmatprep.mubr.f32.mxu0 %v2904_v41 }
 0x11f   : > { %4312 = vmatmul.mubr.f32.gmra.mrb[22].mxu1 %v6216_v46  ;;  %v2911_v46 = vld [vmem:[#allocation2 + $0xca] sm:$0xff] }
 0x120   : > { %4688 = vmatmul.mubr.f32.gmra.mrb[6].mxu0 %v2905_v7  ;;  %4314 = vmatprep.mubr.f32.mxu1 %v6219_v3  ;;  %v2914_v3 = vld [vmem:[#allocation2 + $0xf2] sm:$0xff] }
 0x121   : > { %4690 = vmatprep.mubr.f32.mxu0 %v2906_v5 }
 0x123   : > { %4315 = vmatmul.mubr.f32.gmra.mrb[24].mxu1 %v6230_v29  ;;  %v2913_v29 = vld [vmem:[#allocation2 + $0xe2] sm:$0xff] }
 0x124   : > { %4691 = vmatmul.mubr.f32.gmra.mrb[8].mxu0 %v2907_v0  ;;  %4317 = vmatprep.mubr.f32.mxu1 %v6233_v54  ;;  %v2916_v54 = vld [vmem:[#allocation2 + $0x10a] sm:$0xff] }
 0x125   : > { %4693 = vmatprep.mubr.f32.mxu0 %v2908_v55 }
 0x127   : > { %4318 = vmatmul.mubr.f32.gmra.mrb[26].mxu1 %v6244_v60  ;;  %v2915_v60 = vld [vmem:[#allocation2 + $0xfa] sm:$0xff] }
 0x128   : > { %4694 = vmatmul.mubr.f32.gmra.mrb[10].mxu0 %v2909_v27  ;;  %4320 = vmatprep.mubr.f32.mxu1 %v6247_v48  ;;  %v2918_v48 = vld [vmem:[#allocation2 + $0x122] sm:$0xff] }
 0x129   : > { %4696 = vmatprep.mubr.f32.mxu0 %v2910_v16 }
 0x12b   : > { %4321 = vmatmul.mubr.f32.gmra.mrb[28].mxu1 %v6258_v63  ;;  %v2917_v63 = vld [vmem:[#allocation2 + $0x112] sm:$0xff] }
 0x12c   : > { %4697 = vmatmul.mubr.f32.gmra.mrb[12].mxu0 %v2911_v46  ;;  %4323 = vmatprep.mubr.f32.mxu1 %v6323_v35  ;;  %v2919_v35 = vld [vmem:[#allocation2 + $0x12a] sm:$0xff] }
 0x12d   : > { %4699 = vmatprep.mubr.f32.mxu0 %v2912_v25 }
 0x12f   : > { %4324 = vmatmul.mubr.f32.gmra.mrb[30].mxu1 %v6335_v47  ;;  %v2920_v47 = vld [vmem:[#allocation2 + $0x13a] sm:$0xff] }
 0x130   : > { %4700 = vmatmul.mubr.f32.gmra.mrb[14].mxu0 %v2913_v29  ;;  %4382 = vmatprep.mubr.f32.mxu1 %v6400_v1  ;;  %v1702_v1 = vld [vmem:[#allocation2 + $0x171] sm:$0xff] }
 0x131   : > { %4702 = vmatprep.mubr.f32.mxu0 %v2914_v3 }
 0x133   : > { %4383 = vmatmul.mubr.f32.vlgmr.msra.gmra.mrb[16].mxu1 %v6405_v43  ;;  %v1703_v43 = vld [vmem:[#allocation2 + $0x181] sm:$0xff] }
 0x134   : > { %4703 = vmatmul.mubr.f32.gmra.mrb[16].mxu0 %v2915_v60  ;;  %4385 = vmatprep.mubr.f32.mxu1 %v6407_v26  ;;  %v2928_v26 = vld [vmem:[#allocation2 + $0x19a] sm:$0xff] }
 0x135   : > { %4705 = vmatprep.mubr.f32.mxu0 %v2916_v54 }
 0x137   : > { %4386 = vmatmul.mubr.f32.gmra.mrb[18].mxu1 %v6413_v50  ;;  %v1704_v50 = vld [vmem:[#allocation2 + $0x189] sm:$0xff] }
 0x138   : > { %4706 = vmatmul.mubr.f32.gmra.mrb[18].mxu0 %v2917_v63  ;;  %4388 = vmatprep.mubr.f32.mxu1 %v6415_v59  ;;  %v2929_v59 = vld [vmem:[#allocation2 + $0x1a2] sm:$0xff] }
 0x139   : > { %4708 = vmatprep.mubr.f32.mxu0 %v2918_v48 }
 0x13b   : > { %4389 = vmatmul.mubr.f32.gmra.mrb[20].mxu1 %v6422_v21 }
 0x13c   : > { %4709 = vmatmul.mubr.f32.gmra.mrb[20].mxu0 %v2919_v35  ;;  %4391 = vmatprep.mubr.f32.mxu1 %v6424_v11 }
 0x13d   : > { %4711 = vmatprep.mubr.f32.mxu0 %v2920_v47 }
 0x13f   : > { %4392 = vmatmul.mubr.f32.gmra.mrb[22].mxu1 %v6431_v23 }
 0x140   : > { %4712 = vmatmul.mubr.f32.gmra.mrb[22].mxu0 %v2921_v61  ;;  %4394 = vmatprep.mubr.f32.mxu1 %v6434_v8 }
 0x141   : > { %4714 = vmatprep.mubr.f32.mxu0 %v2922_v30 }
 0x143   : > { %4395 = vmatmul.mubr.f32.gmra.mrb[24].mxu1 %v6441_v31 }
 0x144   : > { %4715 = vmatmul.mubr.f32.gmra.mrb[24].mxu0 %v2923_v19  ;;  %4397 = vmatprep.mubr.f32.mxu1 %v6444_v51 }
 0x145   : > { %4717 = vmatprep.mubr.f32.mxu0 %v2924_v57 }
 0x147   : > { %4398 = vmatmul.mubr.f32.gmra.mrb[26].mxu1 %v6451_v20 }
 0x148   : > { %4718 = vmatmul.mubr.f32.gmra.mrb[26].mxu0 %v2925_v14  ;;  %4400 = vmatprep.mubr.f32.mxu1 %v1701_v6 }
 0x149   : > { %4720 = vmatprep.mubr.f32.mxu0 %v2926_v56 }
 0x14b   : > { %4401 = vmatmul.mubr.f32.gmra.mrb[28].mxu1 %v1702_v1 }
 0x14c   : > { %4721 = vmatmul.mubr.f32.gmra.mrb[28].mxu0 %v2927_v49  ;;  %4403 = vmatprep.mubr.f32.mxu1 %v1703_v43 }
 0x14d   : > { %4723 = vmatprep.mubr.f32.mxu0 %v2928_v26 }
 0x14f   : > { %4404 = vmatmul.mubr.f32.gmra.mrb[30].mxu1 %v1704_v50 }
 0x150   : > { %4724 = vmatmul.mubr.f32.gmra.mrb[30].mxu0 %v2929_v59 }
 0x1c6   : > { %v4280_v21 = vpop.f32.mrb[0].mxu1 }
 0x1c7   : > { %v1482_v11 = vpop.f32.mrb[1].mxu1 }
 0x1ca   : > { %v4283_v23 = vpop.f32.mrb[2].mxu1 }
 0x1cb   : > { %v1492_v8 = vpop.f32.mrb[3].mxu1 }
 0x1ce   : > { %v4286_v32 = vpop.f32.mrb[4].mxu1 }
 0x1cf   : > { %v1502_v31 = vpop.f32.mrb[5].mxu1 }
 0x1d2   : > { %v4289_v51 = vpop.f32.mrb[6].mxu1 }
 0x1d3   : > { %v1512_v58 = vpop.f32.mrb[7].mxu1 }
 0x1d6   : > { %v4292_v13 = vpop.f32.mrb[8].mxu1 }
 0x1d7   : > { %v1522_v15 = vpop.f32.mrb[9].mxu1 }
 0x1da   : > { %v4295_v20 = vpop.f32.mrb[10].mxu1 }
 0x1db   : > { %v6502_v12 = vpop.f32.mrb[11].mxu1 }
 0x1de   : > { %v6504_v37 = vpop.f32.mrb[12].mxu1 }
 0x1df   : > { %v6506_v18 = vpop.f32.mrb[13].mxu1 }
 0x1e2   : > { %v6508_v36 = vpop.f32.mrb[14].mxu1 }
 0x1e3   : > { %v6510_v17 = vpop.f32.mrb[15].mxu1 }
 0x1e7   : > { %v4680_v62 = vpop.f32.mrb[0].mxu0 }
 0x1e8   : > { %v5030_v52 = vadd.f32 %v4680_v62, %v4280_v21  ;;  %v3013_v4 = vpop.f32.mrb[1].mxu0 }
 0x1e9   : > { %v5031_v38 = vadd.f32 %v3013_v4, %v1482_v11 }
 0x1ea   : > { %3205 = vst [vmem:[%s6517_s8 + $0x8] sm:$0xff] %v5030_v52  ;;  %v3275_v22 = vmul.f32 %v5030_v52, %v5030_v52 }
 0x1eb   : > { %3204 = vst [vmem:[%s6517_s8] sm:$0xff] %v5031_v38  ;;  %v3236_v45 = vadd.f32 %v5031_v38, %v5030_v52  ;;  %v3274_v53 = vmul.f32 %v5031_v38, %v5031_v38  ;;  %v4683_v40 = vpop.f32.mrb[2].mxu0 }
 0x1ec   : > { %v5032_v39 = vadd.f32 %v4683_v40, %v4283_v23  ;;  %v3023_v24 = vpop.f32.mrb[3].mxu0 }
 0x1ed   : > { %v3306_v44 = vadd.f32 %v3275_v22, %v3274_v53  ;;  %v5033_v10 = vadd.f32 %v3023_v24, %v1492_v8 }
 0x1ee   : > { %3207 = vst [vmem:[%s6517_s8 + $0x18] sm:$0xff] %v5032_v39  ;;  %v3277_v33 = vmul.f32 %v5032_v39, %v5032_v39 }
 0x1ef   : > { %3206 = vst [vmem:[%s6517_s8 + $0x10] sm:$0xff] %v5033_v10  ;;  %v3237_v42 = vadd.f32 %v5033_v10, %v3236_v45  ;;  %v3276_v28 = vmul.f32 %v5033_v10, %v5033_v10  ;;  %v4686_v9 = vpop.f32.mrb[4].mxu0 }
 0x1f0   : > { %v5034_v2 = vadd.f32 %v4686_v9, %v4286_v32  ;;  %v3033_v34 = vpop.f32.mrb[5].mxu0 }
 0x1f1   : > { %v3307_v41 = vadd.f32 %v3306_v44, %v3276_v28  ;;  %v5035_v7 = vadd.f32 %v3033_v34, %v1502_v31  ;;  %v3238_v5 = vadd.f32 %v5032_v39, %v3237_v42 }
 0x1f2   : > { %3209 = vst [vmem:[%s6517_s8 + $0x28] sm:$0xff] %v5034_v2  ;;  %v3279_v29 = vmul.f32 %v5034_v2, %v5034_v2 }
 0x1f3   : > { %3208 = vst [vmem:[%s6517_s8 + $0x20] sm:$0xff] %v5035_v7  ;;  %v3239_v0 = vadd.f32 %v5035_v7, %v3238_v5  ;;  %v3278_v55 = vmul.f32 %v5035_v7, %v5035_v7  ;;  %v3308_v27 = vadd.f32 %v3307_v41, %v3277_v33  ;;  %v4689_v16 = vpop.f32.mrb[6].mxu0 }
 0x1f4   : > { %v5036_v46 = vadd.f32 %v4689_v16, %v4289_v51  ;;  %v3043_v25 = vpop.f32.mrb[7].mxu0 }
 0x1f5   : > { %v3309_v3 = vadd.f32 %v3308_v27, %v3278_v55  ;;  %v5037_v60 = vadd.f32 %v3043_v25, %v1512_v58  ;;  %v3240_v54 = vadd.f32 %v5034_v2, %v3239_v0 }
 0x1f6   : > { %3211 = vst [vmem:[%s6517_s8 + $0x38] sm:$0xff] %v5036_v46  ;;  %v3281_v19 = vmul.f32 %v5036_v46, %v5036_v46 }
 0x1f7   : > { %3210 = vst [vmem:[%s6517_s8 + $0x30] sm:$0xff] %v5037_v60  ;;  %v3241_v63 = vadd.f32 %v5037_v60, %v3240_v54  ;;  %v3280_v48 = vmul.f32 %v5037_v60, %v5037_v60  ;;  %v3310_v35 = vadd.f32 %v3309_v3, %v3279_v29  ;;  %v4692_v47 = vpop.f32.mrb[8].mxu0 }
 0x1f8   : > { %v5038_v61 = vadd.f32 %v4692_v47, %v4292_v13  ;;  %v3053_v30 = vpop.f32.mrb[9].mxu0 }
 0x1f9   : > { %v3311_v57 = vadd.f32 %v3310_v35, %v3280_v48  ;;  %v5039_v14 = vadd.f32 %v3053_v30, %v1522_v15  ;;  %v3242_v6 = vadd.f32 %v5036_v46, %v3241_v63 }
 0x1fa   : > { %3213 = vst [vmem:[%s6517_s8 + $0x48] sm:$0xff] %v5038_v61  ;;  %v3283_v59 = vmul.f32 %v5038_v61, %v5038_v61 }
 0x1fb   : > { %3212 = vst [vmem:[%s6517_s8 + $0x40] sm:$0xff] %v5039_v14  ;;  %v3243_v56 = vadd.f32 %v5039_v14, %v3242_v6  ;;  %v3282_v1 = vmul.f32 %v5039_v14, %v5039_v14  ;;  %v3312_v49 = vadd.f32 %v3311_v57, %v3281_v19  ;;  %v4695_v43 = vpop.f32.mrb[10].mxu0 }
 0x1fc   : > { %v5040_v26 = vadd.f32 %v4695_v43, %v4295_v20  ;;  %v3063_v50 = vpop.f32.mrb[11].mxu0 }
 0x1fd   : > { %v3313_v21 = vadd.f32 %v3312_v49, %v3282_v1  ;;  %v5041_v11 = vadd.f32 %v3063_v50, %v6502_v12  ;;  %v3244_v23 = vadd.f32 %v5038_v61, %v3243_v56 }
 0x1fe   : > { %3215 = vst [vmem:[%s6517_s8 + $0x58] sm:$0xff] %v5040_v26  ;;  %v3285_v15 = vmul.f32 %v5040_v26, %v5040_v26 }
 0x1ff   : > { %3214 = vst [vmem:[%s6517_s8 + $0x50] sm:$0xff] %v5041_v11  ;;  %v3245_v8 = vadd.f32 %v5041_v11, %v3244_v23  ;;  %v3284_v32 = vmul.f32 %v5041_v11, %v5041_v11  ;;  %v3314_v31 = vadd.f32 %v3313_v21, %v3283_v59  ;;  %v4698_v51 = vpop.f32.mrb[12].mxu0 }
 0x200   : > { %v5042_v58 = vadd.f32 %v4698_v51, %v6504_v37  ;;  %v3073_v13 = vpop.f32.mrb[13].mxu0 }
 0x201   : > { %v3315_v20 = vadd.f32 %v3314_v31, %v3284_v32  ;;  %v5043_v62 = vadd.f32 %v3073_v13, %v6506_v18  ;;  %v3246_v52 = vadd.f32 %v5040_v26, %v3245_v8 }
 0x202   : > { %3217 = vst [vmem:[%s6517_s8 + $0x68] sm:$0xff] %v5042_v58  ;;  %v3287_v40 = vmul.f32 %v5042_v58, %v5042_v58 }
 0x203   : > { %3216 = vst [vmem:[%s6517_s8 + $0x60] sm:$0xff] %v5043_v62  ;;  %v3247_v12 = vadd.f32 %v5043_v62, %v3246_v52  ;;  %v3286_v4 = vmul.f32 %v5043_v62, %v5043_v62  ;;  %v3316_v38 = vadd.f32 %v3315_v20, %v3285_v15  ;;  %v4701_v22 = vpop.f32.mrb[14].mxu0 }
 0x204   : > { %v5044_v45 = vadd.f32 %v4701_v22, %v6508_v36  ;;  %v3083_v53 = vpop.f32.mrb[15].mxu0 }
 0x205   : > { %v3317_v39 = vadd.f32 %v3316_v38, %v3286_v4  ;;  %v5045_v37 = vadd.f32 %v3083_v53, %v6510_v17  ;;  %v3248_v24 = vadd.f32 %v5042_v58, %v3247_v12 }
 0x206   : > { %3219 = vst [vmem:[%s6517_s8 + $0x78] sm:$0xff] %v5044_v45  ;;  %v4384_v18 = vpop.f32.mrb[16].mxu1  ;;  %v3289_v33 = vmul.f32 %v5044_v45, %v5044_v45 }
 0x207   : > { %3218 = vst [vmem:[%s6517_s8 + $0x70] sm:$0xff] %v5045_v37  ;;  %v3249_v44 = vadd.f32 %v5045_v37, %v3248_v24  ;;  %v3288_v10 = vmul.f32 %v5045_v37, %v5045_v37  ;;  %v3318_v42 = vadd.f32 %v3317_v39, %v3287_v40  ;;  %v4704_v28 = vpop.f32.mrb[16].mxu0  ;;  %v1868_v9 = vpop.f32.mrb[17].mxu1 }
 0x208   : > { %v5046_v2 = vadd.f32 %v4704_v28, %v4384_v18  ;;  %v3093_v34 = vpop.f32.mrb[17].mxu0 }
 0x209   : > { %v3319_v36 = vadd.f32 %v3318_v42, %v3288_v10  ;;  %v5047_v41 = vadd.f32 %v3093_v34, %v1868_v9  ;;  %v3250_v7 = vadd.f32 %v5044_v45, %v3249_v44 }
 0x20a   : > { %3221 = vst [vmem:[%s6517_s8 + $0x88] sm:$0xff] %v5046_v2  ;;  %v4387_v17 = vpop.f32.mrb[18].mxu1  ;;  %v3291_v29 = vmul.f32 %v5046_v2, %v5046_v2 }
 0x20b   : > { %3220 = vst [vmem:[%s6517_s8 + $0x80] sm:$0xff] %v5047_v41  ;;  %v3251_v5 = vadd.f32 %v5047_v41, %v3250_v7  ;;  %v3290_v0 = vmul.f32 %v5047_v41, %v5047_v41  ;;  %v3320_v55 = vadd.f32 %v3319_v36, %v3289_v33  ;;  %v4707_v27 = vpop.f32.mrb[18].mxu0  ;;  %v1878_v16 = vpop.f32.mrb[19].mxu1 }
 0x20c   : > { %v5048_v46 = vadd.f32 %v4707_v27, %v4387_v17  ;;  %v3103_v25 = vpop.f32.mrb[19].mxu0 }
 0x20d   : > { %v3321_v3 = vadd.f32 %v3320_v55, %v3290_v0  ;;  %v5049_v60 = vadd.f32 %v3103_v25, %v1878_v16  ;;  %v3252_v54 = vadd.f32 %v5046_v2, %v3251_v5 }
 0x20e   : > { %3223 = vst [vmem:[%s6517_s8 + $0x98] sm:$0xff] %v5048_v46  ;;  %v4390_v63 = vpop.f32.mrb[20].mxu1  ;;  %v3293_v14 = vmul.f32 %v5048_v46, %v5048_v46 }
 0x20f   : > { %3222 = vst [vmem:[%s6517_s8 + $0x90] sm:$0xff] %v5049_v60  ;;  %v3253_v48 = vadd.f32 %v5049_v60, %v3252_v54  ;;  %v3292_v35 = vmul.f32 %v5049_v60, %v5049_v60  ;;  %v3322_v47 = vadd.f32 %v3321_v3, %v3291_v29  ;;  %v4710_v61 = vpop.f32.mrb[20].mxu0  ;;  %v1888_v30 = vpop.f32.mrb[21].mxu1 }
 0x210   : > { %v5050_v19 = vadd.f32 %v4710_v61, %v4390_v63  ;;  %v3113_v57 = vpop.f32.mrb[21].mxu0 }
 0x211   : > { %v3323_v6 = vadd.f32 %v3322_v47, %v3292_v35  ;;  %v5051_v56 = vadd.f32 %v3113_v57, %v1888_v30  ;;  %v3254_v1 = vadd.f32 %v5048_v46, %v3253_v48 }
 0x212   : > { %3225 = vst [vmem:[%s6517_s8 + $0xa8] sm:$0xff] %v5050_v19  ;;  %v4393_v49 = vpop.f32.mrb[22].mxu1  ;;  %v3295_v8 = vmul.f32 %v5050_v19, %v5050_v19 }
 0x213   : > { %3224 = vst [vmem:[%s6517_s8 + $0xa0] sm:$0xff] %v5051_v56  ;;  %v3255_v43 = vadd.f32 %v5051_v56, %v3254_v1  ;;  %v3294_v26 = vmul.f32 %v5051_v56, %v5051_v56  ;;  %v3324_v50 = vadd.f32 %v3323_v6, %v3293_v14  ;;  %v4713_v59 = vpop.f32.mrb[22].mxu0  ;;  %v1898_v21 = vpop.f32.mrb[23].mxu1 }
 0x214   : > { %v5052_v11 = vadd.f32 %v4713_v59, %v4393_v49  ;;  %v3123_v23 = vpop.f32.mrb[23].mxu0 }
 0x215   : > { %v3325_v32 = vadd.f32 %v3324_v50, %v3294_v26  ;;  %v5053_v31 = vadd.f32 %v3123_v23, %v1898_v21  ;;  %v3256_v51 = vadd.f32 %v5050_v19, %v3255_v43 }
 0x216   : > { %3227 = vst [vmem:[%s6517_s8 + $0xb8] sm:$0xff] %v5052_v11  ;;  %v4396_v58 = vpop.f32.mrb[24].mxu1  ;;  %v3297_v38 = vmul.f32 %v5052_v11, %v5052_v11 }
 0x217   : > { %3226 = vst [vmem:[%s6517_s8 + $0xb0] sm:$0xff] %v5053_v31  ;;  %v3257_v13 = vadd.f32 %v5053_v31, %v3256_v51  ;;  %v3296_v15 = vmul.f32 %v5053_v31, %v5053_v31  ;;  %v3326_v20 = vadd.f32 %v3325_v32, %v3295_v8  ;;  %v4716_v62 = vpop.f32.mrb[24].mxu0  ;;  %v1908_v52 = vpop.f32.mrb[25].mxu1 }
 0x218   : > { %v5054_v12 = vadd.f32 %v4716_v62, %v4396_v58  ;;  %v3133_v4 = vpop.f32.mrb[25].mxu0 }
 0x219   : > { %v3327_v22 = vadd.f32 %v3326_v20, %v3296_v15  ;;  %v5055_v45 = vadd.f32 %v3133_v4, %v1908_v52  ;;  %v3258_v53 = vadd.f32 %v5052_v11, %v3257_v13 }
 0x21a   : > { %3229 = vst [vmem:[%s6517_s8 + $0xc8] sm:$0xff] %v5054_v12  ;;  %v4399_v40 = vpop.f32.mrb[26].mxu1  ;;  %v3299_v28 = vmul.f32 %v5054_v12, %v5054_v12 }
 0x21b   : > { %3228 = vst [vmem:[%s6517_s8 + $0xc0] sm:$0xff] %v5055_v45  ;;  %v3259_v39 = vadd.f32 %v5055_v45, %v3258_v53  ;;  %v3298_v37 = vmul.f32 %v5055_v45, %v5055_v45  ;;  %v3328_v24 = vadd.f32 %v3327_v22, %v3297_v38  ;;  %v4719_v18 = vpop.f32.mrb[26].mxu0  ;;  %v1918_v44 = vpop.f32.mrb[27].mxu1 }
 0x21c   : > { %v5056_v10 = vadd.f32 %v4719_v18, %v4399_v40  ;;  %v3143_v42 = vpop.f32.mrb[27].mxu0 }
 0x21d   : > { %v3329_v9 = vadd.f32 %v3328_v24, %v3298_v37  ;;  %v5057_v2 = vadd.f32 %v3143_v42, %v1918_v44  ;;  %v3260_v34 = vadd.f32 %v5054_v12, %v3259_v39 }
 0x21e   : > { %3231 = vst [vmem:[%s6517_s8 + $0xd8] sm:$0xff] %v5056_v10  ;;  %v4402_v33 = vpop.f32.mrb[28].mxu1  ;;  %v3301_v27 = vmul.f32 %v5056_v10, %v5056_v10 }
 0x21f   : > { %3230 = vst [vmem:[%s6517_s8 + $0xd0] sm:$0xff] %v5057_v2  ;;  %v3261_v36 = vadd.f32 %v5057_v2, %v3260_v34  ;;  %v3300_v41 = vmul.f32 %v5057_v2, %v5057_v2  ;;  %v3330_v7 = vadd.f32 %v3329_v9, %v3299_v28  ;;  %v4722_v17 = vpop.f32.mrb[28].mxu0  ;;  %v1928_v5 = vpop.f32.mrb[29].mxu1 }
 0x220   : > { %v5058_v0 = vadd.f32 %v4722_v17, %v4402_v33  ;;  %v3153_v55 = vpop.f32.mrb[29].mxu0 }
 0x221   : > { %v3331_v16 = vadd.f32 %v3330_v7, %v3300_v41  ;;  %v5059_v46 = vadd.f32 %v3153_v55, %v1928_v5  ;;  %v3262_v25 = vadd.f32 %v5056_v10, %v3261_v36 }
 0x222   : > { %3233 = vst [vmem:[%s6517_s8 + $0xe8] sm:$0xff] %v5058_v0  ;;  %v4405_v29 = vpop.f32.mrb[30].mxu1  ;;  %v3303_v61 = vmul.f32 %v5058_v0, %v5058_v0 }
 0x223   : > { %3232 = vst [vmem:[%s6517_s8 + $0xe0] sm:$0xff] %v5059_v46  ;;  %v3263_v3 = vadd.f32 %v5059_v46, %v3262_v25  ;;  %v3302_v60 = vmul.f32 %v5059_v46, %v5059_v46  ;;  %v3332_v54 = vadd.f32 %v3331_v16, %v3301_v27  ;;  %v4725_v63 = vpop.f32.mrb[30].mxu0  ;;  %v1938_v48 = vpop.f32.mrb[31].mxu1 }
 0x224   : > { %v5060_v35 = vadd.f32 %v4725_v63, %v4405_v29  ;;  %v3163_v47 = vpop.f32.mrb[31].mxu0 }
 0x225   : > { %v3333_v30 = vadd.f32 %v3332_v54, %v3302_v60  ;;  %v5061_v19 = vadd.f32 %v3163_v47, %v1938_v48  ;;  %v3264_v57 = vadd.f32 %v5058_v0, %v3263_v3 }
 0x226   : > { %3235 = vst [vmem:[%s6517_s8 + $0xf8] sm:$0xff] %v5060_v35  ;;  %v3305_v1 = vmul.f32 %v5060_v35, %v5060_v35 }
 0x227   : > { %3234 = vst [vmem:[%s6517_s8 + $0xf0] sm:$0xff] %v5061_v19  ;;  %v3265_v14 = vadd.f32 %v5061_v19, %v3264_v57  ;;  %v3304_v6 = vmul.f32 %v5061_v19, %v5061_v19  ;;  %v3334_v56 = vadd.f32 %v3333_v30, %v3303_v61 }
 0x229   : > { %v3266_v49 = vadd.f32 %v5060_v35, %v3265_v14  ;;  %v3335_v43 = vadd.f32 %v3334_v56, %v3304_v6 }
 0x22b   : > { %v3267_v26 = vrot.slane %v3266_v49, 4  ;;  %v3336_v50 = vadd.f32 %v3335_v43, %v3305_v1 }
 0x22d   : > { %v3268_v59 = vadd.f32 %v3267_v26, %v3266_v49  ;;  %v3337_v21 = vrot.slane %v3336_v50, 4 }
 0x22f   : > { %v3269_v11 = vrot.slane %v3268_v59, 2  ;;  %v3338_v23 = vadd.f32 %v3337_v21, %v3336_v50 }
 0x231   : > { %v3270_v8 = vadd.f32 %v3269_v11, %v3268_v59  ;;  %v3339_v32 = vrot.slane %v3338_v23, 2 }
 0x233   : > { %v3271_v31 = vrot.slane %v3270_v8, 1  ;;  %v3340_v51 = vadd.f32 %v3339_v32, %v3338_v23 }
 0x235   : > { %v3272_v58 = vadd.f32 %v3271_v31, %v3270_v8  ;;  %v3341_v13 = vrot.slane %v3340_v51, 1 }
 0x237   : > { %3273 = vst [vmem:[%s235_s14] sm:$0x1] %v3272_v58  ;;  %v3342_v15 = vadd.f32 %v3341_v13, %v3340_v51 }
 0x239   : > { %3343 = vst [vmem:[%s235_s14 + $0x1] sm:$0x1] %v3342_v15 }
 0x23a PF: > { %s16_s18 = sadd.s32 1, %s5302_s18  }
 0x23b   : > { %p13_p4 = scmp.ge.s32.totalorder %s16_s18, 4  }
 0x23d   :  { %15 = sbr.rel (!%p13_p4) target bundleno = 1 (0x1), region = 89 }

// kernel: conv_block_forward.3
= control target key start
LH: loop header
LB: loop body
LE: loop exit
PB: predicated region body
PF: predicated region fallthrough
CT: control target
= control target key end

     0   :  { %s5388_s18 = smov 0   ;;  %s6404_s0 = inlined_call_operand.vmem [shape: f32[2,16,16,4], index: 0, kind: input, shape index: {}]   ;;  %s6405_s1 = inlined_call_operand.vmem [shape: f32[1,4], index: 1, kind: input, shape index: {}]   ;;  %s6406_s2 = inlined_call_operand.vmem [shape: f32[1,4], index: 2, kind: input, shape index: {}]   ;;  %s6407_s3 = inlined_call_operand.vmem [shape: f32[9,4,128], index: 3, kind: input, shape index: {}]   ;;  %s6408_s4 = inlined_call_operand.vmem [shape: f32[2,256,128], index: 4, kind: output, shape index: {0}]   ;;  %s6409_s5 = inlined_call_operand.vmem [shape: f32[2,2,128], index: 5, kind: output, shape index: {1}]  }
   0x1 LB: > { %s4016_s1 = sadd.s32 4294967295, %s5355_s18   ;;  %p4020_p0 = scmp.ge.s32.totalorder %s5355_s18, 1  ;;  %s5355_s18 = sphi %s5388_s18, %s16_s18  }
   0x2   : > { %p190_p1 = scmp.lt.s32.totalorder %s5355_s18, 3 }
   0x4   : > { %p191_p2 = pnand %p4020_p0, %p190_p1 }
   0x6   : > { %194 = sbr.rel (%p191_p2) target bundleno = 560 (0x230), region = 36 }
   0xd   : > { %v4026_v0 = vld [vmem:[%s6407_s3 + $0x4] sm:$0xf]  ;;  %vm506_vm0 = vcmask 1043456   ;;  %vm268_vm1 = vcmask 31744   ;;  %vm271_vm2 = vcmask 25600   ;;  %v5357_v1 = vmov 0.0  }
   0xe   : > { %4632 = vmatprep.subr.msk.mxu1 %vm506_vm0, %v4026_v0  ;;  %269 = vst.msk [vmem:[#allocation2] sm:$0xff] %vm268_vm1, %v5357_v1  ;;  %270 = vst.msk [vmem:[#allocation2 + $0x8] sm:$0xff] %vm268_vm1, %v5357_v1  ;;  %v5407_v2 = vld [vmem:[%s6407_s3 + $0x10] sm:$0xf]  ;;  %p5411_p3 = scmp.lt.s32.totalorder %s4016_s1, 1  ;;  %vm278_vm3 = vcmask 24576  }
   0xf   : > { %274 = vst.msk [vmem:[#allocation2 + $0x198] sm:$0xff] %vm268_vm1, %v5357_v1  ;;  %275 = vst.msk [vmem:[#allocation2 + $0x1a0] sm:$0xff] %vm268_vm1, %v5357_v1  ;;  %v5418_v3 = vld [vmem:[%s6407_s3] sm:$0xf]  ;;  %4633 = vmatpush3.msk.msra.mxu1 %vm506_vm0, %v4026_v0  ;;  %4832 = vmatprep.subr.msk.mxu0 %vm506_vm0, %v5407_v2  ;;  %v5426_v4 = vld [vmem:[%s6407_s3 + $0x14] sm:$0xf] }
  0x10   : > { %272 = vst.msk [vmem:[#allocation2 + $0x10] sm:$0x3] %vm271_vm2, %v5357_v1  ;;  %276 = vst.msk [vmem:[#allocation2 + $0x1a8] sm:$0x3] %vm271_vm2, %v5357_v1  ;;  %4833 = vmatpush3.msk.msra.mxu0 %vm506_vm0, %v5407_v2  ;;  %s6518_s1 = smov (!%p5411_p3, %s4016_s1), 1  ;;  %4682 = vmatprep.subr.msk.mxu1 %vm506_vm0, %v5418_v3 }
  0x11   : > { %295 = vst.msk [vmem:[#allocation2 + $0x29] sm:$0x1] %vm278_vm3, %v5357_v1  ;;  %279 = vst.msk [vmem:[#allocation2 + $0x18] sm:$0x1] %vm278_vm3, %v5357_v1  ;;  %4882 = vmatprep.subr.msk.mxu0 %vm506_vm0, %v5426_v4  ;;  %s4333_s27 = sshll.u32 %s6518_s1, 8  ;;  %s4025_s19 = sshll.u32 %s6518_s1, 1 }
  0x12   : > { %280 = vst.msk [vmem:[#allocation2 + $0x30] sm:$0x1] %vm278_vm3, %v5357_v1  ;;  %281 = vst.msk [vmem:[#allocation2 + $0x48] sm:$0x1] %vm278_vm3, %v5357_v1  ;;  %s5478_s30 = scalar_lea.vmem %s6404_s0, %s4333_s27  ;;  %v5486_v8 = vld [vmem:[%s6407_s3 + $0x8] sm:$0xf]  ;;  %s6358_s2 = scalar_lea.vmem %s6408_s4, %s4333_s27 }
  0x13   : > { %282 = vst.msk [vmem:[#allocation2 + $0x60] sm:$0x1] %vm278_vm3, %v5357_v1  ;;  %283 = vst.msk [vmem:[#allocation2 + $0x78] sm:$0x1] %vm278_vm3, %v5357_v1  ;;  %v236_v5 = vld [vmem:[%s5478_s30] sm:$0xff]  ;;  %v237_v6 = vld [vmem:[%s5478_s30 + $0x8] sm:$0xff]  ;;  %s235_s22 = scalar_lea.vmem %s6409_s5, %s4025_s19 }
  0x14   : > { %284 = vst.msk [vmem:[#allocation2 + $0x90] sm:$0x1] %vm278_vm3, %v5357_v1  ;;  %285 = vst.msk [vmem:[#allocation2 + $0xa8] sm:$0x1] %vm278_vm3, %v5357_v1  ;;  %v238_v7 = vld [vmem:[%s5478_s30 + $0x10] sm:$0xff]  ;;  %v239_v11 = vld [vmem:[%s5478_s30 + $0x18] sm:$0xff] }
  0x15   : > { %286 = vst.msk [vmem:[#allocation2 + $0xc0] sm:$0x1] %vm278_vm3, %v5357_v1  ;;  %287 = vst.msk [vmem:[#allocation2 + $0xd8] sm:$0x1] %vm278_vm3, %v5357_v1  ;;  %v376_v9 = vld [vmem:[#allocation2 + $0x1] sm:$0xff]  ;;  %v242_v14 = vld [vmem:[%s5478_s30 + $0x30] sm:$0xff] }
  0x16   : > { %288 = vst.msk [vmem:[#allocation2 + $0xf0] sm:$0x1] %vm278_vm3, %v5357_v1  ;;  %289 = vst.msk [vmem:[#allocation2 + $0x108] sm:$0x1] %vm278_vm3, %v5357_v1  ;;  %4634 = vmatprep.mubr.msk.f32.mxu1 %vm268_vm1, %v376_v9  ;;  %v240_v12 = vld [vmem:[%s5478_s30 + $0x20] sm:$0xff]  ;;  %v241_v13 = vld [vmem:[%s5478_s30 + $0x28] sm:$0xff] }
  0x17   : > { %290 = vst.msk [vmem:[#allocation2 + $0x120] sm:$0x1] %vm278_vm3, %v5357_v1  ;;  %291 = vst.msk [vmem:[#allocation2 + $0x138] sm:$0x1] %vm278_vm3, %v5357_v1  ;;  %v377_v10 = vld [vmem:[#allocation2 + $0x9] sm:$0xff]  ;;  %v243_v15 = vld [vmem:[%s5478_s30 + $0x38] sm:$0xff] }
  0x18   : > { %292 = vst.msk [vmem:[#allocation2 + $0x150] sm:$0x1] %vm278_vm3, %v5357_v1  ;;  %293 = vst.msk [vmem:[#allocation2 + $0x168] sm:$0x1] %vm278_vm3, %v5357_v1  ;;  %4635 = vmatmul.mubr.msk.f32.vlgmr.msra.gmra.mrb[0].mxu1 %vm268_vm1, %v377_v10  ;;  %v244_v16 = vld [vmem:[%s5478_s30 + $0x40] sm:$0xff]  ;;  %v245_v17 = vld [vmem:[%s5478_s30 + $0x48] sm:$0xff] }
  0x19   : > { %294 = vst.msk [vmem:[#allocation2 + $0x180] sm:$0x1] %vm278_vm3, %v5357_v1  ;;  %296 = vst.msk [vmem:[#allocation2 + $0x41] sm:$0x1] %vm278_vm3, %v5357_v1  ;;  %4683 = vmatpush3.msk.msra.mxu1 %vm506_vm0, %v5418_v3  ;;  %v246_v18 = vld [vmem:[%s5478_s30 + $0x50] sm:$0xff]  ;;  %v247_v19 = vld [vmem:[%s5478_s30 + $0x58] sm:$0xff] }
  0x1a   : > { %297 = vst.msk [vmem:[#allocation2 + $0x59] sm:$0x1] %vm278_vm3, %v5357_v1  ;;  %298 = vst.msk [vmem:[#allocation2 + $0x71] sm:$0x1] %vm278_vm3, %v5357_v1  ;;  %v248_v20 = vld [vmem:[%s5478_s30 + $0x60] sm:$0xff]  ;;  %v249_v21 = vld [vmem:[%s5478_s30 + $0x68] sm:$0xff]  ;;  %4732 = vmatprep.subr.msk.mxu1 %vm506_vm0, %v5486_v8 }
  0x1b   : > { %299 = vst.msk [vmem:[#allocation2 + $0x89] sm:$0x1] %vm278_vm3, %v5357_v1  ;;  %300 = vst.msk [vmem:[#allocation2 + $0xa1] sm:$0x1] %vm278_vm3, %v5357_v1  ;;  %v250_v22 = vld [vmem:[%s5478_s30 + $0x70] sm:$0xff]  ;;  %v251_v23 = vld [vmem:[%s5478_s30 + $0x78] sm:$0xff] }
  0x1c   : > { %301 = vst.msk [vmem:[#allocation2 + $0xb9] sm:$0x1] %vm278_vm3, %v5357_v1  ;;  %302 = vst.msk [vmem:[#allocation2 + $0xd1] sm:$0x1] %vm278_vm3, %v5357_v1  ;;  %v252_v24 = vld [vmem:[%s5478_s30 + $0x80] sm:$0xff]  ;;  %v253_v25 = vld [vmem:[%s5478_s30 + $0x88] sm:$0xff] }
  0x1d   : > { %303 = vst.msk [vmem:[#allocation2 + $0xe9] sm:$0x1] %vm278_vm3, %v5357_v1  ;;  %304 = vst.msk [vmem:[#allocation2 + $0x101] sm:$0x1] %vm278_vm3, %v5357_v1  ;;  %v254_v26 = vld [vmem:[%s5478_s30 + $0x90] sm:$0xff]  ;;  %v255_v27 = vld [vmem:[%s5478_s30 + $0x98] sm:$0xff] }
  0x1e   : > { %305 = vst.msk [vmem:[#allocation2 + $0x119] sm:$0x1] %vm278_vm3, %v5357_v1  ;;  %306 = vst.msk [vmem:[#allocation2 + $0x131] sm:$0x1] %vm278_vm3, %v5357_v1  ;;  %v256_v28 = vld [vmem:[%s5478_s30 + $0xa0] sm:$0xff]  ;;  %v257_v29 = vld [vmem:[%s5478_s30 + $0xa8] sm:$0xff] }
  0x1f   : > { %307 = vst.msk [vmem:[#allocation2 + $0x149] sm:$0x1] %vm278_vm3, %v5357_v1  ;;  %308 = vst.msk [vmem:[#allocation2 + $0x161] sm:$0x1] %vm278_vm3, %v5357_v1  ;;  %v5542_v33 = vld [vmem:[%s6407_s3 + $0x18] sm:$0xf] }
  0x20   : > { %309 = vst.msk [vmem:[#allocation2 + $0x179] sm:$0x1] %vm278_vm3, %v5357_v1  ;;  %310 = vst.msk [vmem:[#allocation2 + $0x191] sm:$0x1] %vm278_vm3, %v5357_v1  ;;  %v258_v38 = vld [vmem:[%s5478_s30 + $0xb0] sm:$0xff]  ;;  %v259_v39 = vld [vmem:[%s5478_s30 + $0xb8] sm:$0xff] }
  0x21   : > { %311 = vst.msk [vmem:[#allocation2 + $0x19] sm:$0xff] %vm268_vm1, %v236_v5  ;;  %312 = vst.msk [vmem:[#allocation2 + $0x21] sm:$0xff] %vm268_vm1, %v237_v6  ;;  %v260_v40 = vld [vmem:[%s5478_s30 + $0xc0] sm:$0xff]  ;;  %v261_v42 = vld [vmem:[%s5478_s30 + $0xc8] sm:$0xff] }
  0x22   : > { %313 = vst.msk [vmem:[#allocation2 + $0x31] sm:$0xff] %vm268_vm1, %v238_v7  ;;  %314 = vst.msk [vmem:[#allocation2 + $0x39] sm:$0xff] %vm268_vm1, %v239_v11  ;;  %v262_v44 = vld [vmem:[%s5478_s30 + $0xd0] sm:$0xff]  ;;  %v263_v45 = vld [vmem:[%s5478_s30 + $0xd8] sm:$0xff] }
  0x23   : > { %315 = vst.msk [vmem:[#allocation2 + $0x49] sm:$0xff] %vm268_vm1, %v240_v12  ;;  %316 = vst.msk [vmem:[#allocation2 + $0x51] sm:$0xff] %vm268_vm1, %v241_v13  ;;  %v264_v46 = vld [vmem:[%s5478_s30 + $0xe0] sm:$0xff]  ;;  %v265_v47 = vld [vmem:[%s5478_s30 + $0xe8] sm:$0xff] }
  0x24   : > { %317 = vst.msk [vmem:[#allocation2 + $0x61] sm:$0xff] %vm268_vm1, %v242_v14  ;;  %318 = vst.msk [vmem:[#allocation2 + $0x69] sm:$0xff] %vm268_vm1, %v243_v15  ;;  %v266_v57 = vld [vmem:[%s5478_s30 + $0xf0] sm:$0xff]  ;;  %v267_v58 = vld [vmem:[%s5478_s30 + $0xf8] sm:$0xff] }
  0x25   : > { %319 = vst.msk [vmem:[#allocation2 + $0x79] sm:$0xff] %vm268_vm1, %v244_v16  ;;  %320 = vst.msk [vmem:[#allocation2 + $0x81] sm:$0xff] %vm268_vm1, %v245_v17  ;;  %v5671_v63 = vld [vmem:[%s6407_s3 + $0x1c] sm:$0xf] }
  0x26   : > { %321 = vst.msk [vmem:[#allocation2 + $0x91] sm:$0xff] %vm268_vm1, %v246_v18  ;;  %322 = vst.msk [vmem:[#allocation2 + $0x99] sm:$0xff] %vm268_vm1, %v247_v19 }
  0x27   : > { %323 = vst.msk [vmem:[#allocation2 + $0xa9] sm:$0xff] %vm268_vm1, %v248_v20  ;;  %324 = vst.msk [vmem:[#allocation2 + $0xb1] sm:$0xff] %vm268_vm1, %v249_v21 }
  0x28   : > { %325 = vst.msk [vmem:[#allocation2 + $0xc1] sm:$0xff] %vm268_vm1, %v250_v22  ;;  %326 = vst.msk [vmem:[#allocation2 + $0xc9] sm:$0xff] %vm268_vm1, %v251_v23  ;;  %v378_v30 = vld [vmem:[#allocation2 + $0x19] sm:$0xff]  ;;  %v379_v31 = vld [vmem:[#allocation2 + $0x21] sm:$0xff] }
  0x29   : > { %327 = vst.msk [vmem:[#allocation2 + $0xd9] sm:$0xff] %vm268_vm1, %v252_v24  ;;  %328 = vst.msk [vmem:[#allocation2 + $0xe1] sm:$0xff] %vm268_vm1, %v253_v25  ;;  %v5532_v32 = vld [vmem:[#allocation2 + $0x31] sm:$0xff]  ;;  %4637 = vmatprep.mubr.msk.f32.mxu1 %vm268_vm1, %v378_v30  ;;  %4834 = vmatprep.mubr.msk.f32.mxu0 %vm268_vm1, %v378_v30  ;;  %v5550_v34 = vld [vmem:[#allocation2 + $0x39] sm:$0xff] }
  0x2a   : > { %329 = vst.msk [vmem:[#allocation2 + $0xf1] sm:$0xff] %vm268_vm1, %v254_v26  ;;  %330 = vst.msk [vmem:[#allocation2 + $0xf9] sm:$0xff] %vm268_vm1, %v255_v27  ;;  %4638 = vmatmul.mubr.msk.f32.gmra.mrb[2].mxu1 %vm268_vm1, %v379_v31  ;;  %4835 = vmatmul.mubr.msk.f32.vlgmr.msra.gmra.mrb[0].mxu0 %vm268_vm1, %v379_v31  ;;  %v5554_v35 = vld [vmem:[#allocation2 + $0x49] sm:$0xff]  ;;  %v5566_v36 = vld [vmem:[#allocation2 + $0x51] sm:$0xff] }
  0x2b   : > { %331 = vst.msk [vmem:[#allocation2 + $0x109] sm:$0xff] %vm268_vm1, %v256_v28  ;;  %332 = vst.msk [vmem:[#allocation2 + $0x111] sm:$0xff] %vm268_vm1, %v257_v29  ;;  %4883 = vmatpush3.msk.msra.mxu0 %vm506_vm0, %v5426_v4  ;;  %4640 = vmatprep.mubr.msk.f32.mxu1 %vm268_vm1, %v5532_v32  ;;  %v5568_v37 = vld [vmem:[#allocation2 + $0x61] sm:$0xff]  ;;  %v5582_v41 = vld [vmem:[#allocation2 + $0x69] sm:$0xff] }
  0x2c   : > { %4837 = vmatprep.mubr.msk.f32.mxu0 %vm268_vm1, %v5532_v32  ;;  %4932 = vmatprep.subr.msk.mxu0 %vm506_vm0, %v5542_v33  ;;  %333 = vst.msk [vmem:[#allocation2 + $0x121] sm:$0xff] %vm268_vm1, %v258_v38  ;;  %334 = vst.msk [vmem:[#allocation2 + $0x129] sm:$0xff] %vm268_vm1, %v259_v39  ;;  %v5587_v43 = vld [vmem:[#allocation2 + $0x79] sm:$0xff]  ;;  %v5605_v48 = vld [vmem:[#allocation2 + $0x81] sm:$0xff] }
  0x2d   : > { %335 = vst.msk [vmem:[#allocation2 + $0x139] sm:$0xff] %vm268_vm1, %v260_v40  ;;  %336 = vst.msk [vmem:[#allocation2 + $0x141] sm:$0xff] %vm268_vm1, %v261_v42  ;;  %v5608_v49 = vld [vmem:[#allocation2 + $0x91] sm:$0xff]  ;;  %v5618_v50 = vld [vmem:[#allocation2 + $0x99] sm:$0xff] }
  0x2e   : > { %4641 = vmatmul.mubr.msk.f32.gmra.mrb[4].mxu1 %vm268_vm1, %v5550_v34  ;;  %4838 = vmatmul.mubr.msk.f32.gmra.mrb[2].mxu0 %vm268_vm1, %v5550_v34  ;;  %337 = vst.msk [vmem:[#allocation2 + $0x151] sm:$0xff] %vm268_vm1, %v262_v44  ;;  %338 = vst.msk [vmem:[#allocation2 + $0x159] sm:$0xff] %vm268_vm1, %v263_v45  ;;  %v5620_v51 = vld [vmem:[#allocation2 + $0xa9] sm:$0xff]  ;;  %v5630_v52 = vld [vmem:[#allocation2 + $0xb1] sm:$0xff] }
  0x2f   : > { %4643 = vmatprep.mubr.msk.f32.mxu1 %vm268_vm1, %v5554_v35  ;;  %4840 = vmatprep.mubr.msk.f32.mxu0 %vm268_vm1, %v5554_v35  ;;  %339 = vst.msk [vmem:[#allocation2 + $0x169] sm:$0xff] %vm268_vm1, %v264_v46  ;;  %340 = vst.msk [vmem:[#allocation2 + $0x171] sm:$0xff] %vm268_vm1, %v265_v47  ;;  %v5632_v53 = vld [vmem:[#allocation2 + $0xc1] sm:$0xff]  ;;  %v5642_v54 = vld [vmem:[#allocation2 + $0xc9] sm:$0xff] }
  0x30   : > { %6455 = vst [vmem:[#allocation3_spill] sm:$0xff] %v5642_v54  ;;  %v5644_v55 = vld [vmem:[#allocation2 + $0x1a] sm:$0xff]  ;;  %341 = vst.msk [vmem:[#allocation2 + $0x181] sm:$0xff] %vm268_vm1, %v266_v57  ;;  %v5662_v60 = vld [vmem:[#allocation2 + $0x22] sm:$0xff] }
  0x31   : > { %v5646_v56 = vld [vmem:[#allocation2 + $0xd9] sm:$0xff]  ;;  %342 = vst.msk [vmem:[#allocation2 + $0x189] sm:$0xff] %vm268_vm1, %v267_v58  ;;  %v5660_v59 = vld [vmem:[#allocation2 + $0xe1] sm:$0xff]  ;;  %v5664_v61 = vld [vmem:[#allocation2 + $0xf1] sm:$0xff] }
  0x32   : > { %4644 = vmatmul.mubr.msk.f32.gmra.mrb[6].mxu1 %vm268_vm1, %v5566_v36  ;;  %4841 = vmatmul.mubr.msk.f32.gmra.mrb[4].mxu0 %vm268_vm1, %v5566_v36  ;;  %6456 = vst [vmem:[#allocation4_spill] sm:$0xff] %v5646_v56  ;;  %6457 = vst [vmem:[#allocation5_spill] sm:$0xff] %v5660_v59  ;;  %v5666_v62 = vld [vmem:[#allocation2 + $0x32] sm:$0xff]  ;;  %v5683_v1 = vld [vmem:[#allocation2 + $0x3a] sm:$0xff] }
  0x33   : > { %4646 = vmatprep.mubr.msk.f32.mxu1 %vm268_vm1, %v5568_v37  ;;  %4843 = vmatprep.mubr.msk.f32.mxu0 %vm268_vm1, %v5568_v37  ;;  %6458 = vst [vmem:[#allocation6_spill] sm:$0xff] %v5664_v61  ;;  %v5681_v0 = vld [vmem:[#allocation2 + $0xf9] sm:$0xff]  ;;  %v5687_v3 = vld [vmem:[#allocation2 + $0x109] sm:$0xff]  ;;  %v5701_v5 = vld [vmem:[#allocation2 + $0x111] sm:$0xff] }
  0x34   : > { %6459 = vst [vmem:[#allocation7_spill] sm:$0xff] %v5681_v0  ;;  %6460 = vst [vmem:[#allocation8_spill] sm:$0xff] %v5687_v3  ;;  %v5689_v4 = vld [vmem:[#allocation2 + $0x4a] sm:$0xff]  ;;  %v5703_v6 = vld [vmem:[#allocation2 + $0x52] sm:$0xff] }
  0x35   : > { %6461 = vst [vmem:[#allocation9_spill] sm:$0xff] %v5701_v5  ;;  %v5705_v7 = vld [vmem:[#allocation2 + $0x121] sm:$0xff]  ;;  %v5717_v10 = vld [vmem:[#allocation2 + $0x129] sm:$0xff]  ;;  %v5721_v12 = vld [vmem:[#allocation2 + $0x139] sm:$0xff] }
  0x36   : > { %4647 = vmatmul.mubr.msk.f32.gmra.mrb[8].mxu1 %vm268_vm1, %v5582_v41  ;;  %4844 = vmatmul.mubr.msk.f32.gmra.mrb[6].mxu0 %vm268_vm1, %v5582_v41  ;;  %6462 = vst [vmem:[#allocation10_spill] sm:$0xff] %v5705_v7  ;;  %v5707_v9 = vld [vmem:[#allocation2 + $0x62] sm:$0xff]  ;;  %6463 = vst [vmem:[#allocation11_spill] sm:$0xff] %v5717_v10  ;;  %v5719_v11 = vld [vmem:[#allocation2 + $0x6a] sm:$0xff] }
  0x37   : > { %4649 = vmatprep.mubr.msk.f32.mxu1 %vm268_vm1, %v5587_v43  ;;  %4846 = vmatprep.mubr.msk.f32.mxu0 %vm268_vm1, %v5587_v43  ;;  %6464 = vst [vmem:[#allocation12_spill] sm:$0xff] %v5721_v12  ;;  %v5723_v13 = vld [vmem:[#allocation2 + $0x7a] sm:$0xff]  ;;  %v5735_v15 = vld [vmem:[#allocation2 + $0x82] sm:$0xff]  ;;  %v5737_v16 = vld [vmem:[#allocation2 + $0x151] sm:$0xff] }
  0x38   : > { %v5733_v14 = vld [vmem:[#allocation2 + $0x141] sm:$0xff]  ;;  %6466 = vst [vmem:[#allocation14_spill] sm:$0xff] %v5737_v16  ;;  %v5739_v17 = vld [vmem:[#allocation2 + $0x92] sm:$0xff]  ;;  %v5753_v20 = vld [vmem:[#allocation2 + $0x169] sm:$0xff] }
  0x39   : > { %6465 = vst [vmem:[#allocation13_spill] sm:$0xff] %v5733_v14  ;;  %v5749_v18 = vld [vmem:[#allocation2 + $0x159] sm:$0xff]  ;;  %6468 = vst [vmem:[#allocation16_spill] sm:$0xff] %v5753_v20  ;;  %v5755_v21 = vld [vmem:[#allocation2 + $0xaa] sm:$0xff] }
  0x3a   : > { %4650 = vmatmul.mubr.msk.f32.gmra.mrb[10].mxu1 %vm268_vm1, %v5605_v48  ;;  %4847 = vmatmul.mubr.msk.f32.gmra.mrb[8].mxu0 %vm268_vm1, %v5605_v48  ;;  %6467 = vst [vmem:[#allocation15_spill] sm:$0xff] %v5749_v18  ;;  %v5751_v19 = vld [vmem:[#allocation2 + $0x9a] sm:$0xff]  ;;  %v5765_v22 = vld [vmem:[#allocation2 + $0x171] sm:$0xff]  ;;  %v5769_v25 = vld [vmem:[#allocation2 + $0xc2] sm:$0xff] }
  0x3b   : > { %4652 = vmatprep.mubr.msk.f32.mxu1 %vm268_vm1, %v5608_v49  ;;  %4849 = vmatprep.mubr.msk.f32.mxu0 %vm268_vm1, %v5608_v49  ;;  %6469 = vst [vmem:[#allocation17_spill] sm:$0xff] %v5765_v22  ;;  %v5767_v23 = vld [vmem:[#allocation2 + $0xb2] sm:$0xff]  ;;  %v343_v24 = vld [vmem:[#allocation2] sm:$0xff]  ;;  %v344_v26 = vld [vmem:[#allocation2 + $0x8] sm:$0xff] }
  0x3c   : > { %v5778_v27 = vld [vmem:[#allocation2 + $0xca] sm:$0xff]  ;;  %v5780_v28 = vld [vmem:[#allocation2 + $0x18] sm:$0xff]  ;;  %v5796_v31 = vld [vmem:[#allocation2 + $0x20] sm:$0xff] }
  0x3d   : > { %6470 = vst [vmem:[#allocation18_spill] sm:$0xff] %v5780_v28  ;;  %v5782_v29 = vld [vmem:[#allocation2 + $0xda] sm:$0xff]  ;;  %v5790_v30 = vld [vmem:[%s6407_s3 + $0xc] sm:$0xf]  ;;  %6471 = vst [vmem:[#allocation19_spill] sm:$0xff] %v5796_v31 }
  0x3e   : > { %4653 = vmatmul.mubr.msk.f32.gmra.mrb[12].mxu1 %vm268_vm1, %v5618_v50  ;;  %4850 = vmatmul.mubr.msk.f32.gmra.mrb[10].mxu0 %vm268_vm1, %v5618_v50  ;;  %v5802_v38 = vld [vmem:[#allocation2 + $0x30] sm:$0xff]  ;;  %v5818_v40 = vld [vmem:[#allocation2 + $0xfa] sm:$0xff]  ;;  %v5820_v42 = vld [vmem:[#allocation2 + $0x48] sm:$0xff] }
  0x3f   : > { %4655 = vmatprep.mubr.msk.f32.mxu1 %vm268_vm1, %v5620_v51  ;;  %4852 = vmatprep.mubr.msk.f32.mxu0 %vm268_vm1, %v5620_v51  ;;  %6472 = vst [vmem:[#allocation20_spill] sm:$0xff] %v5802_v38  ;;  %v5804_v39 = vld [vmem:[#allocation2 + $0xf2] sm:$0xff]  ;;  %6474 = vst [vmem:[#allocation22_spill] sm:$0xff] %v5820_v42  ;;  %v5822_v44 = vld [vmem:[#allocation2 + $0x10a] sm:$0xff] }
  0x40   : > { %v5832_v45 = vld [vmem:[#allocation2 + $0x50] sm:$0xff]  ;;  %v5836_v47 = vld [vmem:[#allocation2 + $0x60] sm:$0xff]  ;;  %v5848_v58 = vld [vmem:[#allocation2 + $0x68] sm:$0xff] }
  0x41   : > { %6475 = vst [vmem:[#allocation23_spill] sm:$0xff] %v5832_v45  ;;  %v5834_v46 = vld [vmem:[#allocation2 + $0x112] sm:$0xff]  ;;  %6476 = vst [vmem:[#allocation24_spill] sm:$0xff] %v5836_v47  ;;  %v5838_v57 = vld [vmem:[#allocation2 + $0x122] sm:$0xff] }
  0x42   : > { %4656 = vmatmul.mubr.msk.f32.gmra.mrb[14].mxu1 %vm268_vm1, %v5630_v52  ;;  %4853 = vmatmul.mubr.msk.f32.gmra.mrb[12].mxu0 %vm268_vm1, %v5630_v52  ;;  %6477 = vst [vmem:[#allocation25_spill] sm:$0xff] %v5848_v58 }
  0x43   : > { %4658 = vmatprep.mubr.msk.f32.mxu1 %vm268_vm1, %v5632_v53  ;;  %4855 = vmatprep.mubr.msk.f32.mxu0 %vm268_vm1, %v5632_v53 }
  0x46   : > { %4659 = vmatmul.mubr.msk.f32.gmra.mrb[16].mxu1 %vm268_vm1, %v5642_v54  ;;  %4856 = vmatmul.mubr.msk.f32.gmra.mrb[14].mxu0 %vm268_vm1, %v5642_v54  ;;  %v5926_v54 = vld [vmem:[#allocation2 + $0xe0] sm:$0xff] }
  0x47   : > { %4661 = vmatprep.mubr.msk.f32.mxu1 %vm268_vm1, %v5646_v56  ;;  %4884 = vmatprep.mubr.msk.f32.mxu0 %vm268_vm1, %v5644_v55  ;;  %v5914_v56 = vld [vmem:[#allocation2 + $0x18a] sm:$0xff] }
  0x48   : > { %6485 = vst [vmem:[#allocation33_spill] sm:$0xff] %v5914_v56 }
  0x4a   : > { %4662 = vmatmul.mubr.msk.f32.gmra.mrb[18].mxu1 %vm268_vm1, %v5660_v59  ;;  %4885 = vmatmul.mubr.msk.f32.vlgmr.msra.gmra.mrb[0].mxu0 %vm268_vm1, %v5662_v60  ;;  %v5902_v59 = vld [vmem:[#allocation2 + $0x182] sm:$0xff] }
  0x4b   : > { %4933 = vmatpush3.msk.msra.mxu0 %vm506_vm0, %v5542_v33  ;;  %4664 = vmatprep.mubr.msk.f32.mxu1 %vm268_vm1, %v5664_v61  ;;  %v5798_v33 = vld [vmem:[#allocation2 + $0xe2] sm:$0xff]  ;;  %6484 = vst [vmem:[#allocation32_spill] sm:$0xff] %v5902_v59 }
  0x4c   : > { %4887 = vmatprep.mubr.msk.f32.mxu0 %vm268_vm1, %v5666_v62  ;;  %4982 = vmatprep.subr.msk.mxu0 %vm506_vm0, %v5671_v63  ;;  %v5900_v61 = vld [vmem:[#allocation2 + $0xc0] sm:$0xff] }
  0x4e   : > { %4665 = vmatmul.mubr.msk.f32.gmra.mrb[20].mxu1 %vm268_vm1, %v5681_v0  ;;  %4888 = vmatmul.mubr.msk.f32.gmra.mrb[2].mxu0 %vm268_vm1, %v5683_v1  ;;  %v5898_v0 = vld [vmem:[#allocation2 + $0x172] sm:$0xff] }
  0x4f   : > { %4667 = vmatprep.mubr.msk.f32.mxu1 %vm268_vm1, %v5687_v3  ;;  %4890 = vmatprep.mubr.msk.f32.mxu0 %vm268_vm1, %v5689_v4  ;;  %v5896_v3 = vld [vmem:[#allocation2 + $0xb0] sm:$0xff]  ;;  %6483 = vst [vmem:[#allocation31_spill] sm:$0xff] %v5898_v0 }
  0x50   : > { %6482 = vst [vmem:[#allocation30_spill] sm:$0xff] %v5896_v3 }
  0x52   : > { %4668 = vmatmul.mubr.msk.f32.gmra.mrb[22].mxu1 %vm268_vm1, %v5701_v5  ;;  %4891 = vmatmul.mubr.msk.f32.gmra.mrb[4].mxu0 %vm268_vm1, %v5703_v6  ;;  %v5886_v5 = vld [vmem:[#allocation2 + $0x16a] sm:$0xff] }
  0x53   : > { %4670 = vmatprep.mubr.msk.f32.mxu1 %vm268_vm1, %v5705_v7  ;;  %4893 = vmatprep.mubr.msk.f32.mxu0 %vm268_vm1, %v5707_v9  ;;  %v5884_v7 = vld [vmem:[#allocation2 + $0xa8] sm:$0xff] }
  0x56   : > { %4671 = vmatmul.mubr.msk.f32.gmra.mrb[24].mxu1 %vm268_vm1, %v5717_v10  ;;  %4894 = vmatmul.mubr.msk.f32.gmra.mrb[6].mxu0 %vm268_vm1, %v5719_v11  ;;  %v5882_v10 = vld [vmem:[#allocation2 + $0x15a] sm:$0xff] }
  0x57   : > { %4673 = vmatprep.mubr.msk.f32.mxu1 %vm268_vm1, %v5721_v12  ;;  %4896 = vmatprep.mubr.msk.f32.mxu0 %vm268_vm1, %v5723_v13  ;;  %v5880_v12 = vld [vmem:[#allocation2 + $0x98] sm:$0xff] }
  0x58   : > { %6481 = vst [vmem:[#allocation29_spill] sm:$0xff] %v5880_v12 }
  0x5a   : > { %4674 = vmatmul.mubr.msk.f32.gmra.mrb[26].mxu1 %vm268_vm1, %v5733_v14  ;;  %4897 = vmatmul.mubr.msk.f32.gmra.mrb[8].mxu0 %vm268_vm1, %v5735_v15  ;;  %v5870_v14 = vld [vmem:[#allocation2 + $0x152] sm:$0xff] }
  0x5b   : > { %4676 = vmatprep.mubr.msk.f32.mxu1 %vm268_vm1, %v5737_v16  ;;  %4899 = vmatprep.mubr.msk.f32.mxu0 %vm268_vm1, %v5739_v17  ;;  %v5868_v16 = vld [vmem:[#allocation2 + $0x90] sm:$0xff] }
  0x5c   : > { %6480 = vst [vmem:[#allocation28_spill] sm:$0xff] %v5868_v16 }
  0x5e   : > { %4677 = vmatmul.mubr.msk.f32.gmra.mrb[28].mxu1 %vm268_vm1, %v5749_v18  ;;  %4900 = vmatmul.mubr.msk.f32.gmra.mrb[10].mxu0 %vm268_vm1, %v5751_v19  ;;  %v5866_v18 = vld [vmem:[#allocation2 + $0x142] sm:$0xff] }
  0x5f   : > { %4679 = vmatprep.mubr.msk.f32.mxu1 %vm268_vm1, %v5753_v20  ;;  %4902 = vmatprep.mubr.msk.f32.mxu0 %vm268_vm1, %v5755_v21  ;;  %v5864_v20 = vld [vmem:[#allocation2 + $0x80] sm:$0xff] }
  0x60   : > { %6479 = vst [vmem:[#allocation27_spill] sm:$0xff] %v5864_v20 }
  0x62   : > { %4680 = vmatmul.mubr.msk.f32.gmra.mrb[30].mxu1 %vm268_vm1, %v5765_v22  ;;  %4903 = vmatmul.mubr.msk.f32.gmra.mrb[12].mxu0 %vm268_vm1, %v5767_v23  ;;  %v5854_v22 = vld [vmem:[#allocation2 + $0x13a] sm:$0xff] }
  0x63   : > { %4684 = vmatprep.mubr.msk.f32.mxu1 %vm268_vm1, %v343_v24  ;;  %4905 = vmatprep.mubr.msk.f32.mxu0 %vm268_vm1, %v5769_v25  ;;  %v5850_v24 = vld [vmem:[#allocation2 + $0x12a] sm:$0xff] }
  0x66   : > { %4685 = vmatmul.mubr.msk.f32.vlgmr.msra.gmra.mrb[0].mxu1 %vm268_vm1, %v344_v26  ;;  %4906 = vmatmul.mubr.msk.f32.gmra.mrb[14].mxu0 %vm268_vm1, %v5778_v27  ;;  %v5852_v26 = vld [vmem:[#allocation2 + $0x78] sm:$0xff] }
  0x67   : > { %4687 = vmatprep.mubr.msk.f32.mxu1 %vm268_vm1, %v5780_v28  ;;  %4908 = vmatprep.mubr.msk.f32.mxu0 %vm268_vm1, %v5782_v29  ;;  %6478 = vst [vmem:[#allocation26_spill] sm:$0xff] %v5852_v26  ;;  %v5916_v28 = vld [vmem:[#allocation2 + $0xd8] sm:$0xff] }
  0x68   : > { %4733 = vmatpush3.msk.msra.mxu1 %vm506_vm0, %v5486_v8  ;;  %v5816_v8 = vld [vmem:[#allocation2 + $0x38] sm:$0xff] }
  0x69   : > { %4782 = vmatprep.subr.msk.mxu1 %vm506_vm0, %v5790_v30  ;;  %6473 = vst [vmem:[#allocation21_spill] sm:$0xff] %v5816_v8 }
  0x6a   : > { %4688 = vmatmul.mubr.msk.f32.gmra.mrb[2].mxu1 %vm268_vm1, %v5796_v31  ;;  %4909 = vmatmul.mubr.msk.f32.gmra.mrb[16].mxu0 %vm268_vm1, %v5798_v33  ;;  %v5912_v31 = vld [vmem:[#allocation2 + $0xc8] sm:$0xff] }
  0x6b   : > { %4690 = vmatprep.mubr.msk.f32.mxu1 %vm268_vm1, %v5802_v38  ;;  %4911 = vmatprep.mubr.msk.f32.mxu0 %vm268_vm1, %v5804_v39 }
  0x6e   : > { %4691 = vmatmul.mubr.msk.f32.gmra.mrb[4].mxu1 %vm268_vm1, %v5816_v8  ;;  %4912 = vmatmul.mubr.msk.f32.gmra.mrb[18].mxu0 %vm268_vm1, %v5818_v40 }
  0x6f   : > { %4693 = vmatprep.mubr.msk.f32.mxu1 %vm268_vm1, %v5820_v42  ;;  %4914 = vmatprep.mubr.msk.f32.mxu0 %vm268_vm1, %v5822_v44 }
  0x72   : > { %4694 = vmatmul.mubr.msk.f32.gmra.mrb[6].mxu1 %vm268_vm1, %v5832_v45  ;;  %4915 = vmatmul.mubr.msk.f32.gmra.mrb[20].mxu0 %vm268_vm1, %v5834_v46 }
  0x73   : > { %4696 = vmatprep.mubr.msk.f32.mxu1 %vm268_vm1, %v5836_v47  ;;  %4917 = vmatprep.mubr.msk.f32.mxu0 %vm268_vm1, %v5838_v57 }
  0x76   : > { %4697 = vmatmul.mubr.msk.f32.gmra.mrb[8].mxu1 %vm268_vm1, %v5848_v58  ;;  %4918 = vmatmul.mubr.msk.f32.gmra.mrb[22].mxu0 %vm268_vm1, %v5850_v24 }
  0x77   : > { %4699 = vmatprep.mubr.msk.f32.mxu1 %vm268_vm1, %v5852_v26  ;;  %4920 = vmatprep.mubr.msk.f32.mxu0 %vm268_vm1, %v5854_v22 }
  0x7a   : > { %4700 = vmatmul.mubr.msk.f32.gmra.mrb[10].mxu1 %vm268_vm1, %v5864_v20  ;;  %4921 = vmatmul.mubr.msk.f32.gmra.mrb[24].mxu0 %vm268_vm1, %v5866_v18 }
  0x7b   : > { %4702 = vmatprep.mubr.msk.f32.mxu1 %vm268_vm1, %v5868_v16  ;;  %4923 = vmatprep.mubr.msk.f32.mxu0 %vm268_vm1, %v5870_v14 }
  0x7e   : > { %4703 = vmatmul.mubr.msk.f32.gmra.mrb[12].mxu1 %vm268_vm1, %v5880_v12  ;;  %4924 = vmatmul.mubr.msk.f32.gmra.mrb[26].mxu0 %vm268_vm1, %v5882_v10 }
  0x7f   : > { %4705 = vmatprep.mubr.msk.f32.mxu1 %vm268_vm1, %v5884_v7  ;;  %4926 = vmatprep.mubr.msk.f32.mxu0 %vm268_vm1, %v5886_v5 }
  0x82   : > { %4706 = vmatmul.mubr.msk.f32.gmra.mrb[14].mxu1 %vm268_vm1, %v5896_v3  ;;  %4927 = vmatmul.mubr.msk.f32.gmra.mrb[28].mxu0 %vm268_vm1, %v5898_v0  ;;  %v5933_v0 = vld [vmem:[%s6407_s3 + $0x20] sm:$0xf] }
  0x83   : > { %4708 = vmatprep.mubr.msk.f32.mxu1 %vm268_vm1, %v5900_v61  ;;  %4929 = vmatprep.mubr.msk.f32.mxu0 %vm268_vm1, %v5902_v59  ;;  %v5928_v59 = vld [vmem:[#allocation2 + $0xf0] sm:$0xff] }
  0x86   : > { %4709 = vmatmul.mubr.msk.f32.gmra.mrb[16].mxu1 %vm268_vm1, %v5912_v31  ;;  %4930 = vmatmul.mubr.msk.f32.gmra.mrb[30].mxu0 %vm268_vm1, %v5914_v56  ;;  %v5943_v56 = vld [vmem:[#allocation2 + $0xf8] sm:$0xff] }
  0x87   : > { %4711 = vmatprep.mubr.msk.f32.mxu1 %vm268_vm1, %v5916_v28  ;;  %4934 = vmatprep.mubr.msk.f32.mxu0 %vm268_vm1, %v5802_v38  ;;  %v5947_v38 = vld [vmem:[#allocation2 + $0x108] sm:$0xff] }
  0x8a   : > { %4712 = vmatmul.mubr.msk.f32.gmra.mrb[18].mxu1 %vm268_vm1, %v5926_v54  ;;  %4935 = vmatmul.mubr.msk.f32.vlgmr.msra.gmra.mrb[0].mxu0 %vm268_vm1, %v5816_v8  ;;  %v5973_v8 = vld [vmem:[#allocation2 + $0x138] sm:$0xff] }
  0x8b   : > { %4983 = vmatpush3.msk.msra.mxu0 %vm506_vm0, %v5671_v63  ;;  %4714 = vmatprep.mubr.msk.f32.mxu1 %vm268_vm1, %v5928_v59  ;;  %v5959_v63 = vld [vmem:[#allocation2 + $0x110] sm:$0xff] }
  0x8c   : > { %4937 = vmatprep.mubr.msk.f32.mxu0 %vm268_vm1, %v5820_v42  ;;  %5032 = vmatprep.subr.msk.mxu0 %vm506_vm0, %v5933_v0  ;;  %v5961_v42 = vld [vmem:[#allocation2 + $0x120] sm:$0xff] }
  0x8e   : > { %4715 = vmatmul.mubr.msk.f32.gmra.mrb[20].mxu1 %vm268_vm1, %v5943_v56  ;;  %4938 = vmatmul.mubr.msk.f32.gmra.mrb[2].mxu0 %vm268_vm1, %v5832_v45  ;;  %v5971_v45 = vld [vmem:[#allocation2 + $0x128] sm:$0xff] }
  0x8f   : > { %4717 = vmatprep.mubr.msk.f32.mxu1 %vm268_vm1, %v5947_v38  ;;  %4940 = vmatprep.mubr.msk.f32.mxu0 %vm268_vm1, %v5836_v47  ;;  %v5985_v47 = vld [vmem:[#allocation2 + $0x150] sm:$0xff] }
  0x92   : > { %4718 = vmatmul.mubr.msk.f32.gmra.mrb[22].mxu1 %vm268_vm1, %v5959_v63  ;;  %4941 = vmatmul.mubr.msk.f32.gmra.mrb[4].mxu0 %vm268_vm1, %v5848_v58  ;;  %v5983_v58 = vld [vmem:[#allocation2 + $0x140] sm:$0xff] }
  0x93   : > { %4720 = vmatprep.mubr.msk.f32.mxu1 %vm268_vm1, %v5961_v42  ;;  %4943 = vmatprep.mubr.msk.f32.mxu0 %vm268_vm1, %v5852_v26  ;;  %v5997_v26 = vld [vmem:[#allocation2 + $0x168] sm:$0xff] }
  0x96   : > { %4721 = vmatmul.mubr.msk.f32.gmra.mrb[24].mxu1 %vm268_vm1, %v5971_v45  ;;  %4944 = vmatmul.mubr.msk.f32.gmra.mrb[6].mxu0 %vm268_vm1, %v5864_v20  ;;  %v5995_v20 = vld [vmem:[#allocation2 + $0x158] sm:$0xff] }
  0x97   : > { %4723 = vmatprep.mubr.msk.f32.mxu1 %vm268_vm1, %v5973_v8  ;;  %4946 = vmatprep.mubr.msk.f32.mxu0 %vm268_vm1, %v5868_v16  ;;  %v1059_v16 = vld [vmem:[#allocation2 + $0x2] sm:$0xff] }
  0x9a   : > { %4724 = vmatmul.mubr.msk.f32.gmra.mrb[26].mxu1 %vm268_vm1, %v5983_v58  ;;  %4947 = vmatmul.mubr.msk.f32.gmra.mrb[8].mxu0 %vm268_vm1, %v5880_v12  ;;  %v6007_v12 = vld [vmem:[#allocation2 + $0x170] sm:$0xff] }
  0x9b   : > { %4726 = vmatprep.mubr.msk.f32.mxu1 %vm268_vm1, %v5985_v47  ;;  %4949 = vmatprep.mubr.msk.f32.mxu0 %vm268_vm1, %v5884_v7 }
  0x9e   : > { %4727 = vmatmul.mubr.msk.f32.gmra.mrb[28].mxu1 %vm268_vm1, %v5995_v20  ;;  %4950 = vmatmul.mubr.msk.f32.gmra.mrb[10].mxu0 %vm268_vm1, %v5896_v3  ;;  %v1060_v3 = vld [vmem:[#allocation2 + $0xa] sm:$0xff] }
  0x9f   : > { %4729 = vmatprep.mubr.msk.f32.mxu1 %vm268_vm1, %v5997_v26  ;;  %4952 = vmatprep.mubr.msk.f32.mxu0 %vm268_vm1, %v5900_v61 }
  0xa2   : > { %4730 = vmatmul.mubr.msk.f32.gmra.mrb[30].mxu1 %vm268_vm1, %v6007_v12  ;;  %4953 = vmatmul.mubr.msk.f32.gmra.mrb[12].mxu0 %vm268_vm1, %v5912_v31 }
  0xa3   : > { %4734 = vmatprep.mubr.msk.f32.mxu1 %vm268_vm1, %v1059_v16  ;;  %4955 = vmatprep.mubr.msk.f32.mxu0 %vm268_vm1, %v5916_v28  ;;  %v2651_v16 = vld [vmem:[#allocation2 + $0x1a0] sm:$0xff] }
  0xa6   : > { %4735 = vmatmul.mubr.msk.f32.vlgmr.msra.gmra.mrb[0].mxu1 %vm268_vm1, %v1060_v3  ;;  %4956 = vmatmul.mubr.msk.f32.gmra.mrb[14].mxu0 %vm268_vm1, %v5926_v54  ;;  %v2650_v3 = vld [vmem:[#allocation2 + $0x198] sm:$0xff] }
  0xa7   : > { %4737 = vmatprep.mubr.msk.f32.mxu1 %vm268_vm1, %v5644_v55  ;;  %4958 = vmatprep.mubr.msk.f32.mxu0 %vm268_vm1, %v5928_v59  ;;  %v6067_v55 = vld [vmem:[#allocation2 + $0x180] sm:$0xff] }
  0xa8   : > { %4783 = vmatpush3.msk.msra.mxu1 %vm506_vm0, %v5790_v30  ;;  %v6500_v30 = vld [vmem:[#allocation24_spill] sm:$0xff] }
  0xa9   : > { %5082 = vmatprep.subr.msk.mxu1 %vm506_vm0, %v5407_v2 }
  0xaa   : > { %4738 = vmatmul.mubr.msk.f32.gmra.mrb[2].mxu1 %vm268_vm1, %v5662_v60  ;;  %4959 = vmatmul.mubr.msk.f32.gmra.mrb[16].mxu0 %vm268_vm1, %v5943_v56  ;;  %v6077_v60 = vld [vmem:[#allocation2 + $0x188] sm:$0xff] }
  0xab   : > { %4740 = vmatprep.mubr.msk.f32.mxu1 %vm268_vm1, %v5666_v62  ;;  %4961 = vmatprep.mubr.msk.f32.mxu0 %vm268_vm1, %v5947_v38 }
  0xae   : > { %4741 = vmatmul.mubr.msk.f32.gmra.mrb[4].mxu1 %vm268_vm1, %v5683_v1  ;;  %4962 = vmatmul.mubr.msk.f32.gmra.mrb[18].mxu0 %vm268_vm1, %v5959_v63 }
  0xaf   : > { %4743 = vmatprep.mubr.msk.f32.mxu1 %vm268_vm1, %v5689_v4  ;;  %4964 = vmatprep.mubr.msk.f32.mxu0 %vm268_vm1, %v5961_v42 }
  0xb2   : > { %4744 = vmatmul.mubr.msk.f32.gmra.mrb[6].mxu1 %vm268_vm1, %v5703_v6  ;;  %4965 = vmatmul.mubr.msk.f32.gmra.mrb[20].mxu0 %vm268_vm1, %v5971_v45 }
  0xb3   : > { %4746 = vmatprep.mubr.msk.f32.mxu1 %vm268_vm1, %v5707_v9  ;;  %4967 = vmatprep.mubr.msk.f32.mxu0 %vm268_vm1, %v5973_v8 }
  0xb6   : > { %4747 = vmatmul.mubr.msk.f32.gmra.mrb[8].mxu1 %vm268_vm1, %v5719_v11  ;;  %4968 = vmatmul.mubr.msk.f32.gmra.mrb[22].mxu0 %vm268_vm1, %v5983_v58 }
  0xb7   : > { %4749 = vmatprep.mubr.msk.f32.mxu1 %vm268_vm1, %v5723_v13  ;;  %4970 = vmatprep.mubr.msk.f32.mxu0 %vm268_vm1, %v5985_v47 }
  0xba   : > { %4750 = vmatmul.mubr.msk.f32.gmra.mrb[10].mxu1 %vm268_vm1, %v5735_v15  ;;  %4971 = vmatmul.mubr.msk.f32.gmra.mrb[24].mxu0 %vm268_vm1, %v5995_v20 }
  0xbb   : > { %4752 = vmatprep.mubr.msk.f32.mxu1 %vm268_vm1, %v5739_v17  ;;  %4973 = vmatprep.mubr.msk.f32.mxu0 %vm268_vm1, %v5997_v26 }
  0xbe   : > { %4753 = vmatmul.mubr.msk.f32.gmra.mrb[12].mxu1 %vm268_vm1, %v5751_v19  ;;  %4974 = vmatmul.mubr.msk.f32.gmra.mrb[26].mxu0 %vm268_vm1, %v6007_v12 }
  0xbf   : > { %4755 = vmatprep.mubr.msk.f32.mxu1 %vm268_vm1, %v5755_v21  ;;  %4976 = vmatprep.mubr.msk.f32.mxu0 %vm268_vm1, %v6067_v55 }
  0xc2   : > { %4756 = vmatmul.mubr.msk.f32.gmra.mrb[14].mxu1 %vm268_vm1, %v5767_v23  ;;  %4977 = vmatmul.mubr.msk.f32.gmra.mrb[28].mxu0 %vm268_vm1, %v6077_v60 }
  0xc3   : > { %4758 = vmatprep.mubr.msk.f32.mxu1 %vm268_vm1, %v5769_v25  ;;  %4979 = vmatprep.mubr.msk.f32.mxu0 %vm268_vm1, %v2650_v3  ;;  %v6502_v3 = vld [vmem:[#allocation25_spill] sm:$0xff] }
  0xc6   : > { %4759 = vmatmul.mubr.msk.f32.gmra.mrb[16].mxu1 %vm268_vm1, %v5778_v27  ;;  %4980 = vmatmul.mubr.msk.f32.gmra.mrb[30].mxu0 %vm268_vm1, %v2651_v16  ;;  %v6503_v16 = vld [vmem:[#allocation11_spill] sm:$0xff] }
  0xc7   : > { %4761 = vmatprep.mubr.msk.f32.mxu1 %vm268_vm1, %v5782_v29  ;;  %4984 = vmatprep.mubr.msk.f32.mxu0 %vm268_vm1, %v5532_v32  ;;  %v6486_v32 = vld [vmem:[#allocation31_spill] sm:$0xff] }
  0xca   : > { %4762 = vmatmul.mubr.msk.f32.gmra.mrb[18].mxu1 %vm268_vm1, %v5798_v33  ;;  %4985 = vmatmul.mubr.msk.f32.vlgmr.msra.gmra.mrb[0].mxu0 %vm268_vm1, %v5550_v34  ;;  %v6487_v34 = vld [vmem:[#allocation3_spill] sm:$0xff] }
  0xcb   : > { %5033 = vmatpush3.msk.msra.mxu0 %vm506_vm0, %v5933_v0  ;;  %4764 = vmatprep.mubr.msk.f32.mxu1 %vm268_vm1, %v5804_v39  ;;  %v6499_v0 = vld [vmem:[#allocation9_spill] sm:$0xff] }
  0xcc   : > { %4987 = vmatprep.mubr.msk.f32.mxu0 %vm268_vm1, %v5554_v35  ;;  %v6488_v35 = vld [vmem:[#allocation18_spill] sm:$0xff] }
  0xce   : > { %4765 = vmatmul.mubr.msk.f32.gmra.mrb[20].mxu1 %vm268_vm1, %v5818_v40  ;;  %4988 = vmatmul.mubr.msk.f32.gmra.mrb[2].mxu0 %vm268_vm1, %v5566_v36  ;;  %v6489_v36 = vld [vmem:[#allocation4_spill] sm:$0xff] }
  0xcf   : > { %4767 = vmatprep.mubr.msk.f32.mxu1 %vm268_vm1, %v5822_v44  ;;  %4990 = vmatprep.mubr.msk.f32.mxu0 %vm268_vm1, %v5568_v37  ;;  %v6490_v37 = vld [vmem:[#allocation19_spill] sm:$0xff] }
  0xd2   : > { %4768 = vmatmul.mubr.msk.f32.gmra.mrb[22].mxu1 %vm268_vm1, %v5834_v46  ;;  %4991 = vmatmul.mubr.msk.f32.gmra.mrb[4].mxu0 %vm268_vm1, %v5582_v41  ;;  %v6491_v41 = vld [vmem:[#allocation5_spill] sm:$0xff] }
  0xd3   : > { %4770 = vmatprep.mubr.msk.f32.mxu1 %vm268_vm1, %v5838_v57  ;;  %4993 = vmatprep.mubr.msk.f32.mxu0 %vm268_vm1, %v5587_v43  ;;  %v6492_v43 = vld [vmem:[#allocation20_spill] sm:$0xff] }
  0xd6   : > { %4771 = vmatmul.mubr.msk.f32.gmra.mrb[24].mxu1 %vm268_vm1, %v5850_v24  ;;  %4994 = vmatmul.mubr.msk.f32.gmra.mrb[6].mxu0 %vm268_vm1, %v5605_v48  ;;  %v6493_v48 = vld [vmem:[#allocation6_spill] sm:$0xff] }
  0xd7   : > { %4773 = vmatprep.mubr.msk.f32.mxu1 %vm268_vm1, %v5854_v22  ;;  %4996 = vmatprep.mubr.msk.f32.mxu0 %vm268_vm1, %v5608_v49  ;;  %v6494_v49 = vld [vmem:[#allocation21_spill] sm:$0xff] }
  0xda   : > { %4774 = vmatmul.mubr.msk.f32.gmra.mrb[26].mxu1 %vm268_vm1, %v5866_v18  ;;  %4997 = vmatmul.mubr.msk.f32.gmra.mrb[8].mxu0 %vm268_vm1, %v5618_v50  ;;  %v6495_v50 = vld [vmem:[#allocation7_spill] sm:$0xff] }
  0xdb   : > { %4776 = vmatprep.mubr.msk.f32.mxu1 %vm268_vm1, %v5870_v14  ;;  %4999 = vmatprep.mubr.msk.f32.mxu0 %vm268_vm1, %v5620_v51  ;;  %v6496_v51 = vld [vmem:[#allocation22_spill] sm:$0xff] }
  0xde   : > { %4777 = vmatmul.mubr.msk.f32.gmra.mrb[28].mxu1 %vm268_vm1, %v5882_v10  ;;  %5000 = vmatmul.mubr.msk.f32.gmra.mrb[10].mxu0 %vm268_vm1, %v5630_v52  ;;  %v6497_v52 = vld [vmem:[#allocation8_spill] sm:$0xff] }
  0xdf   : > { %4779 = vmatprep.mubr.msk.f32.mxu1 %vm268_vm1, %v5886_v5  ;;  %5002 = vmatprep.mubr.msk.f32.mxu0 %vm268_vm1, %v5632_v53  ;;  %v6498_v53 = vld [vmem:[#allocation23_spill] sm:$0xff] }
  0xe2   : > { %4780 = vmatmul.mubr.msk.f32.gmra.mrb[30].mxu1 %vm268_vm1, %v6486_v32  ;;  %5003 = vmatmul.mubr.msk.f32.gmra.mrb[12].mxu0 %vm268_vm1, %v6487_v34  ;;  %v6504_v34 = vld [vmem:[#allocation26_spill] sm:$0xff] }
  0xe3   : > { %4784 = vmatprep.mubr.msk.f32.mxu1 %vm268_vm1, %v6488_v35  ;;  %5005 = vmatprep.mubr.msk.f32.mxu0 %vm268_vm1, %v6489_v36  ;;  %v6505_v35 = vld [vmem:[#allocation12_spill] sm:$0xff]  ;;  %v6506_v36 = vld [vmem:[#allocation27_spill] sm:$0xff] }
  0xe6   : > { %4785 = vmatmul.mubr.msk.f32.vlgmr.msra.gmra.mrb[0].mxu1 %vm268_vm1, %v6490_v37  ;;  %5006 = vmatmul.mubr.msk.f32.gmra.mrb[14].mxu0 %vm268_vm1, %v6491_v41  ;;  %v6507_v37 = vld [vmem:[#allocation13_spill] sm:$0xff]  ;;  %v6508_v41 = vld [vmem:[#allocation28_spill] sm:$0xff] }
  0xe7   : > { %4787 = vmatprep.mubr.msk.f32.mxu1 %vm268_vm1, %v6492_v43  ;;  %5008 = vmatprep.mubr.msk.f32.mxu0 %vm268_vm1, %v6493_v48  ;;  %v6509_v43 = vld [vmem:[#allocation14_spill] sm:$0xff] }
  0xe8   : > { %5083 = vmatpush3.msk.msra.mxu1 %vm506_vm0, %v5407_v2  ;;  %v6501_v2 = vld [vmem:[#allocation10_spill] sm:$0xff] }
  0xea   : > { %4788 = vmatmul.mubr.msk.f32.gmra.mrb[2].mxu1 %vm268_vm1, %v6494_v49  ;;  %5009 = vmatmul.mubr.msk.f32.gmra.mrb[16].mxu0 %vm268_vm1, %v6495_v50  ;;  %v6510_v49 = vld [vmem:[#allocation29_spill] sm:$0xff] }
  0xeb   : > { %4790 = vmatprep.mubr.msk.f32.mxu1 %vm268_vm1, %v6496_v51  ;;  %5011 = vmatprep.mubr.msk.f32.mxu0 %vm268_vm1, %v6497_v52  ;;  %v6511_v51 = vld [vmem:[#allocation15_spill] sm:$0xff] }
  0xee   : > { %4791 = vmatmul.mubr.msk.f32.gmra.mrb[4].mxu1 %vm268_vm1, %v6498_v53  ;;  %5012 = vmatmul.mubr.msk.f32.gmra.mrb[18].mxu0 %vm268_vm1, %v6499_v0  ;;  %v6512_v53 = vld [vmem:[#allocation16_spill] sm:$0xff] }
  0xef   : > { %4793 = vmatprep.mubr.msk.f32.mxu1 %vm268_vm1, %v6500_v30  ;;  %5014 = vmatprep.mubr.msk.f32.mxu0 %vm268_vm1, %v6501_v2  ;;  %v6201_v30 = vld [vmem:[#allocation2 + $0x181] sm:$0xff] }
  0xf2   : > { %4794 = vmatmul.mubr.msk.f32.gmra.mrb[6].mxu1 %vm268_vm1, %v6502_v3  ;;  %5015 = vmatmul.mubr.msk.f32.gmra.mrb[20].mxu0 %vm268_vm1, %v6503_v16  ;;  %v6513_v3 = vld [vmem:[#allocation30_spill] sm:$0xff] }
  0xf3   : > { %4796 = vmatprep.mubr.msk.f32.mxu1 %vm268_vm1, %v6504_v34  ;;  %5017 = vmatprep.mubr.msk.f32.mxu0 %vm268_vm1, %v6505_v35  ;;  %v6514_v34 = vld [vmem:[#allocation17_spill] sm:$0xff] }
  0xf6   : > { %4797 = vmatmul.mubr.msk.f32.gmra.mrb[8].mxu1 %vm268_vm1, %v6506_v36  ;;  %5018 = vmatmul.mubr.msk.f32.gmra.mrb[22].mxu0 %vm268_vm1, %v6507_v37  ;;  %v6211_v36 = vld [vmem:[#allocation2 + $0x189] sm:$0xff] }
  0xf7   : > { %4799 = vmatprep.mubr.msk.f32.mxu1 %vm268_vm1, %v6508_v41  ;;  %5020 = vmatprep.mubr.msk.f32.mxu0 %vm268_vm1, %v6509_v43  ;;  %v3041_v41 = vld [vmem:[#allocation2 + $0x1a1] sm:$0xff] }
  0xfa   : > { %4800 = vmatmul.mubr.msk.f32.gmra.mrb[10].mxu1 %vm268_vm1, %v6510_v49  ;;  %5021 = vmatmul.mubr.msk.f32.gmra.mrb[24].mxu0 %vm268_vm1, %v6511_v51 }
  0xfb   : > { %4802 = vmatprep.mubr.msk.f32.mxu1 %vm268_vm1, %v5884_v7  ;;  %5023 = vmatprep.mubr.msk.f32.mxu0 %vm268_vm1, %v6512_v53  ;;  %v3040_v7 = vld [vmem:[#allocation2 + $0x199] sm:$0xff] }
  0xfe   : > { %4803 = vmatmul.mubr.msk.f32.gmra.mrb[12].mxu1 %vm268_vm1, %v6513_v3  ;;  %5024 = vmatmul.mubr.msk.f32.gmra.mrb[26].mxu0 %vm268_vm1, %v6514_v34 }
  0xff   : > { %4805 = vmatprep.mubr.msk.f32.mxu1 %vm268_vm1, %v5900_v61  ;;  %5026 = vmatprep.mubr.msk.f32.mxu0 %vm268_vm1, %v6201_v30  ;;  %v3430_v61 = vld [vmem:[#allocation2 + $0x19a] sm:$0xff] }
 0x102   : > { %4806 = vmatmul.mubr.msk.f32.gmra.mrb[14].mxu1 %vm268_vm1, %v5912_v31  ;;  %5027 = vmatmul.mubr.msk.f32.gmra.mrb[28].mxu0 %vm268_vm1, %v6211_v36 }
 0x103   : > { %4808 = vmatprep.mubr.msk.f32.mxu1 %vm268_vm1, %v5916_v28  ;;  %5029 = vmatprep.mubr.msk.f32.mxu0 %vm268_vm1, %v3040_v7 }
 0x106   : > { %4809 = vmatmul.mubr.msk.f32.gmra.mrb[16].mxu1 %vm268_vm1, %v5926_v54  ;;  %5030 = vmatmul.mubr.msk.f32.gmra.mrb[30].mxu0 %vm268_vm1, %v3041_v41  ;;  %v1855_v54 = vld [vmem:[#allocation2 + $0xd9] sm:$0xff] }
 0x107   : > { %4811 = vmatprep.mubr.msk.f32.mxu1 %vm268_vm1, %v5928_v59  ;;  %5034 = vmatprep.mubr.msk.f32.mxu0 %vm268_vm1, %v5666_v62  ;;  %v6515_v59 = vld [vmem:[#allocation32_spill] sm:$0xff]  ;;  %v6516_v62 = vld [vmem:[#allocation33_spill] sm:$0xff] }
 0x10a   : > { %4812 = vmatmul.mubr.msk.f32.gmra.mrb[18].mxu1 %vm268_vm1, %v5943_v56  ;;  %5035 = vmatmul.mubr.msk.f32.vlgmr.msra.gmra.mrb[0].mxu0 %vm268_vm1, %v5683_v1  ;;  %v1856_v56 = vld [vmem:[#allocation2 + $0xe1] sm:$0xff] }
 0x10b   : > { %4814 = vmatprep.mubr.msk.f32.mxu1 %vm268_vm1, %v5947_v38  ;;  %5037 = vmatprep.mubr.msk.f32.mxu0 %vm268_vm1, %v5689_v4  ;;  %v3431_v1 = vld [vmem:[#allocation2 + $0x1a2] sm:$0xff] }
 0x10e   : > { %4815 = vmatmul.mubr.msk.f32.gmra.mrb[20].mxu1 %vm268_vm1, %v5959_v63  ;;  %5038 = vmatmul.mubr.msk.f32.gmra.mrb[2].mxu0 %vm268_vm1, %v5703_v6 }
 0x10f   : > { %4817 = vmatprep.mubr.msk.f32.mxu1 %vm268_vm1, %v5961_v42  ;;  %5040 = vmatprep.mubr.msk.f32.mxu0 %vm268_vm1, %v5707_v9 }
 0x112   : > { %4818 = vmatmul.mubr.msk.f32.gmra.mrb[22].mxu1 %vm268_vm1, %v5971_v45  ;;  %5041 = vmatmul.mubr.msk.f32.gmra.mrb[4].mxu0 %vm268_vm1, %v5719_v11 }
 0x113   : > { %4820 = vmatprep.mubr.msk.f32.mxu1 %vm268_vm1, %v5973_v8  ;;  %5043 = vmatprep.mubr.msk.f32.mxu0 %vm268_vm1, %v5723_v13 }
 0x116   : > { %4821 = vmatmul.mubr.msk.f32.gmra.mrb[24].mxu1 %vm268_vm1, %v5983_v58  ;;  %5044 = vmatmul.mubr.msk.f32.gmra.mrb[6].mxu0 %vm268_vm1, %v5735_v15 }
 0x117   : > { %4823 = vmatprep.mubr.msk.f32.mxu1 %vm268_vm1, %v5985_v47  ;;  %5046 = vmatprep.mubr.msk.f32.mxu0 %vm268_vm1, %v5739_v17 }
 0x11a   : > { %4824 = vmatmul.mubr.msk.f32.gmra.mrb[26].mxu1 %vm268_vm1, %v5995_v20  ;;  %5047 = vmatmul.mubr.msk.f32.gmra.mrb[8].mxu0 %vm268_vm1, %v5751_v19 }
 0x11b   : > { %4826 = vmatprep.mubr.msk.f32.mxu1 %vm268_vm1, %v5997_v26  ;;  %5049 = vmatprep.mubr.msk.f32.mxu0 %vm268_vm1, %v5755_v21 }
 0x11e   : > { %4827 = vmatmul.mubr.msk.f32.gmra.mrb[28].mxu1 %vm268_vm1, %v6007_v12  ;;  %5050 = vmatmul.mubr.msk.f32.gmra.mrb[10].mxu0 %vm268_vm1, %v5767_v23 }
 0x11f   : > { %4829 = vmatprep.mubr.msk.f32.mxu1 %vm268_vm1, %v6067_v55  ;;  %5052 = vmatprep.mubr.msk.f32.mxu0 %vm268_vm1, %v5769_v25 }
 0x122   : > { %4830 = vmatmul.mubr.msk.f32.gmra.mrb[30].mxu1 %vm268_vm1, %v6077_v60  ;;  %5053 = vmatmul.mubr.msk.f32.gmra.mrb[12].mxu0 %vm268_vm1, %v5778_v27 }
 0x123   : > { %4858 = vmatprep.mubr.msk.f32.mxu1 %vm268_vm1, %v1855_v54  ;;  %5055 = vmatprep.mubr.msk.f32.mxu0 %vm268_vm1, %v5782_v29 }
 0x126   : > { %4859 = vmatmul.mubr.msk.f32.vlgmr.msra.gmra.mrb[16].mxu1 %vm268_vm1, %v1856_v56  ;;  %5056 = vmatmul.mubr.msk.f32.gmra.mrb[14].mxu0 %vm268_vm1, %v5798_v33 }
 0x127   : > { %4861 = vmatprep.mubr.msk.f32.mxu1 %vm268_vm1, %v6493_v48  ;;  %5058 = vmatprep.mubr.msk.f32.mxu0 %vm268_vm1, %v5804_v39 }
 0x12a   : > { %4862 = vmatmul.mubr.msk.f32.gmra.mrb[18].mxu1 %vm268_vm1, %v6495_v50  ;;  %5059 = vmatmul.mubr.msk.f32.gmra.mrb[16].mxu0 %vm268_vm1, %v5818_v40 }
 0x12b   : > { %4864 = vmatprep.mubr.msk.f32.mxu1 %vm268_vm1, %v6497_v52  ;;  %5061 = vmatprep.mubr.msk.f32.mxu0 %vm268_vm1, %v5822_v44 }
 0x12e   : > { %4865 = vmatmul.mubr.msk.f32.gmra.mrb[20].mxu1 %vm268_vm1, %v6499_v0  ;;  %5062 = vmatmul.mubr.msk.f32.gmra.mrb[18].mxu0 %vm268_vm1, %v5834_v46 }
 0x12f   : > { %4867 = vmatprep.mubr.msk.f32.mxu1 %vm268_vm1, %v6501_v2  ;;  %5064 = vmatprep.mubr.msk.f32.mxu0 %vm268_vm1, %v5838_v57 }
 0x132   : > { %4868 = vmatmul.mubr.msk.f32.gmra.mrb[22].mxu1 %vm268_vm1, %v6503_v16  ;;  %5065 = vmatmul.mubr.msk.f32.gmra.mrb[20].mxu0 %vm268_vm1, %v5850_v24 }
 0x133   : > { %4870 = vmatprep.mubr.msk.f32.mxu1 %vm268_vm1, %v6505_v35  ;;  %5067 = vmatprep.mubr.msk.f32.mxu0 %vm268_vm1, %v5854_v22 }
 0x136   : > { %4871 = vmatmul.mubr.msk.f32.gmra.mrb[24].mxu1 %vm268_vm1, %v6507_v37  ;;  %5068 = vmatmul.mubr.msk.f32.gmra.mrb[22].mxu0 %vm268_vm1, %v5866_v18 }
 0x137   : > { %4873 = vmatprep.mubr.msk.f32.mxu1 %vm268_vm1, %v6509_v43  ;;  %5070 = vmatprep.mubr.msk.f32.mxu0 %vm268_vm1, %v5870_v14 }
 0x13a   : > { %4874 = vmatmul.mubr.msk.f32.gmra.mrb[26].mxu1 %vm268_vm1, %v6511_v51  ;;  %5071 = vmatmul.mubr.msk.f32.gmra.mrb[24].mxu0 %vm268_vm1, %v5882_v10 }
 0x13b   : > { %4876 = vmatprep.mubr.msk.f32.mxu1 %vm268_vm1, %v6512_v53  ;;  %5073 = vmatprep.mubr.msk.f32.mxu0 %vm268_vm1, %v5886_v5 }
 0x13e   : > { %4877 = vmatmul.mubr.msk.f32.gmra.mrb[28].mxu1 %vm268_vm1, %v6514_v34  ;;  %5074 = vmatmul.mubr.msk.f32.gmra.mrb[26].mxu0 %vm268_vm1, %v6486_v32 }
 0x13f   : > { %4879 = vmatprep.mubr.msk.f32.mxu1 %vm268_vm1, %v6201_v30  ;;  %5076 = vmatprep.mubr.msk.f32.mxu0 %vm268_vm1, %v6515_v59 }
 0x142   : > { %4880 = vmatmul.mubr.msk.f32.gmra.mrb[30].mxu1 %vm268_vm1, %v6211_v36  ;;  %5077 = vmatmul.mubr.msk.f32.gmra.mrb[28].mxu0 %vm268_vm1, %v6516_v62 }
 0x143   : > { %5079 = vmatprep.mubr.msk.f32.mxu0 %vm268_vm1, %v3430_v61 }
 0x146   : > { %5080 = vmatmul.mubr.msk.f32.gmra.mrb[30].mxu0 %vm268_vm1, %v3431_v1 }
 0x1b9   : > { %v4786_v4 = vpop.f32.mrb[0].mxu1 }
 0x1ba   : > { %v1648_v5 = vpop.f32.mrb[1].mxu1 }
 0x1bd   : > { %v4789_v6 = vpop.f32.mrb[2].mxu1 }
 0x1be   : > { %v1658_v9 = vpop.f32.mrb[3].mxu1 }
 0x1c1   : > { %v4792_v10 = vpop.f32.mrb[4].mxu1 }
 0x1c2   : > { %v1668_v11 = vpop.f32.mrb[5].mxu1 }
 0x1c5   : > { %v4795_v12 = vpop.f32.mrb[6].mxu1 }
 0x1c6   : > { %v1678_v13 = vpop.f32.mrb[7].mxu1 }
 0x1c9   : > { %v4798_v14 = vpop.f32.mrb[8].mxu1 }
 0x1ca   : > { %v1688_v15 = vpop.f32.mrb[9].mxu1 }
 0x1cd   : > { %v4801_v17 = vpop.f32.mrb[10].mxu1 }
 0x1ce   : > { %v6343_v18 = vpop.f32.mrb[11].mxu1 }
 0x1d1   : > { %v6345_v19 = vpop.f32.mrb[12].mxu1 }
 0x1d2   : > { %v6347_v20 = vpop.f32.mrb[13].mxu1 }
 0x1d5   : > { %v6349_v21 = vpop.f32.mrb[14].mxu1 }
 0x1d6   : > { %v6351_v22 = vpop.f32.mrb[15].mxu1 }
 0x1dd   : > { %v5036_v23 = vpop.f32.mrb[0].mxu0 }
 0x1de   : > { %v5084_v25 = vadd.f32 %v5036_v23, %v4786_v4  ;;  %v3599_v27 = vpop.f32.mrb[1].mxu0 }
 0x1df   : > { %v5085_v28 = vadd.f32 %v3599_v27, %v1648_v5 }
 0x1e0   : > { %3791 = vst [vmem:[%s6358_s2 + $0x8] sm:$0xff] %v5084_v25  ;;  %v3861_v29 = vmul.f32 %v5084_v25, %v5084_v25 }
 0x1e1   : > { %3790 = vst [vmem:[%s6358_s2] sm:$0xff] %v5085_v28  ;;  %v3822_v31 = vadd.f32 %v5085_v28, %v5084_v25  ;;  %v3860_v33 = vmul.f32 %v5085_v28, %v5085_v28  ;;  %v5039_v38 = vpop.f32.mrb[2].mxu0 }
 0x1e2   : > { %v5086_v39 = vadd.f32 %v5039_v38, %v4789_v6  ;;  %v3609_v8 = vpop.f32.mrb[3].mxu0 }
 0x1e3   : > { %v3892_v40 = vadd.f32 %v3861_v29, %v3860_v33  ;;  %v5087_v42 = vadd.f32 %v3609_v8, %v1658_v9 }
 0x1e4   : > { %3793 = vst [vmem:[%s6358_s2 + $0x18] sm:$0xff] %v5086_v39  ;;  %v3863_v58 = vmul.f32 %v5086_v39, %v5086_v39 }
 0x1e5   : > { %3792 = vst [vmem:[%s6358_s2 + $0x10] sm:$0xff] %v5087_v42  ;;  %v3823_v44 = vadd.f32 %v5087_v42, %v3822_v31  ;;  %v3862_v45 = vmul.f32 %v5087_v42, %v5087_v42  ;;  %v5042_v46 = vpop.f32.mrb[4].mxu0 }
 0x1e6   : > { %v5088_v47 = vadd.f32 %v5042_v46, %v4792_v10  ;;  %v3619_v57 = vpop.f32.mrb[5].mxu0 }
 0x1e7   : > { %v3893_v24 = vadd.f32 %v3892_v40, %v3862_v45  ;;  %v5089_v26 = vadd.f32 %v3619_v57, %v1668_v11  ;;  %v3824_v63 = vadd.f32 %v5086_v39, %v3823_v44 }
 0x1e8   : > { %3795 = vst [vmem:[%s6358_s2 + $0x28] sm:$0xff] %v5088_v47  ;;  %v3865_v0 = vmul.f32 %v5088_v47, %v5088_v47 }
 0x1e9   : > { %3794 = vst [vmem:[%s6358_s2 + $0x20] sm:$0xff] %v5089_v26  ;;  %v3825_v55 = vadd.f32 %v5089_v26, %v3824_v63  ;;  %v3864_v60 = vmul.f32 %v5089_v26, %v5089_v26  ;;  %v3894_v32 = vadd.f32 %v3893_v24, %v3863_v58  ;;  %v5045_v48 = vpop.f32.mrb[6].mxu0 }
 0x1ea   : > { %v5090_v50 = vadd.f32 %v5045_v48, %v4795_v12  ;;  %v3629_v52 = vpop.f32.mrb[7].mxu0 }
 0x1eb   : > { %v3895_v2 = vadd.f32 %v3894_v32, %v3864_v60  ;;  %v5091_v16 = vadd.f32 %v3629_v52, %v1678_v13  ;;  %v3826_v35 = vadd.f32 %v5088_v47, %v3825_v55 }
 0x1ec   : > { %3797 = vst [vmem:[%s6358_s2 + $0x38] sm:$0xff] %v5090_v50  ;;  %v3867_v3 = vmul.f32 %v5090_v50, %v5090_v50 }
 0x1ed   : > { %3796 = vst [vmem:[%s6358_s2 + $0x30] sm:$0xff] %v5091_v16  ;;  %v3827_v37 = vadd.f32 %v5091_v16, %v3826_v35  ;;  %v3866_v43 = vmul.f32 %v5091_v16, %v5091_v16  ;;  %v3896_v49 = vadd.f32 %v3895_v2, %v3865_v0  ;;  %v5048_v51 = vpop.f32.mrb[8].mxu0 }
 0x1ee   : > { %v5092_v53 = vadd.f32 %v5048_v51, %v4798_v14  ;;  %v3639_v30 = vpop.f32.mrb[9].mxu0 }
 0x1ef   : > { %v3897_v34 = vadd.f32 %v3896_v49, %v3866_v43  ;;  %v5093_v36 = vadd.f32 %v3639_v30, %v1688_v15  ;;  %v3828_v7 = vadd.f32 %v5090_v50, %v3827_v37 }
 0x1f0   : > { %3799 = vst [vmem:[%s6358_s2 + $0x48] sm:$0xff] %v5092_v53  ;;  %v3869_v1 = vmul.f32 %v5092_v53, %v5092_v53 }
 0x1f1   : > { %3798 = vst [vmem:[%s6358_s2 + $0x40] sm:$0xff] %v5093_v36  ;;  %v3829_v41 = vadd.f32 %v5093_v36, %v3828_v7  ;;  %v3868_v54 = vmul.f32 %v5093_v36, %v5093_v36  ;;  %v3898_v56 = vadd.f32 %v3897_v34, %v3867_v3  ;;  %v5051_v59 = vpop.f32.mrb[10].mxu0 }
 0x1f2   : > { %v5094_v61 = vadd.f32 %v5051_v59, %v4801_v17  ;;  %v3649_v62 = vpop.f32.mrb[11].mxu0 }
 0x1f3   : > { %v3899_v4 = vadd.f32 %v3898_v56, %v3868_v54  ;;  %v5095_v5 = vadd.f32 %v3649_v62, %v6343_v18  ;;  %v3830_v6 = vadd.f32 %v5092_v53, %v3829_v41 }
 0x1f4   : > { %3801 = vst [vmem:[%s6358_s2 + $0x58] sm:$0xff] %v5094_v61  ;;  %v3871_v15 = vmul.f32 %v5094_v61, %v5094_v61 }
 0x1f5   : > { %3800 = vst [vmem:[%s6358_s2 + $0x50] sm:$0xff] %v5095_v5  ;;  %v3831_v9 = vadd.f32 %v5095_v5, %v3830_v6  ;;  %v3870_v10 = vmul.f32 %v5095_v5, %v5095_v5  ;;  %v3900_v11 = vadd.f32 %v3899_v4, %v3869_v1  ;;  %v5054_v12 = vpop.f32.mrb[12].mxu0 }
 0x1f6   : > { %v5096_v13 = vadd.f32 %v5054_v12, %v6345_v19  ;;  %v3659_v14 = vpop.f32.mrb[13].mxu0 }
 0x1f7   : > { %v3901_v23 = vadd.f32 %v3900_v11, %v3870_v10  ;;  %v5097_v17 = vadd.f32 %v3659_v14, %v6347_v20  ;;  %v3832_v25 = vadd.f32 %v5094_v61, %v3831_v9 }
 0x1f8   : > { %3803 = vst [vmem:[%s6358_s2 + $0x68] sm:$0xff] %v5096_v13  ;;  %v3873_v19 = vmul.f32 %v5096_v13, %v5096_v13 }
 0x1f9   : > { %3802 = vst [vmem:[%s6358_s2 + $0x60] sm:$0xff] %v5097_v17  ;;  %v3833_v18 = vadd.f32 %v5097_v17, %v3832_v25  ;;  %v3872_v27 = vmul.f32 %v5097_v17, %v5097_v17  ;;  %v3902_v28 = vadd.f32 %v3901_v23, %v3871_v15  ;;  %v4860_v29 = vpop.f32.mrb[16].mxu1  ;;  %v5057_v31 = vpop.f32.mrb[14].mxu0 }
 0x1fa   : > { %v5098_v33 = vadd.f32 %v5057_v31, %v6349_v21  ;;  %v2118_v38 = vpop.f32.mrb[17].mxu1  ;;  %v3669_v39 = vpop.f32.mrb[15].mxu0 }
 0x1fb   : > { %v3903_v8 = vadd.f32 %v3902_v28, %v3872_v27  ;;  %v5099_v40 = vadd.f32 %v3669_v39, %v6351_v22  ;;  %v3834_v20 = vadd.f32 %v5096_v13, %v3833_v18 }
 0x1fc   : > { %3805 = vst [vmem:[%s6358_s2 + $0x78] sm:$0xff] %v5098_v33  ;;  %v3875_v21 = vmul.f32 %v5098_v33, %v5098_v33 }
 0x1fd   : > { %3804 = vst [vmem:[%s6358_s2 + $0x70] sm:$0xff] %v5099_v40  ;;  %v3835_v42 = vadd.f32 %v5099_v40, %v3834_v20  ;;  %v3874_v44 = vmul.f32 %v5099_v40, %v5099_v40  ;;  %v3904_v45 = vadd.f32 %v3903_v8, %v3873_v19  ;;  %v4863_v46 = vpop.f32.mrb[18].mxu1  ;;  %v5060_v47 = vpop.f32.mrb[16].mxu0 }
 0x1fe   : > { %v5100_v57 = vadd.f32 %v5060_v47, %v4860_v29  ;;  %v2128_v58 = vpop.f32.mrb[19].mxu1  ;;  %v3679_v24 = vpop.f32.mrb[17].mxu0 }
 0x1ff   : > { %v3905_v26 = vadd.f32 %v3904_v45, %v3874_v44  ;;  %v5101_v63 = vadd.f32 %v3679_v24, %v2118_v38  ;;  %v3836_v55 = vadd.f32 %v5098_v33, %v3835_v42 }
 0x200   : > { %3807 = vst [vmem:[%s6358_s2 + $0x88] sm:$0xff] %v5100_v57  ;;  %v3877_v16 = vmul.f32 %v5100_v57, %v5100_v57 }
 0x201   : > { %3806 = vst [vmem:[%s6358_s2 + $0x80] sm:$0xff] %v5101_v63  ;;  %v3837_v22 = vadd.f32 %v5101_v63, %v3836_v55  ;;  %v3876_v60 = vmul.f32 %v5101_v63, %v5101_v63  ;;  %v3906_v32 = vadd.f32 %v3905_v26, %v3875_v21  ;;  %v4866_v48 = vpop.f32.mrb[20].mxu1  ;;  %v5063_v50 = vpop.f32.mrb[18].mxu0 }
 0x202   : > { %v5102_v52 = vadd.f32 %v5063_v50, %v4863_v46  ;;  %v2138_v0 = vpop.f32.mrb[21].mxu1  ;;  %v3689_v2 = vpop.f32.mrb[19].mxu0 }
 0x203   : > { %v3907_v35 = vadd.f32 %v3906_v32, %v3876_v60  ;;  %v5103_v37 = vadd.f32 %v3689_v2, %v2128_v58  ;;  %v3838_v43 = vadd.f32 %v5100_v57, %v3837_v22 }
 0x204   : > { %3809 = vst [vmem:[%s6358_s2 + $0x98] sm:$0xff] %v5102_v52  ;;  %v3879_v41 = vmul.f32 %v5102_v52, %v5102_v52 }
 0x205   : > { %3808 = vst [vmem:[%s6358_s2 + $0x90] sm:$0xff] %v5103_v37  ;;  %v3839_v49 = vadd.f32 %v5103_v37, %v3838_v43  ;;  %v3878_v51 = vmul.f32 %v5103_v37, %v5103_v37  ;;  %v3908_v53 = vadd.f32 %v3907_v35, %v3877_v16  ;;  %v4869_v30 = vpop.f32.mrb[22].mxu1  ;;  %v5066_v3 = vpop.f32.mrb[20].mxu0 }
 0x206   : > { %v5104_v34 = vadd.f32 %v5066_v3, %v4866_v48  ;;  %v2148_v36 = vpop.f32.mrb[23].mxu1  ;;  %v3699_v7 = vpop.f32.mrb[21].mxu0 }
 0x207   : > { %v3909_v54 = vadd.f32 %v3908_v53, %v3878_v51  ;;  %v5105_v56 = vadd.f32 %v3699_v7, %v2138_v0  ;;  %v3840_v59 = vadd.f32 %v5102_v52, %v3839_v49 }
 0x208   : > { %3811 = vst [vmem:[%s6358_s2 + $0xa8] sm:$0xff] %v5104_v34  ;;  %v3881_v11 = vmul.f32 %v5104_v34, %v5104_v34 }
 0x209   : > { %3810 = vst [vmem:[%s6358_s2 + $0xa0] sm:$0xff] %v5105_v56  ;;  %v3841_v61 = vadd.f32 %v5105_v56, %v3840_v59  ;;  %v3880_v62 = vmul.f32 %v5105_v56, %v5105_v56  ;;  %v3910_v1 = vadd.f32 %v3909_v54, %v3879_v41  ;;  %v4872_v4 = vpop.f32.mrb[24].mxu1  ;;  %v5069_v5 = vpop.f32.mrb[22].mxu0 }
 0x20a   : > { %v5106_v6 = vadd.f32 %v5069_v5, %v4869_v30  ;;  %v2158_v9 = vpop.f32.mrb[25].mxu1  ;;  %v3709_v10 = vpop.f32.mrb[23].mxu0 }
 0x20b   : > { %v3911_v12 = vadd.f32 %v3910_v1, %v3880_v62  ;;  %v5107_v13 = vadd.f32 %v3709_v10, %v2148_v36  ;;  %v3842_v14 = vadd.f32 %v5104_v34, %v3841_v61 }
 0x20c   : > { %3813 = vst [vmem:[%s6358_s2 + $0xb8] sm:$0xff] %v5106_v6  ;;  %v3883_v31 = vmul.f32 %v5106_v6, %v5106_v6 }
 0x20d   : > { %3812 = vst [vmem:[%s6358_s2 + $0xb0] sm:$0xff] %v5107_v13  ;;  %v3843_v15 = vadd.f32 %v5107_v13, %v3842_v14  ;;  %v3882_v23 = vmul.f32 %v5107_v13, %v5107_v13  ;;  %v3912_v17 = vadd.f32 %v3911_v12, %v3881_v11  ;;  %v4875_v25 = vpop.f32.mrb[26].mxu1  ;;  %v5072_v18 = vpop.f32.mrb[24].mxu0 }
 0x20e   : > { %v5108_v27 = vadd.f32 %v5072_v18, %v4872_v4  ;;  %v2168_v28 = vpop.f32.mrb[27].mxu1  ;;  %v3719_v29 = vpop.f32.mrb[25].mxu0 }
 0x20f   : > { %v3913_v33 = vadd.f32 %v3912_v17, %v3882_v23  ;;  %v5109_v38 = vadd.f32 %v3719_v29, %v2158_v9  ;;  %v3844_v39 = vadd.f32 %v5106_v6, %v3843_v15 }
 0x210   : > { %3815 = vst [vmem:[%s6358_s2 + $0xc8] sm:$0xff] %v5108_v27  ;;  %v3885_v47 = vmul.f32 %v5108_v27, %v5108_v27 }
 0x211   : > { %3814 = vst [vmem:[%s6358_s2 + $0xc0] sm:$0xff] %v5109_v38  ;;  %v3845_v19 = vadd.f32 %v5109_v38, %v3844_v39  ;;  %v3884_v8 = vmul.f32 %v5109_v38, %v5109_v38  ;;  %v3914_v40 = vadd.f32 %v3913_v33, %v3883_v31  ;;  %v4878_v20 = vpop.f32.mrb[28].mxu1  ;;  %v5075_v42 = vpop.f32.mrb[26].mxu0 }
 0x212   : > { %v5110_v44 = vadd.f32 %v5075_v42, %v4875_v25  ;;  %v2178_v45 = vpop.f32.mrb[29].mxu1  ;;  %v3729_v46 = vpop.f32.mrb[27].mxu0 }
 0x213   : > { %v3915_v57 = vadd.f32 %v3914_v40, %v3884_v8  ;;  %v5111_v58 = vadd.f32 %v3729_v46, %v2168_v28  ;;  %v3846_v24 = vadd.f32 %v5108_v27, %v3845_v19 }
 0x214   : > { %3817 = vst [vmem:[%s6358_s2 + $0xd8] sm:$0xff] %v5110_v44  ;;  %v3887_v50 = vmul.f32 %v5110_v44, %v5110_v44 }
 0x215   : > { %3816 = vst [vmem:[%s6358_s2 + $0xd0] sm:$0xff] %v5111_v58  ;;  %v3847_v21 = vadd.f32 %v5111_v58, %v3846_v24  ;;  %v3886_v26 = vmul.f32 %v5111_v58, %v5111_v58  ;;  %v3916_v63 = vadd.f32 %v3915_v57, %v3885_v47  ;;  %v4881_v55 = vpop.f32.mrb[30].mxu1  ;;  %v5078_v22 = vpop.f32.mrb[28].mxu0 }
 0x216   : > { %v5112_v60 = vadd.f32 %v5078_v22, %v4878_v20  ;;  %v2188_v32 = vpop.f32.mrb[31].mxu1  ;;  %v3739_v48 = vpop.f32.mrb[29].mxu0 }
 0x217   : > { %v3917_v52 = vadd.f32 %v3916_v63, %v3886_v26  ;;  %v5113_v0 = vadd.f32 %v3739_v48, %v2178_v45  ;;  %v3848_v2 = vadd.f32 %v5110_v44, %v3847_v21 }
 0x218   : > { %3819 = vst [vmem:[%s6358_s2 + $0xe8] sm:$0xff] %v5112_v60  ;;  %v3889_v53 = vmul.f32 %v5112_v60, %v5112_v60 }
 0x219   : > { %3818 = vst [vmem:[%s6358_s2 + $0xe0] sm:$0xff] %v5113_v0  ;;  %v3849_v16 = vadd.f32 %v5113_v0, %v3848_v2  ;;  %v3888_v35 = vmul.f32 %v5113_v0, %v5113_v0  ;;  %v3918_v37 = vadd.f32 %v3917_v52, %v3887_v50  ;;  %v5081_v43 = vpop.f32.mrb[30].mxu0 }
 0x21a   : > { %v5114_v49 = vadd.f32 %v5081_v43, %v4881_v55  ;;  %v3749_v51 = vpop.f32.mrb[31].mxu0 }
 0x21b   : > { %v3919_v30 = vadd.f32 %v3918_v37, %v3888_v35  ;;  %v5115_v3 = vadd.f32 %v3749_v51, %v2188_v32  ;;  %v3850_v34 = vadd.f32 %v5112_v60, %v3849_v16 }
 0x21c   : > { %3821 = vst [vmem:[%s6358_s2 + $0xf8] sm:$0xff] %v5114_v49  ;;  %v3891_v54 = vmul.f32 %v5114_v49, %v5114_v49 }
 0x21d   : > { %3820 = vst [vmem:[%s6358_s2 + $0xf0] sm:$0xff] %v5115_v3  ;;  %v3851_v36 = vadd.f32 %v5115_v3, %v3850_v34  ;;  %v3890_v7 = vmul.f32 %v5115_v3, %v5115_v3  ;;  %v3920_v41 = vadd.f32 %v3919_v30, %v3889_v53 }
 0x21f   : > { %v3852_v56 = vadd.f32 %v5114_v49, %v3851_v36  ;;  %v3921_v59 = vadd.f32 %v3920_v41, %v3890_v7 }
 0x221   : > { %v3853_v61 = vrot.slane %v3852_v56, 4  ;;  %v3922_v62 = vadd.f32 %v3921_v59, %v3891_v54 }
 0x223   : > { %v3854_v1 = vadd.f32 %v3853_v61, %v3852_v56  ;;  %v3923_v4 = vrot.slane %v3922_v62, 4 }
 0x225   : > { %v3855_v5 = vrot.slane %v3854_v1, 2  ;;  %v3924_v6 = vadd.f32 %v3923_v4, %v3922_v62 }
 0x227   : > { %v3856_v9 = vadd.f32 %v3855_v5, %v3854_v1  ;;  %v3925_v10 = vrot.slane %v3924_v6, 2 }
 0x229   : > { %v3857_v11 = vrot.slane %v3856_v9, 1  ;;  %v3926_v12 = vadd.f32 %v3925_v10, %v3924_v6 }
 0x22b   : > { %v3858_v13 = vadd.f32 %v3857_v11, %v3856_v9  ;;  %v3927_v14 = vrot.slane %v3926_v12, 1 }
 0x22d   : > { %3859 = vst [vmem:[%s235_s22] sm:$0x1] %v3858_v13  ;;  %v3928_v15 = vadd.f32 %v3927_v14, %v3926_v12 }
 0x22f   : > { %3929 = vst [vmem:[%s235_s22 + $0x1] sm:$0x1] %v3928_v15 }
 0x230 PF: > { %s16_s18 = sadd.s32 1, %s5355_s18  }
 0x231   : > { %p13_p4 = scmp.ge.s32.totalorder %s16_s18, 4  }
 0x233   :  { %15 = sbr.rel (!%p13_p4) target bundleno = 1 (0x1), region = 89 }

</bundles_post_ra>
